<compile_context>
chip_gen: v7x
topology: tpu7x:2x2x1
jax: 0.10.0
libtpu: 0.0.40
codegen_flags: <defaults>
</compile_context>

<pallas_src>
import functools

import jax
import jax.numpy as jnp
import numpy as np
from jax.experimental import pallas as pl
from jax.experimental.pallas import tpu as pltpu


def _round_up(x, m):
    return ((x + m - 1) // m) * m


def _pick_chunk(T, Bp, Hp, max_chunk=32, gx_budget_bytes=6 * 1024 * 1024):
    """Timesteps per grid step: large (amortize per-step overhead) but keep the
    per-chunk gate scratch (chunk * Bp * 4Hp * 4 bytes) inside a VMEM budget."""
    per_step = Bp * 4 * Hp * 4
    return int(max(1, min(max_chunk, T, gx_budget_bytes // per_step)))


# Kernel-internal gate order: i, f, o, g  (PyTorch order is i, f, g, o).
# The three sigmoid gates are contiguous -> one wide sigmoid + one tanh.
_GATE_PERM = (0, 1, 3, 2)


def _pad_gate_matrix(w, H, Hp, K, Kp):
    """w: (4H, K) PyTorch gate layout -> (4Hp, Kp) in (i,f,o,g) order,
    padding each gate block independently with zeros."""
    w4 = w.reshape(4, H, K)[jnp.array(_GATE_PERM), :, :]
    w4 = jnp.pad(w4, ((0, 0), (0, Hp - H), (0, Kp - K)))
    return w4.reshape(4 * Hp, Kp)


def _pad_gate_bias(b, H, Hp):
    b4 = b.reshape(4, H)[jnp.array(_GATE_PERM), :]
    b4 = jnp.pad(b4, ((0, 0), (0, Hp - H)))
    return b4.reshape(4 * Hp)


# ----------------------------------------------------------------------------
# Fused LSTM layer kernel: per grid step (one chunk of timesteps)
#   1) gx = x_chunk @ W_ih^T + (b_ih + b_hh)        (one big MXU matmul)
#   2) serial recurrence over the chunk, only h_prev @ W_hh^T on the
#      per-timestep critical path
#   3) (last layer only) h_t @ W_fc^T + b_fc written as the output
# h/c are carried across grid steps in VMEM scratch; padded (tail) timesteps
# are masked so they never advance the state.
# ----------------------------------------------------------------------------
def _lstm_layer_kernel(*refs, chunk, T, fuse_fc):
    if fuse_fc:
        (x_ref, wih_ref, whh_ref, b_ref, h0_ref, c0_ref, wfc_ref, bfc_ref,
         out_ref, hn_ref, cn_ref, gx_sc, h_sc, c_sc) = refs
    else:
        (x_ref, wih_ref, whh_ref, b_ref, h0_ref, c0_ref,
         out_ref, hn_ref, cn_ref, gx_sc, h_sc, c_sc) = refs
        wfc_ref = bfc_ref = None

    Hp = whh_ref.shape[0]
    Bp = h0_ref.shape[0]
    step = pl.program_id(0)

    @pl.when(step == 0)
    def _():
        h_sc[...] = h0_ref[...]
        c_sc[...] = c0_ref[...]

    # (1) Fused input projection for the whole chunk (off the serial path).
    gx_sc[...] = (jnp.dot(x_ref[...], wih_ref[...],
                          preferred_element_type=jnp.float32)
                  + b_ref[...])

    t0 = step * chunk

    def body(t, carry):
        h_prev, c_prev = carry
        r0 = pl.multiple_of(t * Bp, 8)
        gates = gx_sc[pl.ds(r0, Bp), :] + jnp.dot(
            h_prev, whh_ref[...], preferred_element_type=jnp.float32)
        # Gate order i, f, o, g -> one wide sigmoid + one tanh.
        sig = jax.nn.sigmoid(gates[:, 0:3 * Hp])
        i_g = sig[:, 0 * Hp:1 * Hp]
        f_g = sig[:, 1 * Hp:2 * Hp]
        o_g = sig[:, 2 * Hp:3 * Hp]
        g_g = jnp.tanh(gates[:, 3 * Hp:4 * Hp])
        c_new = f_g * c_prev + i_g * g_g
        h_new = o_g * jnp.tanh(c_new)
        # Tail mask: padded timesteps (t0 + t >= T) must not advance h/c.
        m = ((t0 + t) < T).astype(jnp.float32)
        h_new = m * h_new + (1.0 - m) * h_prev
        c_new = m * c_new + (1.0 - m) * c_prev
        if fuse_fc:
            out_ref[pl.ds(r0, Bp), :] = (
                jnp.dot(h_new, wfc_ref[...],
                        preferred_element_type=jnp.float32) + bfc_ref[...])
        else:
            out_ref[pl.ds(r0, Bp), :] = h_new
        return h_new, c_new

    h_f, c_f = jax.lax.fori_loop(0, chunk, body, (h_sc[...], c_sc[...]),
                                 unroll=min(chunk, 8))
    h_sc[...] = h_f
    c_sc[...] = c_f
    hn_ref[...] = h_f
    cn_ref[...] = c_f


def _lstm_layer(x_flat, wih_t, whh_t, bias_row, h0, c0, *, chunk, T, Tp,
                fuse_fc, wfc_t=None, bfc_row=None):
    """One LSTM layer (optionally with the FC head fused).

    x_flat: (Tp*Bp, Dp_in) time-major flattened input.
    Returns (out_flat (Tp*Bp, Hout), h_n (Bp, Hp), c_n (Bp, Hp))."""
    Bp, Hp = h0.shape
    Dp = x_flat.shape[-1]
    G4 = whh_t.shape[-1]
    n_chunks = Tp // chunk
    Hout = wfc_t.shape[-1] if fuse_fc else Hp

    kernel = functools.partial(_lstm_layer_kernel, chunk=chunk, T=T,
                               fuse_fc=fuse_fc)

    in_specs = [
        pl.BlockSpec((chunk * Bp, Dp), lambda s: (s, 0)),
        pl.BlockSpec((Dp, G4), lambda s: (0, 0)),
        pl.BlockSpec((Hp, G4), lambda s: (0, 0)),
        pl.BlockSpec((1, G4), lambda s: (0, 0)),
        pl.BlockSpec((Bp, Hp), lambda s: (0, 0)),
        pl.BlockSpec((Bp, Hp), lambda s: (0, 0)),
    ]
    args = [x_flat, wih_t, whh_t, bias_row, h0, c0]
    if fuse_fc:
        in_specs += [pl.BlockSpec((Hp, Hout), lambda s: (0, 0)),
                     pl.BlockSpec((1, Hout), lambda s: (0, 0))]
        args += [wfc_t, bfc_row]

    out_shape = (jax.ShapeDtypeStruct((Tp * Bp, Hout), jnp.float32),
                 jax.ShapeDtypeStruct((Bp, Hp), jnp.float32),
                 jax.ShapeDtypeStruct((Bp, Hp), jnp.float32))
    out_specs = (pl.BlockSpec((chunk * Bp, Hout), lambda s: (s, 0)),
                 pl.BlockSpec((Bp, Hp), lambda s: (0, 0)),
                 pl.BlockSpec((Bp, Hp), lambda s: (0, 0)))

    scratch = [pltpu.VMEM((chunk * Bp, G4), jnp.float32),
               pltpu.VMEM((Bp, Hp), jnp.float32),
               pltpu.VMEM((Bp, Hp), jnp.float32)]

    # Explicit scoped-VMEM budget: blocks (double-buffered) + scratch + slack.
    blk_bytes = 4 * (chunk * Bp * Dp + Dp * G4 + Hp * G4 + 8 * G4
                     + 4 * Bp * Hp + chunk * Bp * Hout
                     + (Hp * Hout + 8 * Hout if fuse_fc else 0))
    scratch_bytes = 4 * (chunk * Bp * G4 + 2 * Bp * Hp)
    vmem_limit = int(min(max(2 * blk_bytes + scratch_bytes + (4 << 20),
                             32 << 20), 128 << 20))

    return pl.pallas_call(
        kernel,
        out_shape=out_shape,
        grid=(n_chunks,),
        in_specs=in_specs,
        out_specs=out_specs,
        scratch_shapes=scratch,
        compiler_params=pltpu.CompilerParams(
            dimension_semantics=("arbitrary",),
            vmem_limit_bytes=vmem_limit),
    )(*args)


# ----------------------------------------------------------------------------
# Model: parameters + forward (mirrors the PyTorch LSTMModel.forward).
# ----------------------------------------------------------------------------
def init_params(key, input_size, hidden_size, num_layers, output_size):
    """Uniform(-1/sqrt(H), 1/sqrt(H)) init, like nn.LSTM / nn.Linear."""
    params = {}
    bound = 1.0 / jnp.sqrt(jnp.float32(hidden_size))
    for l in range(num_layers):
        d_in = input_size if l == 0 else hidden_size
        key, k1, k2, k3, k4 = jax.random.split(key, 5)
        params[f"w_ih_{l}"] = jax.random.uniform(
            k1, (4 * hidden_size, d_in), jnp.float32, -bound, bound)
        params[f"w_hh_{l}"] = jax.random.uniform(
            k2, (4 * hidden_size, hidden_size), jnp.float32, -bound, bound)
        params[f"b_ih_{l}"] = jax.random.uniform(
            k3, (4 * hidden_size,), jnp.float32, -bound, bound)
        params[f"b_hh_{l}"] = jax.random.uniform(
            k4, (4 * hidden_size,), jnp.float32, -bound, bound)
    key, k5, k6 = jax.random.split(key, 3)
    params["w_fc"] = jax.random.uniform(
        k5, (output_size, hidden_size), jnp.float32, -bound, bound)
    params["b_fc"] = jax.random.uniform(
        k6, (output_size,), jnp.float32, -bound, bound)
    return params


def init_hidden(num_layers, batch_size, hidden_size):
    h0 = jnp.zeros((num_layers, batch_size, hidden_size), jnp.float32)
    c0 = jnp.zeros((num_layers, batch_size, hidden_size), jnp.float32)
    return (h0, c0)


@functools.partial(jax.jit, static_argnames=("num_layers",))
def lstm_model_forward(params, x, hidden, num_layers):
    """x: (B, T, input_size); hidden: (h0, c0) each (num_layers, B, H).

    Returns (out, (h_n, c_n)) with out: (B, T, output_size)."""
    h0_all, c0_all = hidden
    B, T, Din = x.shape
    H = h0_all.shape[-1]
    O = params["w_fc"].shape[0]

    Bp = _round_up(B, 8)        # sublane multiple
    Hp = _round_up(H, 128)      # lane multiple (gate slices stay lane-aligned)
    Dp = _round_up(Din, 128)
    Op = _round_up(O, 128)      # lane-dense FC output
    chunk = _pick_chunk(T, Bp, Hp)
    Tp = _round_up(T, chunk)

    # Time-major, padded input and states; padded lanes/rows are zero and the
    # padded hidden lanes provably stay zero through the recurrence.
    x_tm = jnp.transpose(x, (1, 0, 2))
    x_tm = jnp.pad(x_tm, ((0, Tp - T), (0, Bp - B), (0, Dp - Din)))
    h0_p = jnp.pad(h0_all, ((0, 0), (0, Bp - B), (0, Hp - H)))
    c0_p = jnp.pad(c0_all, ((0, 0), (0, Bp - B), (0, Hp - H)))

    w_fc_t = jnp.pad(params["w_fc"], ((0, Op - O), (0, Hp - H))).T  # (Hp, Op)
    b_fc_row = jnp.pad(params["b_fc"], (0, Op - O)).reshape(1, Op)

    layer_in = x_tm.reshape(Tp * Bp, Dp)              # time-major flattened
    h_ns, c_ns = [], []
    out_flat = None
    for l in range(num_layers):
        d_in = Din if l == 0 else H
        d_in_p = Dp if l == 0 else Hp
        wih_t = _pad_gate_matrix(params[f"w_ih_{l}"], H, Hp,
                                 d_in, d_in_p).T      # (d_in_p, 4Hp)
        whh_t = _pad_gate_matrix(params[f"w_hh_{l}"], H, Hp, H, Hp).T
        bias_row = _pad_gate_bias(params[f"b_ih_{l}"] + params[f"b_hh_{l}"],
                                  H, Hp).reshape(1, -1)
        is_last = (l == num_layers - 1)
        out_l, h_n, c_n = _lstm_layer(
            layer_in, wih_t, whh_t, bias_row, h0_p[l], c0_p[l],
            chunk=chunk, T=T, Tp=Tp, fuse_fc=is_last,
            wfc_t=w_fc_t if is_last else None,
            bfc_row=b_fc_row if is_last else None)
        h_ns.append(h_n)
        c_ns.append(c_n)
        if is_last:
            out_flat = out_l
        else:
            layer_in = out_l

    out = out_flat.reshape(Tp, Bp, Op)[:T, :B, :O]
    out = jnp.transpose(out, (1, 0, 2))               # (B, T, O)
    h_n = jnp.stack(h_ns)[:, :B, :H]
    c_n = jnp.stack(c_ns)[:, :B, :H]
    return out, (h_n, c_n)


# ----------------------------------------------------------------------------
# Pure-JAX reference (same math as PyTorch nn.LSTM + nn.Linear) for checking.
# ----------------------------------------------------------------------------
def _reference_forward(params, x, hidden, num_layers):
    h_all, c_all = hidden
    B, T, _ = x.shape
    H = h_all.shape[-1]
    inp = x
    h_ns, c_ns = [], []
    for l in range(num_layers):
        wih = params[f"w_ih_{l}"]
        whh = params[f"w_hh_{l}"]
        b = params[f"b_ih_{l}"] + params[f"b_hh_{l}"]
        h, c = h_all[l], c_all[l]
        ys = []
        for t in range(T):
            g = inp[:, t, :] @ wih.T + h @ whh.T + b
            i = jax.nn.sigmoid(g[:, 0 * H:1 * H])
            f = jax.nn.sigmoid(g[:, 1 * H:2 * H])
            gg = jnp.tanh(g[:, 2 * H:3 * H])
            o = jax.nn.sigmoid(g[:, 3 * H:4 * H])
            c = f * c + i * gg
            h = o * jnp.tanh(c)
            ys.append(h)
        inp = jnp.stack(ys, axis=1)
        h_ns.append(h)
        c_ns.append(c)
    out = inp @ params["w_fc"].T + params["b_fc"]
    return out, (jnp.stack(h_ns), jnp.stack(c_ns))


def _run_and_check(batch, seq, input_size, hidden_size, num_layers,
                   output_size, seed=0):
    key = jax.random.PRNGKey(seed)
    kx, kp = jax.random.split(key)
    x = jax.random.normal(kx, (batch, seq, input_size), jnp.float32)
    params = init_params(kp, input_size, hidden_size, num_layers, output_size)
    hidden = init_hidden(num_layers, batch, hidden_size)

    out, (h_n, c_n) = lstm_model_forward(params, x, hidden, num_layers)
    jax.block_until_ready((out, h_n, c_n))

    assert out.shape == (batch, seq, output_size)
    assert h_n.shape == (num_layers, batch, hidden_size)
    assert c_n.shape == (num_layers, batch, hidden_size)

    ref_out, (ref_h, ref_c) = _reference_forward(params, x, hidden, num_layers)
    np.testing.assert_allclose(np.asarray(out), np.asarray(ref_out),
                               rtol=2e-3, atol=2e-3)
    np.testing.assert_allclose(np.asarray(h_n), np.asarray(ref_h),
                               rtol=2e-3, atol=2e-3)
    np.testing.assert_allclose(np.asarray(c_n), np.asarray(ref_c),
                               rtol=2e-3, atol=2e-3)


if __name__ == "__main__":
    # Small config matching the module's example scale.
    _run_and_check(batch=2, seq=8, input_size=10, hidden_size=32,
                   num_layers=2, output_size=1)
    # Longer / ragged config to exercise the chunked grid, tail masking and
    # batch / output padding paths.
    _run_and_check(batch=3, seq=40, input_size=10, hidden_size=32,
                   num_layers=2, output_size=2, seed=1)
    print("KERNEL_OK")
</pallas_src>

<mosaic_0001>
module attributes {stable_mosaic.version = 11 : i64} {
  func.func @_lstm_layer_kernel(%arg0: i32, %arg1: memref<64x128xf32, #tpu.memory_space<vmem>>, %arg2: memref<128x512xf32, #tpu.memory_space<vmem>>, %arg3: memref<128x512xf32, #tpu.memory_space<vmem>>, %arg4: memref<1x512xf32, #tpu.memory_space<vmem>>, %arg5: memref<8x128xf32, #tpu.memory_space<vmem>>, %arg6: memref<8x128xf32, #tpu.memory_space<vmem>>, %arg7: memref<64x128xf32, #tpu.memory_space<vmem>>, %arg8: memref<8x128xf32, #tpu.memory_space<vmem>>, %arg9: memref<8x128xf32, #tpu.memory_space<vmem>>, %arg10: memref<64x512xf32, #tpu.memory_space<vmem>>, %arg11: memref<8x128xf32, #tpu.memory_space<vmem>>, %arg12: memref<8x128xf32, #tpu.memory_space<vmem>>) attributes {dimension_semantics = [#tpu.dimension_semantics<arbitrary>], iteration_bounds = array<i64: 1>, scalar_prefetch = 0 : i64, scratch_operands = 3 : i64, tpu.core_type = #tpu.core_type<tc>, window_params = [{transform_indices = @transform_0, window_bounds = array<i64: 64, 128>}, {pipeline_mode = #tpu.pipeline_mode<synchronous>, transform_indices = @transform_1, window_bounds = array<i64: 128, 512>}, {pipeline_mode = #tpu.pipeline_mode<synchronous>, transform_indices = @transform_2, window_bounds = array<i64: 128, 512>}, {pipeline_mode = #tpu.pipeline_mode<synchronous>, transform_indices = @transform_3, window_bounds = array<i64: 1, 512>}, {pipeline_mode = #tpu.pipeline_mode<synchronous>, transform_indices = @transform_4, window_bounds = array<i64: 8, 128>}, {pipeline_mode = #tpu.pipeline_mode<synchronous>, transform_indices = @transform_5, window_bounds = array<i64: 8, 128>}, {transform_indices = @transform_6, window_bounds = array<i64: 64, 128>}, {pipeline_mode = #tpu.pipeline_mode<synchronous>, transform_indices = @transform_7, window_bounds = array<i64: 8, 128>}, {pipeline_mode = #tpu.pipeline_mode<synchronous>, transform_indices = @transform_8, window_bounds = array<i64: 8, 128>}]} {
    %c0_i32 = arith.constant 0 : i32
    %0 = arith.cmpi eq, %arg0, %c0_i32 : i32
    %1 = arith.extui %0 : i1 to i32
    %c0_i32_0 = arith.constant 0 : i32
    %2 = arith.cmpi ne, %1, %c0_i32_0 : i32
    scf.if %2 {
      %c0_102 = arith.constant 0 : index
      %c0_103 = arith.constant 0 : index
      %345 = vector.load %arg5[%c0_102, %c0_103] : memref<8x128xf32, #tpu.memory_space<vmem>>, vector<8x128xf32>
      %c0_104 = arith.constant 0 : index
      %c0_105 = arith.constant 0 : index
      %346 = vector.load %arg11[%c0_104, %c0_105] : memref<8x128xf32, #tpu.memory_space<vmem>>, vector<8x128xf32>
      tpu.vector_store %arg11[%c0_104, %c0_105], %345 {strides = array<i32>} : memref<8x128xf32, #tpu.memory_space<vmem>>, vector<8x128xf32>,
      %c0_106 = arith.constant 0 : index
      %c0_107 = arith.constant 0 : index
      %347 = vector.load %arg6[%c0_106, %c0_107] : memref<8x128xf32, #tpu.memory_space<vmem>>, vector<8x128xf32>
      %c0_108 = arith.constant 0 : index
      %c0_109 = arith.constant 0 : index
      %348 = vector.load %arg12[%c0_108, %c0_109] : memref<8x128xf32, #tpu.memory_space<vmem>>, vector<8x128xf32>
      tpu.vector_store %arg12[%c0_108, %c0_109], %347 {strides = array<i32>} : memref<8x128xf32, #tpu.memory_space<vmem>>, vector<8x128xf32>,
    } else {
    }
    %c0 = arith.constant 0 : index
    %c0_1 = arith.constant 0 : index
    %3 = vector.load %arg1[%c0, %c0_1] : memref<64x128xf32, #tpu.memory_space<vmem>>, vector<64x128xf32>
    %c0_2 = arith.constant 0 : index
    %c0_3 = arith.constant 0 : index
    %4 = vector.load %arg2[%c0_2, %c0_3] : memref<128x512xf32, #tpu.memory_space<vmem>>, vector<128x512xf32>
    %cst = arith.constant dense<0.000000e+00> : vector<64x512xf32>
    %5 = tpu.matmul %3, %4, %cst {dimension_numbers = #tpu.dot_dimension_numbers<[1], [0], [0], [1], [0, 0, 1, 1], [], []>} : vector<64x128xf32>, vector<128x512xf32>, vector<64x512xf32> -> vector<64x512xf32>
    %c0_4 = arith.constant 0 : index
    %c0_5 = arith.constant 0 : index
    %6 = vector.load %arg4[%c0_4, %c0_5] : memref<1x512xf32, #tpu.memory_space<vmem>>, vector<1x512xf32>
    %7 = vector.broadcast %6 : vector<1x512xf32> to vector<64x512xf32>
    %8 = arith.addf %5, %7 : vector<64x512xf32>
    %c0_6 = arith.constant 0 : index
    %c0_7 = arith.constant 0 : index
    %9 = vector.load %arg10[%c0_6, %c0_7] : memref<64x512xf32, #tpu.memory_space<vmem>>, vector<64x512xf32>
    tpu.vector_store %arg10[%c0_6, %c0_7], %8 {strides = array<i32>} : memref<64x512xf32, #tpu.memory_space<vmem>>, vector<64x512xf32>,
    %c8_i32 = arith.constant 8 : i32
    %10 = arith.muli %arg0, %c8_i32 : i32
    %c0_8 = arith.constant 0 : index
    %c0_9 = arith.constant 0 : index
    %11 = vector.load %arg11[%c0_8, %c0_9] : memref<8x128xf32, #tpu.memory_space<vmem>>, vector<8x128xf32>
    %c0_10 = arith.constant 0 : index
    %c0_11 = arith.constant 0 : index
    %12 = vector.load %arg12[%c0_10, %c0_11] : memref<8x128xf32, #tpu.memory_space<vmem>>, vector<8x128xf32>
    %c0_i32_12 = arith.constant 0 : i32
    %c8_i32_13 = arith.constant 8 : i32
    %13 = arith.muli %c0_i32_12, %c8_i32_13 : i32
    %14 = tpu.assume_multiple %13, 8 : i32
    %15 = arith.index_cast %14 : i32 to index
    %c0_14 = arith.constant 0 : index
    %16 = vector.load %arg10[%15, %c0_14] : memref<64x512xf32, #tpu.memory_space<vmem>>, vector<8x512xf32>
    %c0_15 = arith.constant 0 : index
    %c0_16 = arith.constant 0 : index
    %17 = vector.load %arg3[%c0_15, %c0_16] : memref<128x512xf32, #tpu.memory_space<vmem>>, vector<128x512xf32>
    %cst_17 = arith.constant dense<0.000000e+00> : vector<8x512xf32>
    %18 = tpu.matmul %11, %17, %cst_17 {dimension_numbers = #tpu.dot_dimension_numbers<[1], [0], [0], [1], [0, 0, 1, 1], [], []>} : vector<8x128xf32>, vector<128x512xf32>, vector<8x512xf32> -> vector<8x512xf32>
    %19 = arith.addf %16, %18 : vector<8x512xf32>
    %20 = vector.extract_strided_slice %19 {offsets = [0, 0], sizes = [8, 384], strides = [1, 1]} : vector<8x512xf32> to vector<8x384xf32>
    %21 = arith.negf %20 : vector<8x384xf32>
    %22 = math.exp %21 : vector<8x384xf32>
    %cst_18 = arith.constant 1.000000e+00 : f32
    %23 = vector.broadcast %cst_18 : f32 to vector<8x384xf32>
    %24 = arith.addf %23, %22 : vector<8x384xf32>
    %25 = arith.divf %23, %24 : vector<8x384xf32>
    %26 = vector.extract_strided_slice %25 {offsets = [0, 0], sizes = [8, 128], strides = [1, 1]} : vector<8x384xf32> to vector<8x128xf32>
    %27 = vector.extract_strided_slice %25 {offsets = [0, 128], sizes = [8, 128], strides = [1, 1]} : vector<8x384xf32> to vector<8x128xf32>
    %28 = vector.extract_strided_slice %25 {offsets = [0, 256], sizes = [8, 128], strides = [1, 1]} : vector<8x384xf32> to vector<8x128xf32>
    %29 = vector.extract_strided_slice %19 {offsets = [0, 384], sizes = [8, 128], strides = [1, 1]} : vector<8x512xf32> to vector<8x128xf32>
    %30 = math.tanh %29 : vector<8x128xf32>
    %31 = arith.mulf %27, %12 : vector<8x128xf32>
    %32 = arith.mulf %26, %30 : vector<8x128xf32>
    %33 = arith.addf %31, %32 : vector<8x128xf32>
    %34 = math.tanh %33 : vector<8x128xf32>
    %35 = arith.mulf %28, %34 : vector<8x128xf32>
    %36 = arith.addi %10, %c0_i32_12 : i32
    %c8_i32_19 = arith.constant 8 : i32
    %37 = arith.cmpi slt, %36, %c8_i32_19 : i32
    %38 = arith.extui %37 : i1 to i32
    %39 = arith.sitofp %38 : i32 to f32
    %40 = vector.broadcast %39 : f32 to vector<8x128xf32>
    %41 = arith.mulf %40, %35 : vector<8x128xf32>
    %cst_20 = arith.constant 1.000000e+00 : f32
    %42 = arith.subf %cst_20, %39 : f32
    %43 = vector.broadcast %42 : f32 to vector<8x128xf32>
    %44 = arith.mulf %43, %11 : vector<8x128xf32>
    %45 = arith.addf %41, %44 : vector<8x128xf32>
    %46 = vector.broadcast %39 : f32 to vector<8x128xf32>
    %47 = arith.mulf %46, %33 : vector<8x128xf32>
    %cst_21 = arith.constant 1.000000e+00 : f32
    %48 = arith.subf %cst_21, %39 : f32
    %49 = vector.broadcast %48 : f32 to vector<8x128xf32>
    %50 = arith.mulf %49, %12 : vector<8x128xf32>
    %51 = arith.addf %47, %50 : vector<8x128xf32>
    %52 = arith.index_cast %14 : i32 to index
    %c0_22 = arith.constant 0 : index
    %53 = vector.load %arg7[%52, %c0_22] : memref<64x128xf32, #tpu.memory_space<vmem>>, vector<8x128xf32>
    tpu.vector_store %arg7[%52, %c0_22], %45 {strides = array<i32>} : memref<64x128xf32, #tpu.memory_space<vmem>>, vector<8x128xf32>,
    %c1_i32 = arith.constant 1 : i32
    %c8_i32_23 = arith.constant 8 : i32
    %54 = arith.muli %c1_i32, %c8_i32_23 : i32
    %55 = tpu.assume_multiple %54, 8 : i32
    %56 = arith.index_cast %55 : i32 to index
    %c0_24 = arith.constant 0 : index
    %57 = vector.load %arg10[%56, %c0_24] : memref<64x512xf32, #tpu.memory_space<vmem>>, vector<8x512xf32>
    %c0_25 = arith.constant 0 : index
    %c0_26 = arith.constant 0 : index
    %58 = vector.load %arg3[%c0_25, %c0_26] : memref<128x512xf32, #tpu.memory_space<vmem>>, vector<128x512xf32>
    %cst_27 = arith.constant dense<0.000000e+00> : vector<8x512xf32>
    %59 = tpu.matmul %45, %58, %cst_27 {dimension_numbers = #tpu.dot_dimension_numbers<[1], [0], [0], [1], [0, 0, 1, 1], [], []>} : vector<8x128xf32>, vector<128x512xf32>, vector<8x512xf32> -> vector<8x512xf32>
    %60 = arith.addf %57, %59 : vector<8x512xf32>
    %61 = vector.extract_strided_slice %60 {offsets = [0, 0], sizes = [8, 384], strides = [1, 1]} : vector<8x512xf32> to vector<8x384xf32>
    %62 = arith.negf %61 : vector<8x384xf32>
    %63 = math.exp %62 : vector<8x384xf32>
    %cst_28 = arith.constant 1.000000e+00 : f32
    %64 = vector.broadcast %cst_28 : f32 to vector<8x384xf32>
    %65 = arith.addf %64, %63 : vector<8x384xf32>
    %66 = arith.divf %64, %65 : vector<8x384xf32>
    %67 = vector.extract_strided_slice %66 {offsets = [0, 0], sizes = [8, 128], strides = [1, 1]} : vector<8x384xf32> to vector<8x128xf32>
    %68 = vector.extract_strided_slice %66 {offsets = [0, 128], sizes = [8, 128], strides = [1, 1]} : vector<8x384xf32> to vector<8x128xf32>
    %69 = vector.extract_strided_slice %66 {offsets = [0, 256], sizes = [8, 128], strides = [1, 1]} : vector<8x384xf32> to vector<8x128xf32>
    %70 = vector.extract_strided_slice %60 {offsets = [0, 384], sizes = [8, 128], strides = [1, 1]} : vector<8x512xf32> to vector<8x128xf32>
    %71 = math.tanh %70 : vector<8x128xf32>
    %72 = arith.mulf %68, %51 : vector<8x128xf32>
    %73 = arith.mulf %67, %71 : vector<8x128xf32>
    %74 = arith.addf %72, %73 : vector<8x128xf32>
    %75 = math.tanh %74 : vector<8x128xf32>
    %76 = arith.mulf %69, %75 : vector<8x128xf32>
    %77 = arith.addi %10, %c1_i32 : i32
    %c8_i32_29 = arith.constant 8 : i32
    %78 = arith.cmpi slt, %77, %c8_i32_29 : i32
    %79 = arith.extui %78 : i1 to i32
    %80 = arith.sitofp %79 : i32 to f32
    %81 = vector.broadcast %80 : f32 to vector<8x128xf32>
    %82 = arith.mulf %81, %76 : vector<8x128xf32>
    %cst_30 = arith.constant 1.000000e+00 : f32
    %83 = arith.subf %cst_30, %80 : f32
    %84 = vector.broadcast %83 : f32 to vector<8x128xf32>
    %85 = arith.mulf %84, %45 : vector<8x128xf32>
    %86 = arith.addf %82, %85 : vector<8x128xf32>
    %87 = vector.broadcast %80 : f32 to vector<8x128xf32>
    %88 = arith.mulf %87, %74 : vector<8x128xf32>
    %cst_31 = arith.constant 1.000000e+00 : f32
    %89 = arith.subf %cst_31, %80 : f32
    %90 = vector.broadcast %89 : f32 to vector<8x128xf32>
    %91 = arith.mulf %90, %51 : vector<8x128xf32>
    %92 = arith.addf %88, %91 : vector<8x128xf32>
    %93 = arith.index_cast %55 : i32 to index
    %c0_32 = arith.constant 0 : index
    %94 = vector.load %arg7[%93, %c0_32] : memref<64x128xf32, #tpu.memory_space<vmem>>, vector<8x128xf32>
    tpu.vector_store %arg7[%93, %c0_32], %86 {strides = array<i32>} : memref<64x128xf32, #tpu.memory_space<vmem>>, vector<8x128xf32>,
    %c2_i32 = arith.constant 2 : i32
    %c8_i32_33 = arith.constant 8 : i32
    %95 = arith.muli %c2_i32, %c8_i32_33 : i32
    %96 = tpu.assume_multiple %95, 8 : i32
    %97 = arith.index_cast %96 : i32 to index
    %c0_34 = arith.constant 0 : index
    %98 = vector.load %arg10[%97, %c0_34] : memref<64x512xf32, #tpu.memory_space<vmem>>, vector<8x512xf32>
    %c0_35 = arith.constant 0 : index
    %c0_36 = arith.constant 0 : index
    %99 = vector.load %arg3[%c0_35, %c0_36] : memref<128x512xf32, #tpu.memory_space<vmem>>, vector<128x512xf32>
    %cst_37 = arith.constant dense<0.000000e+00> : vector<8x512xf32>
    %100 = tpu.matmul %86, %99, %cst_37 {dimension_numbers = #tpu.dot_dimension_numbers<[1], [0], [0], [1], [0, 0, 1, 1], [], []>} : vector<8x128xf32>, vector<128x512xf32>, vector<8x512xf32> -> vector<8x512xf32>
    %101 = arith.addf %98, %100 : vector<8x512xf32>
    %102 = vector.extract_strided_slice %101 {offsets = [0, 0], sizes = [8, 384], strides = [1, 1]} : vector<8x512xf32> to vector<8x384xf32>
    %103 = arith.negf %102 : vector<8x384xf32>
    %104 = math.exp %103 : vector<8x384xf32>
    %cst_38 = arith.constant 1.000000e+00 : f32
    %105 = vector.broadcast %cst_38 : f32 to vector<8x384xf32>
    %106 = arith.addf %105, %104 : vector<8x384xf32>
    %107 = arith.divf %105, %106 : vector<8x384xf32>
    %108 = vector.extract_strided_slice %107 {offsets = [0, 0], sizes = [8, 128], strides = [1, 1]} : vector<8x384xf32> to vector<8x128xf32>
    %109 = vector.extract_strided_slice %107 {offsets = [0, 128], sizes = [8, 128], strides = [1, 1]} : vector<8x384xf32> to vector<8x128xf32>
    %110 = vector.extract_strided_slice %107 {offsets = [0, 256], sizes = [8, 128], strides = [1, 1]} : vector<8x384xf32> to vector<8x128xf32>
    %111 = vector.extract_strided_slice %101 {offsets = [0, 384], sizes = [8, 128], strides = [1, 1]} : vector<8x512xf32> to vector<8x128xf32>
    %112 = math.tanh %111 : vector<8x128xf32>
    %113 = arith.mulf %109, %92 : vector<8x128xf32>
    %114 = arith.mulf %108, %112 : vector<8x128xf32>
    %115 = arith.addf %113, %114 : vector<8x128xf32>
    %116 = math.tanh %115 : vector<8x128xf32>
    %117 = arith.mulf %110, %116 : vector<8x128xf32>
    %118 = arith.addi %10, %c2_i32 : i32
    %c8_i32_39 = arith.constant 8 : i32
    %119 = arith.cmpi slt, %118, %c8_i32_39 : i32
    %120 = arith.extui %119 : i1 to i32
    %121 = arith.sitofp %120 : i32 to f32
    %122 = vector.broadcast %121 : f32 to vector<8x128xf32>
    %123 = arith.mulf %122, %117 : vector<8x128xf32>
    %cst_40 = arith.constant 1.000000e+00 : f32
    %124 = arith.subf %cst_40, %121 : f32
    %125 = vector.broadcast %124 : f32 to vector<8x128xf32>
    %126 = arith.mulf %125, %86 : vector<8x128xf32>
    %127 = arith.addf %123, %126 : vector<8x128xf32>
    %128 = vector.broadcast %121 : f32 to vector<8x128xf32>
    %129 = arith.mulf %128, %115 : vector<8x128xf32>
    %cst_41 = arith.constant 1.000000e+00 : f32
    %130 = arith.subf %cst_41, %121 : f32
    %131 = vector.broadcast %130 : f32 to vector<8x128xf32>
    %132 = arith.mulf %131, %92 : vector<8x128xf32>
    %133 = arith.addf %129, %132 : vector<8x128xf32>
    %134 = arith.index_cast %96 : i32 to index
    %c0_42 = arith.constant 0 : index
    %135 = vector.load %arg7[%134, %c0_42] : memref<64x128xf32, #tpu.memory_space<vmem>>, vector<8x128xf32>
    tpu.vector_store %arg7[%134, %c0_42], %127 {strides = array<i32>} : memref<64x128xf32, #tpu.memory_space<vmem>>, vector<8x128xf32>,
    %c3_i32 = arith.constant 3 : i32
    %c8_i32_43 = arith.constant 8 : i32
    %136 = arith.muli %c3_i32, %c8_i32_43 : i32
    %137 = tpu.assume_multiple %136, 8 : i32
    %138 = arith.index_cast %137 : i32 to index
    %c0_44 = arith.constant 0 : index
    %139 = vector.load %arg10[%138, %c0_44] : memref<64x512xf32, #tpu.memory_space<vmem>>, vector<8x512xf32>
    %c0_45 = arith.constant 0 : index
    %c0_46 = arith.constant 0 : index
    %140 = vector.load %arg3[%c0_45, %c0_46] : memref<128x512xf32, #tpu.memory_space<vmem>>, vector<128x512xf32>
    %cst_47 = arith.constant dense<0.000000e+00> : vector<8x512xf32>
    %141 = tpu.matmul %127, %140, %cst_47 {dimension_numbers = #tpu.dot_dimension_numbers<[1], [0], [0], [1], [0, 0, 1, 1], [], []>} : vector<8x128xf32>, vector<128x512xf32>, vector<8x512xf32> -> vector<8x512xf32>
    %142 = arith.addf %139, %141 : vector<8x512xf32>
    %143 = vector.extract_strided_slice %142 {offsets = [0, 0], sizes = [8, 384], strides = [1, 1]} : vector<8x512xf32> to vector<8x384xf32>
    %144 = arith.negf %143 : vector<8x384xf32>
    %145 = math.exp %144 : vector<8x384xf32>
    %cst_48 = arith.constant 1.000000e+00 : f32
    %146 = vector.broadcast %cst_48 : f32 to vector<8x384xf32>
    %147 = arith.addf %146, %145 : vector<8x384xf32>
    %148 = arith.divf %146, %147 : vector<8x384xf32>
    %149 = vector.extract_strided_slice %148 {offsets = [0, 0], sizes = [8, 128], strides = [1, 1]} : vector<8x384xf32> to vector<8x128xf32>
    %150 = vector.extract_strided_slice %148 {offsets = [0, 128], sizes = [8, 128], strides = [1, 1]} : vector<8x384xf32> to vector<8x128xf32>
    %151 = vector.extract_strided_slice %148 {offsets = [0, 256], sizes = [8, 128], strides = [1, 1]} : vector<8x384xf32> to vector<8x128xf32>
    %152 = vector.extract_strided_slice %142 {offsets = [0, 384], sizes = [8, 128], strides = [1, 1]} : vector<8x512xf32> to vector<8x128xf32>
    %153 = math.tanh %152 : vector<8x128xf32>
    %154 = arith.mulf %150, %133 : vector<8x128xf32>
    %155 = arith.mulf %149, %153 : vector<8x128xf32>
    %156 = arith.addf %154, %155 : vector<8x128xf32>
    %157 = math.tanh %156 : vector<8x128xf32>
    %158 = arith.mulf %151, %157 : vector<8x128xf32>
    %159 = arith.addi %10, %c3_i32 : i32
    %c8_i32_49 = arith.constant 8 : i32
    %160 = arith.cmpi slt, %159, %c8_i32_49 : i32
    %161 = arith.extui %160 : i1 to i32
    %162 = arith.sitofp %161 : i32 to f32
    %163 = vector.broadcast %162 : f32 to vector<8x128xf32>
    %164 = arith.mulf %163, %158 : vector<8x128xf32>
    %cst_50 = arith.constant 1.000000e+00 : f32
    %165 = arith.subf %cst_50, %162 : f32
    %166 = vector.broadcast %165 : f32 to vector<8x128xf32>
    %167 = arith.mulf %166, %127 : vector<8x128xf32>
    %168 = arith.addf %164, %167 : vector<8x128xf32>
    %169 = vector.broadcast %162 : f32 to vector<8x128xf32>
    %170 = arith.mulf %169, %156 : vector<8x128xf32>
    %cst_51 = arith.constant 1.000000e+00 : f32
    %171 = arith.subf %cst_51, %162 : f32
    %172 = vector.broadcast %171 : f32 to vector<8x128xf32>
    %173 = arith.mulf %172, %133 : vector<8x128xf32>
    %174 = arith.addf %170, %173 : vector<8x128xf32>
    %175 = arith.index_cast %137 : i32 to index
    %c0_52 = arith.constant 0 : index
    %176 = vector.load %arg7[%175, %c0_52] : memref<64x128xf32, #tpu.memory_space<vmem>>, vector<8x128xf32>
    tpu.vector_store %arg7[%175, %c0_52], %168 {strides = array<i32>} : memref<64x128xf32, #tpu.memory_space<vmem>>, vector<8x128xf32>,
    %c4_i32 = arith.constant 4 : i32
    %c8_i32_53 = arith.constant 8 : i32
    %177 = arith.muli %c4_i32, %c8_i32_53 : i32
    %178 = tpu.assume_multiple %177, 8 : i32
    %179 = arith.index_cast %178 : i32 to index
    %c0_54 = arith.constant 0 : index
    %180 = vector.load %arg10[%179, %c0_54] : memref<64x512xf32, #tpu.memory_space<vmem>>, vector<8x512xf32>
    %c0_55 = arith.constant 0 : index
    %c0_56 = arith.constant 0 : index
    %181 = vector.load %arg3[%c0_55, %c0_56] : memref<128x512xf32, #tpu.memory_space<vmem>>, vector<128x512xf32>
    %cst_57 = arith.constant dense<0.000000e+00> : vector<8x512xf32>
    %182 = tpu.matmul %168, %181, %cst_57 {dimension_numbers = #tpu.dot_dimension_numbers<[1], [0], [0], [1], [0, 0, 1, 1], [], []>} : vector<8x128xf32>, vector<128x512xf32>, vector<8x512xf32> -> vector<8x512xf32>
    %183 = arith.addf %180, %182 : vector<8x512xf32>
    %184 = vector.extract_strided_slice %183 {offsets = [0, 0], sizes = [8, 384], strides = [1, 1]} : vector<8x512xf32> to vector<8x384xf32>
    %185 = arith.negf %184 : vector<8x384xf32>
    %186 = math.exp %185 : vector<8x384xf32>
    %cst_58 = arith.constant 1.000000e+00 : f32
    %187 = vector.broadcast %cst_58 : f32 to vector<8x384xf32>
    %188 = arith.addf %187, %186 : vector<8x384xf32>
    %189 = arith.divf %187, %188 : vector<8x384xf32>
    %190 = vector.extract_strided_slice %189 {offsets = [0, 0], sizes = [8, 128], strides = [1, 1]} : vector<8x384xf32> to vector<8x128xf32>
    %191 = vector.extract_strided_slice %189 {offsets = [0, 128], sizes = [8, 128], strides = [1, 1]} : vector<8x384xf32> to vector<8x128xf32>
    %192 = vector.extract_strided_slice %189 {offsets = [0, 256], sizes = [8, 128], strides = [1, 1]} : vector<8x384xf32> to vector<8x128xf32>
    %193 = vector.extract_strided_slice %183 {offsets = [0, 384], sizes = [8, 128], strides = [1, 1]} : vector<8x512xf32> to vector<8x128xf32>
    %194 = math.tanh %193 : vector<8x128xf32>
    %195 = arith.mulf %191, %174 : vector<8x128xf32>
    %196 = arith.mulf %190, %194 : vector<8x128xf32>
    %197 = arith.addf %195, %196 : vector<8x128xf32>
    %198 = math.tanh %197 : vector<8x128xf32>
    %199 = arith.mulf %192, %198 : vector<8x128xf32>
    %200 = arith.addi %10, %c4_i32 : i32
    %c8_i32_59 = arith.constant 8 : i32
    %201 = arith.cmpi slt, %200, %c8_i32_59 : i32
    %202 = arith.extui %201 : i1 to i32
    %203 = arith.sitofp %202 : i32 to f32
    %204 = vector.broadcast %203 : f32 to vector<8x128xf32>
    %205 = arith.mulf %204, %199 : vector<8x128xf32>
    %cst_60 = arith.constant 1.000000e+00 : f32
    %206 = arith.subf %cst_60, %203 : f32
    %207 = vector.broadcast %206 : f32 to vector<8x128xf32>
    %208 = arith.mulf %207, %168 : vector<8x128xf32>
    %209 = arith.addf %205, %208 : vector<8x128xf32>
    %210 = vector.broadcast %203 : f32 to vector<8x128xf32>
    %211 = arith.mulf %210, %197 : vector<8x128xf32>
    %cst_61 = arith.constant 1.000000e+00 : f32
    %212 = arith.subf %cst_61, %203 : f32
    %213 = vector.broadcast %212 : f32 to vector<8x128xf32>
    %214 = arith.mulf %213, %174 : vector<8x128xf32>
    %215 = arith.addf %211, %214 : vector<8x128xf32>
    %216 = arith.index_cast %178 : i32 to index
    %c0_62 = arith.constant 0 : index
    %217 = vector.load %arg7[%216, %c0_62] : memref<64x128xf32, #tpu.memory_space<vmem>>, vector<8x128xf32>
    tpu.vector_store %arg7[%216, %c0_62], %209 {strides = array<i32>} : memref<64x128xf32, #tpu.memory_space<vmem>>, vector<8x128xf32>,
    %c5_i32 = arith.constant 5 : i32
    %c8_i32_63 = arith.constant 8 : i32
    %218 = arith.muli %c5_i32, %c8_i32_63 : i32
    %219 = tpu.assume_multiple %218, 8 : i32
    %220 = arith.index_cast %219 : i32 to index
    %c0_64 = arith.constant 0 : index
    %221 = vector.load %arg10[%220, %c0_64] : memref<64x512xf32, #tpu.memory_space<vmem>>, vector<8x512xf32>
    %c0_65 = arith.constant 0 : index
    %c0_66 = arith.constant 0 : index
    %222 = vector.load %arg3[%c0_65, %c0_66] : memref<128x512xf32, #tpu.memory_space<vmem>>, vector<128x512xf32>
    %cst_67 = arith.constant dense<0.000000e+00> : vector<8x512xf32>
    %223 = tpu.matmul %209, %222, %cst_67 {dimension_numbers = #tpu.dot_dimension_numbers<[1], [0], [0], [1], [0, 0, 1, 1], [], []>} : vector<8x128xf32>, vector<128x512xf32>, vector<8x512xf32> -> vector<8x512xf32>
    %224 = arith.addf %221, %223 : vector<8x512xf32>
    %225 = vector.extract_strided_slice %224 {offsets = [0, 0], sizes = [8, 384], strides = [1, 1]} : vector<8x512xf32> to vector<8x384xf32>
    %226 = arith.negf %225 : vector<8x384xf32>
    %227 = math.exp %226 : vector<8x384xf32>
    %cst_68 = arith.constant 1.000000e+00 : f32
    %228 = vector.broadcast %cst_68 : f32 to vector<8x384xf32>
    %229 = arith.addf %228, %227 : vector<8x384xf32>
    %230 = arith.divf %228, %229 : vector<8x384xf32>
    %231 = vector.extract_strided_slice %230 {offsets = [0, 0], sizes = [8, 128], strides = [1, 1]} : vector<8x384xf32> to vector<8x128xf32>
    %232 = vector.extract_strided_slice %230 {offsets = [0, 128], sizes = [8, 128], strides = [1, 1]} : vector<8x384xf32> to vector<8x128xf32>
    %233 = vector.extract_strided_slice %230 {offsets = [0, 256], sizes = [8, 128], strides = [1, 1]} : vector<8x384xf32> to vector<8x128xf32>
    %234 = vector.extract_strided_slice %224 {offsets = [0, 384], sizes = [8, 128], strides = [1, 1]} : vector<8x512xf32> to vector<8x128xf32>
    %235 = math.tanh %234 : vector<8x128xf32>
    %236 = arith.mulf %232, %215 : vector<8x128xf32>
    %237 = arith.mulf %231, %235 : vector<8x128xf32>
    %238 = arith.addf %236, %237 : vector<8x128xf32>
    %239 = math.tanh %238 : vector<8x128xf32>
    %240 = arith.mulf %233, %239 : vector<8x128xf32>
    %241 = arith.addi %10, %c5_i32 : i32
    %c8_i32_69 = arith.constant 8 : i32
    %242 = arith.cmpi slt, %241, %c8_i32_69 : i32
    %243 = arith.extui %242 : i1 to i32
    %244 = arith.sitofp %243 : i32 to f32
    %245 = vector.broadcast %244 : f32 to vector<8x128xf32>
    %246 = arith.mulf %245, %240 : vector<8x128xf32>
    %cst_70 = arith.constant 1.000000e+00 : f32
    %247 = arith.subf %cst_70, %244 : f32
    %248 = vector.broadcast %247 : f32 to vector<8x128xf32>
    %249 = arith.mulf %248, %209 : vector<8x128xf32>
    %250 = arith.addf %246, %249 : vector<8x128xf32>
    %251 = vector.broadcast %244 : f32 to vector<8x128xf32>
    %252 = arith.mulf %251, %238 : vector<8x128xf32>
    %cst_71 = arith.constant 1.000000e+00 : f32
    %253 = arith.subf %cst_71, %244 : f32
    %254 = vector.broadcast %253 : f32 to vector<8x128xf32>
    %255 = arith.mulf %254, %215 : vector<8x128xf32>
    %256 = arith.addf %252, %255 : vector<8x128xf32>
    %257 = arith.index_cast %219 : i32 to index
    %c0_72 = arith.constant 0 : index
    %258 = vector.load %arg7[%257, %c0_72] : memref<64x128xf32, #tpu.memory_space<vmem>>, vector<8x128xf32>
    tpu.vector_store %arg7[%257, %c0_72], %250 {strides = array<i32>} : memref<64x128xf32, #tpu.memory_space<vmem>>, vector<8x128xf32>,
    %c6_i32 = arith.constant 6 : i32
    %c8_i32_73 = arith.constant 8 : i32
    %259 = arith.muli %c6_i32, %c8_i32_73 : i32
    %260 = tpu.assume_multiple %259, 8 : i32
    %261 = arith.index_cast %260 : i32 to index
    %c0_74 = arith.constant 0 : index
    %262 = vector.load %arg10[%261, %c0_74] : memref<64x512xf32, #tpu.memory_space<vmem>>, vector<8x512xf32>
    %c0_75 = arith.constant 0 : index
    %c0_76 = arith.constant 0 : index
    %263 = vector.load %arg3[%c0_75, %c0_76] : memref<128x512xf32, #tpu.memory_space<vmem>>, vector<128x512xf32>
    %cst_77 = arith.constant dense<0.000000e+00> : vector<8x512xf32>
    %264 = tpu.matmul %250, %263, %cst_77 {dimension_numbers = #tpu.dot_dimension_numbers<[1], [0], [0], [1], [0, 0, 1, 1], [], []>} : vector<8x128xf32>, vector<128x512xf32>, vector<8x512xf32> -> vector<8x512xf32>
    %265 = arith.addf %262, %264 : vector<8x512xf32>
    %266 = vector.extract_strided_slice %265 {offsets = [0, 0], sizes = [8, 384], strides = [1, 1]} : vector<8x512xf32> to vector<8x384xf32>
    %267 = arith.negf %266 : vector<8x384xf32>
    %268 = math.exp %267 : vector<8x384xf32>
    %cst_78 = arith.constant 1.000000e+00 : f32
    %269 = vector.broadcast %cst_78 : f32 to vector<8x384xf32>
    %270 = arith.addf %269, %268 : vector<8x384xf32>
    %271 = arith.divf %269, %270 : vector<8x384xf32>
    %272 = vector.extract_strided_slice %271 {offsets = [0, 0], sizes = [8, 128], strides = [1, 1]} : vector<8x384xf32> to vector<8x128xf32>
    %273 = vector.extract_strided_slice %271 {offsets = [0, 128], sizes = [8, 128], strides = [1, 1]} : vector<8x384xf32> to vector<8x128xf32>
    %274 = vector.extract_strided_slice %271 {offsets = [0, 256], sizes = [8, 128], strides = [1, 1]} : vector<8x384xf32> to vector<8x128xf32>
    %275 = vector.extract_strided_slice %265 {offsets = [0, 384], sizes = [8, 128], strides = [1, 1]} : vector<8x512xf32> to vector<8x128xf32>
    %276 = math.tanh %275 : vector<8x128xf32>
    %277 = arith.mulf %273, %256 : vector<8x128xf32>
    %278 = arith.mulf %272, %276 : vector<8x128xf32>
    %279 = arith.addf %277, %278 : vector<8x128xf32>
    %280 = math.tanh %279 : vector<8x128xf32>
    %281 = arith.mulf %274, %280 : vector<8x128xf32>
    %282 = arith.addi %10, %c6_i32 : i32
    %c8_i32_79 = arith.constant 8 : i32
    %283 = arith.cmpi slt, %282, %c8_i32_79 : i32
    %284 = arith.extui %283 : i1 to i32
    %285 = arith.sitofp %284 : i32 to f32
    %286 = vector.broadcast %285 : f32 to vector<8x128xf32>
    %287 = arith.mulf %286, %281 : vector<8x128xf32>
    %cst_80 = arith.constant 1.000000e+00 : f32
    %288 = arith.subf %cst_80, %285 : f32
    %289 = vector.broadcast %288 : f32 to vector<8x128xf32>
    %290 = arith.mulf %289, %250 : vector<8x128xf32>
    %291 = arith.addf %287, %290 : vector<8x128xf32>
    %292 = vector.broadcast %285 : f32 to vector<8x128xf32>
    %293 = arith.mulf %292, %279 : vector<8x128xf32>
    %cst_81 = arith.constant 1.000000e+00 : f32
    %294 = arith.subf %cst_81, %285 : f32
    %295 = vector.broadcast %294 : f32 to vector<8x128xf32>
    %296 = arith.mulf %295, %256 : vector<8x128xf32>
    %297 = arith.addf %293, %296 : vector<8x128xf32>
    %298 = arith.index_cast %260 : i32 to index
    %c0_82 = arith.constant 0 : index
    %299 = vector.load %arg7[%298, %c0_82] : memref<64x128xf32, #tpu.memory_space<vmem>>, vector<8x128xf32>
    tpu.vector_store %arg7[%298, %c0_82], %291 {strides = array<i32>} : memref<64x128xf32, #tpu.memory_space<vmem>>, vector<8x128xf32>,
    %c7_i32 = arith.constant 7 : i32
    %c8_i32_83 = arith.constant 8 : i32
    %300 = arith.muli %c7_i32, %c8_i32_83 : i32
    %301 = tpu.assume_multiple %300, 8 : i32
    %302 = arith.index_cast %301 : i32 to index
    %c0_84 = arith.constant 0 : index
    %303 = vector.load %arg10[%302, %c0_84] : memref<64x512xf32, #tpu.memory_space<vmem>>, vector<8x512xf32>
    %c0_85 = arith.constant 0 : index
    %c0_86 = arith.constant 0 : index
    %304 = vector.load %arg3[%c0_85, %c0_86] : memref<128x512xf32, #tpu.memory_space<vmem>>, vector<128x512xf32>
    %cst_87 = arith.constant dense<0.000000e+00> : vector<8x512xf32>
    %305 = tpu.matmul %291, %304, %cst_87 {dimension_numbers = #tpu.dot_dimension_numbers<[1], [0], [0], [1], [0, 0, 1, 1], [], []>} : vector<8x128xf32>, vector<128x512xf32>, vector<8x512xf32> -> vector<8x512xf32>
    %306 = arith.addf %303, %305 : vector<8x512xf32>
    %307 = vector.extract_strided_slice %306 {offsets = [0, 0], sizes = [8, 384], strides = [1, 1]} : vector<8x512xf32> to vector<8x384xf32>
    %308 = arith.negf %307 : vector<8x384xf32>
    %309 = math.exp %308 : vector<8x384xf32>
    %cst_88 = arith.constant 1.000000e+00 : f32
    %310 = vector.broadcast %cst_88 : f32 to vector<8x384xf32>
    %311 = arith.addf %310, %309 : vector<8x384xf32>
    %312 = arith.divf %310, %311 : vector<8x384xf32>
    %313 = vector.extract_strided_slice %312 {offsets = [0, 0], sizes = [8, 128], strides = [1, 1]} : vector<8x384xf32> to vector<8x128xf32>
    %314 = vector.extract_strided_slice %312 {offsets = [0, 128], sizes = [8, 128], strides = [1, 1]} : vector<8x384xf32> to vector<8x128xf32>
    %315 = vector.extract_strided_slice %312 {offsets = [0, 256], sizes = [8, 128], strides = [1, 1]} : vector<8x384xf32> to vector<8x128xf32>
    %316 = vector.extract_strided_slice %306 {offsets = [0, 384], sizes = [8, 128], strides = [1, 1]} : vector<8x512xf32> to vector<8x128xf32>
    %317 = math.tanh %316 : vector<8x128xf32>
    %318 = arith.mulf %314, %297 : vector<8x128xf32>
    %319 = arith.mulf %313, %317 : vector<8x128xf32>
    %320 = arith.addf %318, %319 : vector<8x128xf32>
    %321 = math.tanh %320 : vector<8x128xf32>
    %322 = arith.mulf %315, %321 : vector<8x128xf32>
    %323 = arith.addi %10, %c7_i32 : i32
    %c8_i32_89 = arith.constant 8 : i32
    %324 = arith.cmpi slt, %323, %c8_i32_89 : i32
    %325 = arith.extui %324 : i1 to i32
    %326 = arith.sitofp %325 : i32 to f32
    %327 = vector.broadcast %326 : f32 to vector<8x128xf32>
    %328 = arith.mulf %327, %322 : vector<8x128xf32>
    %cst_90 = arith.constant 1.000000e+00 : f32
    %329 = arith.subf %cst_90, %326 : f32
    %330 = vector.broadcast %329 : f32 to vector<8x128xf32>
    %331 = arith.mulf %330, %291 : vector<8x128xf32>
    %332 = arith.addf %328, %331 : vector<8x128xf32>
    %333 = vector.broadcast %326 : f32 to vector<8x128xf32>
    %334 = arith.mulf %333, %320 : vector<8x128xf32>
    %cst_91 = arith.constant 1.000000e+00 : f32
    %335 = arith.subf %cst_91, %326 : f32
    %336 = vector.broadcast %335 : f32 to vector<8x128xf32>
    %337 = arith.mulf %336, %297 : vector<8x128xf32>
    %338 = arith.addf %334, %337 : vector<8x128xf32>
    %339 = arith.index_cast %301 : i32 to index
    %c0_92 = arith.constant 0 : index
    %340 = vector.load %arg7[%339, %c0_92] : memref<64x128xf32, #tpu.memory_space<vmem>>, vector<8x128xf32>
    tpu.vector_store %arg7[%339, %c0_92], %332 {strides = array<i32>} : memref<64x128xf32, #tpu.memory_space<vmem>>, vector<8x128xf32>,
    %c8_i32_93 = arith.constant 8 : i32
    %c0_94 = arith.constant 0 : index
    %c0_95 = arith.constant 0 : index
    %341 = vector.load %arg11[%c0_94, %c0_95] : memref<8x128xf32, #tpu.memory_space<vmem>>, vector<8x128xf32>
    tpu.vector_store %arg11[%c0_94, %c0_95], %332 {strides = array<i32>} : memref<8x128xf32, #tpu.memory_space<vmem>>, vector<8x128xf32>,
    %c0_96 = arith.constant 0 : index
    %c0_97 = arith.constant 0 : index
    %342 = vector.load %arg12[%c0_96, %c0_97] : memref<8x128xf32, #tpu.memory_space<vmem>>, vector<8x128xf32>
    tpu.vector_store %arg12[%c0_96, %c0_97], %338 {strides = array<i32>} : memref<8x128xf32, #tpu.memory_space<vmem>>, vector<8x128xf32>,
    %c0_98 = arith.constant 0 : index
    %c0_99 = arith.constant 0 : index
    %343 = vector.load %arg8[%c0_98, %c0_99] : memref<8x128xf32, #tpu.memory_space<vmem>>, vector<8x128xf32>
    tpu.vector_store %arg8[%c0_98, %c0_99], %332 {strides = array<i32>} : memref<8x128xf32, #tpu.memory_space<vmem>>, vector<8x128xf32>,
    %c0_100 = arith.constant 0 : index
    %c0_101 = arith.constant 0 : index
    %344 = vector.load %arg9[%c0_100, %c0_101] : memref<8x128xf32, #tpu.memory_space<vmem>>, vector<8x128xf32>
    tpu.vector_store %arg9[%c0_100, %c0_101], %338 {strides = array<i32>} : memref<8x128xf32, #tpu.memory_space<vmem>>, vector<8x128xf32>,
    return
  }
  func.func @transform_0(%arg0: i32) -> (i32, i32) {
    %c0_i32 = arith.constant 0 : i32
    %c0_i32_0 = arith.constant 0 : i32
    return %arg0, %c0_i32 : i32, i32
  }
  func.func @transform_1(%arg0: i32) -> (i32, i32) {
    %c0_i32 = arith.constant 0 : i32
    %c0_i32_0 = arith.constant 0 : i32
    %c0_i32_1 = arith.constant 0 : i32
    return %c0_i32, %c0_i32_0 : i32, i32
  }
  func.func @transform_2(%arg0: i32) -> (i32, i32) {
    %c0_i32 = arith.constant 0 : i32
    %c0_i32_0 = arith.constant 0 : i32
    %c0_i32_1 = arith.constant 0 : i32
    return %c0_i32, %c0_i32_0 : i32, i32
  }
  func.func @transform_3(%arg0: i32) -> (i32, i32) {
    %c0_i32 = arith.constant 0 : i32
    %c0_i32_0 = arith.constant 0 : i32
    %c0_i32_1 = arith.constant 0 : i32
    return %c0_i32, %c0_i32_0 : i32, i32
  }
  func.func @transform_4(%arg0: i32) -> (i32, i32) {
    %c0_i32 = arith.constant 0 : i32
    %c0_i32_0 = arith.constant 0 : i32
    %c0_i32_1 = arith.constant 0 : i32
    return %c0_i32, %c0_i32_0 : i32, i32
  }
  func.func @transform_5(%arg0: i32) -> (i32, i32) {
    %c0_i32 = arith.constant 0 : i32
    %c0_i32_0 = arith.constant 0 : i32
    %c0_i32_1 = arith.constant 0 : i32
    return %c0_i32, %c0_i32_0 : i32, i32
  }
  func.func @transform_6(%arg0: i32) -> (i32, i32) {
    %c0_i32 = arith.constant 0 : i32
    %c0_i32_0 = arith.constant 0 : i32
    return %arg0, %c0_i32 : i32, i32
  }
  func.func @transform_7(%arg0: i32) -> (i32, i32) {
    %c0_i32 = arith.constant 0 : i32
    %c0_i32_0 = arith.constant 0 : i32
    %c0_i32_1 = arith.constant 0 : i32
    return %c0_i32, %c0_i32_0 : i32, i32
  }
  func.func @transform_8(%arg0: i32) -> (i32, i32) {
    %c0_i32 = arith.constant 0 : i32
    %c0_i32_0 = arith.constant 0 : i32
    %c0_i32_1 = arith.constant 0 : i32
    return %c0_i32, %c0_i32_0 : i32, i32
  }
}

module attributes {stable_mosaic.version = 11 : i64} {
  func.func @_lstm_layer_kernel(%arg0: i32, %arg1: memref<64x128xf32, #tpu.memory_space<vmem>>, %arg2: memref<128x512xf32, #tpu.memory_space<vmem>>, %arg3: memref<128x512xf32, #tpu.memory_space<vmem>>, %arg4: memref<1x512xf32, #tpu.memory_space<vmem>>, %arg5: memref<8x128xf32, #tpu.memory_space<vmem>>, %arg6: memref<8x128xf32, #tpu.memory_space<vmem>>, %arg7: memref<128x128xf32, #tpu.memory_space<vmem>>, %arg8: memref<1x128xf32, #tpu.memory_space<vmem>>, %arg9: memref<64x128xf32, #tpu.memory_space<vmem>>, %arg10: memref<8x128xf32, #tpu.memory_space<vmem>>, %arg11: memref<8x128xf32, #tpu.memory_space<vmem>>, %arg12: memref<64x512xf32, #tpu.memory_space<vmem>>, %arg13: memref<8x128xf32, #tpu.memory_space<vmem>>, %arg14: memref<8x128xf32, #tpu.memory_space<vmem>>) attributes {dimension_semantics = [#tpu.dimension_semantics<arbitrary>], iteration_bounds = array<i64: 1>, scalar_prefetch = 0 : i64, scratch_operands = 3 : i64, tpu.core_type = #tpu.core_type<tc>, window_params = [{transform_indices = @transform_0, window_bounds = array<i64: 64, 128>}, {pipeline_mode = #tpu.pipeline_mode<synchronous>, transform_indices = @transform_1, window_bounds = array<i64: 128, 512>}, {pipeline_mode = #tpu.pipeline_mode<synchronous>, transform_indices = @transform_2, window_bounds = array<i64: 128, 512>}, {pipeline_mode = #tpu.pipeline_mode<synchronous>, transform_indices = @transform_3, window_bounds = array<i64: 1, 512>}, {pipeline_mode = #tpu.pipeline_mode<synchronous>, transform_indices = @transform_4, window_bounds = array<i64: 8, 128>}, {pipeline_mode = #tpu.pipeline_mode<synchronous>, transform_indices = @transform_5, window_bounds = array<i64: 8, 128>}, {pipeline_mode = #tpu.pipeline_mode<synchronous>, transform_indices = @transform_6, window_bounds = array<i64: 128, 128>}, {pipeline_mode = #tpu.pipeline_mode<synchronous>, transform_indices = @transform_7, window_bounds = array<i64: 1, 128>}, {transform_indices = @transform_8, window_bounds = array<i64: 64, 128>}, {pipeline_mode = #tpu.pipeline_mode<synchronous>, transform_indices = @transform_9, window_bounds = array<i64: 8, 128>}, {pipeline_mode = #tpu.pipeline_mode<synchronous>, transform_indices = @transform_10, window_bounds = array<i64: 8, 128>}]} {
    %c0_i32 = arith.constant 0 : i32
    %0 = arith.cmpi eq, %arg0, %c0_i32 : i32
    %1 = arith.extui %0 : i1 to i32
    %c0_i32_0 = arith.constant 0 : i32
    %2 = arith.cmpi ne, %1, %c0_i32_0 : i32
    scf.if %2 {
      %c0_142 = arith.constant 0 : index
      %c0_143 = arith.constant 0 : index
      %385 = vector.load %arg5[%c0_142, %c0_143] : memref<8x128xf32, #tpu.memory_space<vmem>>, vector<8x128xf32>
      %c0_144 = arith.constant 0 : index
      %c0_145 = arith.constant 0 : index
      %386 = vector.load %arg13[%c0_144, %c0_145] : memref<8x128xf32, #tpu.memory_space<vmem>>, vector<8x128xf32>
      tpu.vector_store %arg13[%c0_144, %c0_145], %385 {strides = array<i32>} : memref<8x128xf32, #tpu.memory_space<vmem>>, vector<8x128xf32>,
      %c0_146 = arith.constant 0 : index
      %c0_147 = arith.constant 0 : index
      %387 = vector.load %arg6[%c0_146, %c0_147] : memref<8x128xf32, #tpu.memory_space<vmem>>, vector<8x128xf32>
      %c0_148 = arith.constant 0 : index
      %c0_149 = arith.constant 0 : index
      %388 = vector.load %arg14[%c0_148, %c0_149] : memref<8x128xf32, #tpu.memory_space<vmem>>, vector<8x128xf32>
      tpu.vector_store %arg14[%c0_148, %c0_149], %387 {strides = array<i32>} : memref<8x128xf32, #tpu.memory_space<vmem>>, vector<8x128xf32>,
    } else {
    }
    %c0 = arith.constant 0 : index
    %c0_1 = arith.constant 0 : index
    %3 = vector.load %arg1[%c0, %c0_1] : memref<64x128xf32, #tpu.memory_space<vmem>>, vector<64x128xf32>
    %c0_2 = arith.constant 0 : index
    %c0_3 = arith.constant 0 : index
    %4 = vector.load %arg2[%c0_2, %c0_3] : memref<128x512xf32, #tpu.memory_space<vmem>>, vector<128x512xf32>
    %cst = arith.constant dense<0.000000e+00> : vector<64x512xf32>
    %5 = tpu.matmul %3, %4, %cst {dimension_numbers = #tpu.dot_dimension_numbers<[1], [0], [0], [1], [0, 0, 1, 1], [], []>} : vector<64x128xf32>, vector<128x512xf32>, vector<64x512xf32> -> vector<64x512xf32>
    %c0_4 = arith.constant 0 : index
    %c0_5 = arith.constant 0 : index
    %6 = vector.load %arg4[%c0_4, %c0_5] : memref<1x512xf32, #tpu.memory_space<vmem>>, vector<1x512xf32>
    %7 = vector.broadcast %6 : vector<1x512xf32> to vector<64x512xf32>
    %8 = arith.addf %5, %7 : vector<64x512xf32>
    %c0_6 = arith.constant 0 : index
    %c0_7 = arith.constant 0 : index
    %9 = vector.load %arg12[%c0_6, %c0_7] : memref<64x512xf32, #tpu.memory_space<vmem>>, vector<64x512xf32>
    tpu.vector_store %arg12[%c0_6, %c0_7], %8 {strides = array<i32>} : memref<64x512xf32, #tpu.memory_space<vmem>>, vector<64x512xf32>,
    %c8_i32 = arith.constant 8 : i32
    %10 = arith.muli %arg0, %c8_i32 : i32
    %c0_8 = arith.constant 0 : index
    %c0_9 = arith.constant 0 : index
    %11 = vector.load %arg13[%c0_8, %c0_9] : memref<8x128xf32, #tpu.memory_space<vmem>>, vector<8x128xf32>
    %c0_10 = arith.constant 0 : index
    %c0_11 = arith.constant 0 : index
    %12 = vector.load %arg14[%c0_10, %c0_11] : memref<8x128xf32, #tpu.memory_space<vmem>>, vector<8x128xf32>
    %c0_i32_12 = arith.constant 0 : i32
    %c8_i32_13 = arith.constant 8 : i32
    %13 = arith.muli %c0_i32_12, %c8_i32_13 : i32
    %14 = tpu.assume_multiple %13, 8 : i32
    %15 = arith.index_cast %14 : i32 to index
    %c0_14 = arith.constant 0 : index
    %16 = vector.load %arg12[%15, %c0_14] : memref<64x512xf32, #tpu.memory_space<vmem>>, vector<8x512xf32>
    %c0_15 = arith.constant 0 : index
    %c0_16 = arith.constant 0 : index
    %17 = vector.load %arg3[%c0_15, %c0_16] : memref<128x512xf32, #tpu.memory_space<vmem>>, vector<128x512xf32>
    %cst_17 = arith.constant dense<0.000000e+00> : vector<8x512xf32>
    %18 = tpu.matmul %11, %17, %cst_17 {dimension_numbers = #tpu.dot_dimension_numbers<[1], [0], [0], [1], [0, 0, 1, 1], [], []>} : vector<8x128xf32>, vector<128x512xf32>, vector<8x512xf32> -> vector<8x512xf32>
    %19 = arith.addf %16, %18 : vector<8x512xf32>
    %20 = vector.extract_strided_slice %19 {offsets = [0, 0], sizes = [8, 384], strides = [1, 1]} : vector<8x512xf32> to vector<8x384xf32>
    %21 = arith.negf %20 : vector<8x384xf32>
    %22 = math.exp %21 : vector<8x384xf32>
    %cst_18 = arith.constant 1.000000e+00 : f32
    %23 = vector.broadcast %cst_18 : f32 to vector<8x384xf32>
    %24 = arith.addf %23, %22 : vector<8x384xf32>
    %25 = arith.divf %23, %24 : vector<8x384xf32>
    %26 = vector.extract_strided_slice %25 {offsets = [0, 0], sizes = [8, 128], strides = [1, 1]} : vector<8x384xf32> to vector<8x128xf32>
    %27 = vector.extract_strided_slice %25 {offsets = [0, 128], sizes = [8, 128], strides = [1, 1]} : vector<8x384xf32> to vector<8x128xf32>
    %28 = vector.extract_strided_slice %25 {offsets = [0, 256], sizes = [8, 128], strides = [1, 1]} : vector<8x384xf32> to vector<8x128xf32>
    %29 = vector.extract_strided_slice %19 {offsets = [0, 384], sizes = [8, 128], strides = [1, 1]} : vector<8x512xf32> to vector<8x128xf32>
    %30 = math.tanh %29 : vector<8x128xf32>
    %31 = arith.mulf %27, %12 : vector<8x128xf32>
    %32 = arith.mulf %26, %30 : vector<8x128xf32>
    %33 = arith.addf %31, %32 : vector<8x128xf32>
    %34 = math.tanh %33 : vector<8x128xf32>
    %35 = arith.mulf %28, %34 : vector<8x128xf32>
    %36 = arith.addi %10, %c0_i32_12 : i32
    %c8_i32_19 = arith.constant 8 : i32
    %37 = arith.cmpi slt, %36, %c8_i32_19 : i32
    %38 = arith.extui %37 : i1 to i32
    %39 = arith.sitofp %38 : i32 to f32
    %40 = vector.broadcast %39 : f32 to vector<8x128xf32>
    %41 = arith.mulf %40, %35 : vector<8x128xf32>
    %cst_20 = arith.constant 1.000000e+00 : f32
    %42 = arith.subf %cst_20, %39 : f32
    %43 = vector.broadcast %42 : f32 to vector<8x128xf32>
    %44 = arith.mulf %43, %11 : vector<8x128xf32>
    %45 = arith.addf %41, %44 : vector<8x128xf32>
    %46 = vector.broadcast %39 : f32 to vector<8x128xf32>
    %47 = arith.mulf %46, %33 : vector<8x128xf32>
    %cst_21 = arith.constant 1.000000e+00 : f32
    %48 = arith.subf %cst_21, %39 : f32
    %49 = vector.broadcast %48 : f32 to vector<8x128xf32>
    %50 = arith.mulf %49, %12 : vector<8x128xf32>
    %51 = arith.addf %47, %50 : vector<8x128xf32>
    %c0_22 = arith.constant 0 : index
    %c0_23 = arith.constant 0 : index
    %52 = vector.load %arg7[%c0_22, %c0_23] : memref<128x128xf32, #tpu.memory_space<vmem>>, vector<128x128xf32>
    %cst_24 = arith.constant dense<0.000000e+00> : vector<8x128xf32>
    %53 = tpu.matmul %45, %52, %cst_24 {dimension_numbers = #tpu.dot_dimension_numbers<[1], [0], [0], [1], [0, 0, 1, 1], [], []>} : vector<8x128xf32>, vector<128x128xf32>, vector<8x128xf32> -> vector<8x128xf32>
    %c0_25 = arith.constant 0 : index
    %c0_26 = arith.constant 0 : index
    %54 = vector.load %arg8[%c0_25, %c0_26] : memref<1x128xf32, #tpu.memory_space<vmem>>, vector<1x128xf32>
    %55 = vector.broadcast %54 : vector<1x128xf32> to vector<8x128xf32>
    %56 = arith.addf %53, %55 : vector<8x128xf32>
    %57 = arith.index_cast %14 : i32 to index
    %c0_27 = arith.constant 0 : index
    %58 = vector.load %arg9[%57, %c0_27] : memref<64x128xf32, #tpu.memory_space<vmem>>, vector<8x128xf32>
    tpu.vector_store %arg9[%57, %c0_27], %56 {strides = array<i32>} : memref<64x128xf32, #tpu.memory_space<vmem>>, vector<8x128xf32>,
    %c1_i32 = arith.constant 1 : i32
    %c8_i32_28 = arith.constant 8 : i32
    %59 = arith.muli %c1_i32, %c8_i32_28 : i32
    %60 = tpu.assume_multiple %59, 8 : i32
    %61 = arith.index_cast %60 : i32 to index
    %c0_29 = arith.constant 0 : index
    %62 = vector.load %arg12[%61, %c0_29] : memref<64x512xf32, #tpu.memory_space<vmem>>, vector<8x512xf32>
    %c0_30 = arith.constant 0 : index
    %c0_31 = arith.constant 0 : index
    %63 = vector.load %arg3[%c0_30, %c0_31] : memref<128x512xf32, #tpu.memory_space<vmem>>, vector<128x512xf32>
    %cst_32 = arith.constant dense<0.000000e+00> : vector<8x512xf32>
    %64 = tpu.matmul %45, %63, %cst_32 {dimension_numbers = #tpu.dot_dimension_numbers<[1], [0], [0], [1], [0, 0, 1, 1], [], []>} : vector<8x128xf32>, vector<128x512xf32>, vector<8x512xf32> -> vector<8x512xf32>
    %65 = arith.addf %62, %64 : vector<8x512xf32>
    %66 = vector.extract_strided_slice %65 {offsets = [0, 0], sizes = [8, 384], strides = [1, 1]} : vector<8x512xf32> to vector<8x384xf32>
    %67 = arith.negf %66 : vector<8x384xf32>
    %68 = math.exp %67 : vector<8x384xf32>
    %cst_33 = arith.constant 1.000000e+00 : f32
    %69 = vector.broadcast %cst_33 : f32 to vector<8x384xf32>
    %70 = arith.addf %69, %68 : vector<8x384xf32>
    %71 = arith.divf %69, %70 : vector<8x384xf32>
    %72 = vector.extract_strided_slice %71 {offsets = [0, 0], sizes = [8, 128], strides = [1, 1]} : vector<8x384xf32> to vector<8x128xf32>
    %73 = vector.extract_strided_slice %71 {offsets = [0, 128], sizes = [8, 128], strides = [1, 1]} : vector<8x384xf32> to vector<8x128xf32>
    %74 = vector.extract_strided_slice %71 {offsets = [0, 256], sizes = [8, 128], strides = [1, 1]} : vector<8x384xf32> to vector<8x128xf32>
    %75 = vector.extract_strided_slice %65 {offsets = [0, 384], sizes = [8, 128], strides = [1, 1]} : vector<8x512xf32> to vector<8x128xf32>
    %76 = math.tanh %75 : vector<8x128xf32>
    %77 = arith.mulf %73, %51 : vector<8x128xf32>
    %78 = arith.mulf %72, %76 : vector<8x128xf32>
    %79 = arith.addf %77, %78 : vector<8x128xf32>
    %80 = math.tanh %79 : vector<8x128xf32>
    %81 = arith.mulf %74, %80 : vector<8x128xf32>
    %82 = arith.addi %10, %c1_i32 : i32
    %c8_i32_34 = arith.constant 8 : i32
    %83 = arith.cmpi slt, %82, %c8_i32_34 : i32
    %84 = arith.extui %83 : i1 to i32
    %85 = arith.sitofp %84 : i32 to f32
    %86 = vector.broadcast %85 : f32 to vector<8x128xf32>
    %87 = arith.mulf %86, %81 : vector<8x128xf32>
    %cst_35 = arith.constant 1.000000e+00 : f32
    %88 = arith.subf %cst_35, %85 : f32
    %89 = vector.broadcast %88 : f32 to vector<8x128xf32>
    %90 = arith.mulf %89, %45 : vector<8x128xf32>
    %91 = arith.addf %87, %90 : vector<8x128xf32>
    %92 = vector.broadcast %85 : f32 to vector<8x128xf32>
    %93 = arith.mulf %92, %79 : vector<8x128xf32>
    %cst_36 = arith.constant 1.000000e+00 : f32
    %94 = arith.subf %cst_36, %85 : f32
    %95 = vector.broadcast %94 : f32 to vector<8x128xf32>
    %96 = arith.mulf %95, %51 : vector<8x128xf32>
    %97 = arith.addf %93, %96 : vector<8x128xf32>
    %c0_37 = arith.constant 0 : index
    %c0_38 = arith.constant 0 : index
    %98 = vector.load %arg7[%c0_37, %c0_38] : memref<128x128xf32, #tpu.memory_space<vmem>>, vector<128x128xf32>
    %cst_39 = arith.constant dense<0.000000e+00> : vector<8x128xf32>
    %99 = tpu.matmul %91, %98, %cst_39 {dimension_numbers = #tpu.dot_dimension_numbers<[1], [0], [0], [1], [0, 0, 1, 1], [], []>} : vector<8x128xf32>, vector<128x128xf32>, vector<8x128xf32> -> vector<8x128xf32>
    %c0_40 = arith.constant 0 : index
    %c0_41 = arith.constant 0 : index
    %100 = vector.load %arg8[%c0_40, %c0_41] : memref<1x128xf32, #tpu.memory_space<vmem>>, vector<1x128xf32>
    %101 = vector.broadcast %100 : vector<1x128xf32> to vector<8x128xf32>
    %102 = arith.addf %99, %101 : vector<8x128xf32>
    %103 = arith.index_cast %60 : i32 to index
    %c0_42 = arith.constant 0 : index
    %104 = vector.load %arg9[%103, %c0_42] : memref<64x128xf32, #tpu.memory_space<vmem>>, vector<8x128xf32>
    tpu.vector_store %arg9[%103, %c0_42], %102 {strides = array<i32>} : memref<64x128xf32, #tpu.memory_space<vmem>>, vector<8x128xf32>,
    %c2_i32 = arith.constant 2 : i32
    %c8_i32_43 = arith.constant 8 : i32
    %105 = arith.muli %c2_i32, %c8_i32_43 : i32
    %106 = tpu.assume_multiple %105, 8 : i32
    %107 = arith.index_cast %106 : i32 to index
    %c0_44 = arith.constant 0 : index
    %108 = vector.load %arg12[%107, %c0_44] : memref<64x512xf32, #tpu.memory_space<vmem>>, vector<8x512xf32>
    %c0_45 = arith.constant 0 : index
    %c0_46 = arith.constant 0 : index
    %109 = vector.load %arg3[%c0_45, %c0_46] : memref<128x512xf32, #tpu.memory_space<vmem>>, vector<128x512xf32>
    %cst_47 = arith.constant dense<0.000000e+00> : vector<8x512xf32>
    %110 = tpu.matmul %91, %109, %cst_47 {dimension_numbers = #tpu.dot_dimension_numbers<[1], [0], [0], [1], [0, 0, 1, 1], [], []>} : vector<8x128xf32>, vector<128x512xf32>, vector<8x512xf32> -> vector<8x512xf32>
    %111 = arith.addf %108, %110 : vector<8x512xf32>
    %112 = vector.extract_strided_slice %111 {offsets = [0, 0], sizes = [8, 384], strides = [1, 1]} : vector<8x512xf32> to vector<8x384xf32>
    %113 = arith.negf %112 : vector<8x384xf32>
    %114 = math.exp %113 : vector<8x384xf32>
    %cst_48 = arith.constant 1.000000e+00 : f32
    %115 = vector.broadcast %cst_48 : f32 to vector<8x384xf32>
    %116 = arith.addf %115, %114 : vector<8x384xf32>
    %117 = arith.divf %115, %116 : vector<8x384xf32>
    %118 = vector.extract_strided_slice %117 {offsets = [0, 0], sizes = [8, 128], strides = [1, 1]} : vector<8x384xf32> to vector<8x128xf32>
    %119 = vector.extract_strided_slice %117 {offsets = [0, 128], sizes = [8, 128], strides = [1, 1]} : vector<8x384xf32> to vector<8x128xf32>
    %120 = vector.extract_strided_slice %117 {offsets = [0, 256], sizes = [8, 128], strides = [1, 1]} : vector<8x384xf32> to vector<8x128xf32>
    %121 = vector.extract_strided_slice %111 {offsets = [0, 384], sizes = [8, 128], strides = [1, 1]} : vector<8x512xf32> to vector<8x128xf32>
    %122 = math.tanh %121 : vector<8x128xf32>
    %123 = arith.mulf %119, %97 : vector<8x128xf32>
    %124 = arith.mulf %118, %122 : vector<8x128xf32>
    %125 = arith.addf %123, %124 : vector<8x128xf32>
    %126 = math.tanh %125 : vector<8x128xf32>
    %127 = arith.mulf %120, %126 : vector<8x128xf32>
    %128 = arith.addi %10, %c2_i32 : i32
    %c8_i32_49 = arith.constant 8 : i32
    %129 = arith.cmpi slt, %128, %c8_i32_49 : i32
    %130 = arith.extui %129 : i1 to i32
    %131 = arith.sitofp %130 : i32 to f32
    %132 = vector.broadcast %131 : f32 to vector<8x128xf32>
    %133 = arith.mulf %132, %127 : vector<8x128xf32>
    %cst_50 = arith.constant 1.000000e+00 : f32
    %134 = arith.subf %cst_50, %131 : f32
    %135 = vector.broadcast %134 : f32 to vector<8x128xf32>
    %136 = arith.mulf %135, %91 : vector<8x128xf32>
    %137 = arith.addf %133, %136 : vector<8x128xf32>
    %138 = vector.broadcast %131 : f32 to vector<8x128xf32>
    %139 = arith.mulf %138, %125 : vector<8x128xf32>
    %cst_51 = arith.constant 1.000000e+00 : f32
    %140 = arith.subf %cst_51, %131 : f32
    %141 = vector.broadcast %140 : f32 to vector<8x128xf32>
    %142 = arith.mulf %141, %97 : vector<8x128xf32>
    %143 = arith.addf %139, %142 : vector<8x128xf32>
    %c0_52 = arith.constant 0 : index
    %c0_53 = arith.constant 0 : index
    %144 = vector.load %arg7[%c0_52, %c0_53] : memref<128x128xf32, #tpu.memory_space<vmem>>, vector<128x128xf32>
    %cst_54 = arith.constant dense<0.000000e+00> : vector<8x128xf32>
    %145 = tpu.matmul %137, %144, %cst_54 {dimension_numbers = #tpu.dot_dimension_numbers<[1], [0], [0], [1], [0, 0, 1, 1], [], []>} : vector<8x128xf32>, vector<128x128xf32>, vector<8x128xf32> -> vector<8x128xf32>
    %c0_55 = arith.constant 0 : index
    %c0_56 = arith.constant 0 : index
    %146 = vector.load %arg8[%c0_55, %c0_56] : memref<1x128xf32, #tpu.memory_space<vmem>>, vector<1x128xf32>
    %147 = vector.broadcast %146 : vector<1x128xf32> to vector<8x128xf32>
    %148 = arith.addf %145, %147 : vector<8x128xf32>
    %149 = arith.index_cast %106 : i32 to index
    %c0_57 = arith.constant 0 : index
    %150 = vector.load %arg9[%149, %c0_57] : memref<64x128xf32, #tpu.memory_space<vmem>>, vector<8x128xf32>
    tpu.vector_store %arg9[%149, %c0_57], %148 {strides = array<i32>} : memref<64x128xf32, #tpu.memory_space<vmem>>, vector<8x128xf32>,
    %c3_i32 = arith.constant 3 : i32
    %c8_i32_58 = arith.constant 8 : i32
    %151 = arith.muli %c3_i32, %c8_i32_58 : i32
    %152 = tpu.assume_multiple %151, 8 : i32
    %153 = arith.index_cast %152 : i32 to index
    %c0_59 = arith.constant 0 : index
    %154 = vector.load %arg12[%153, %c0_59] : memref<64x512xf32, #tpu.memory_space<vmem>>, vector<8x512xf32>
    %c0_60 = arith.constant 0 : index
    %c0_61 = arith.constant 0 : index
    %155 = vector.load %arg3[%c0_60, %c0_61] : memref<128x512xf32, #tpu.memory_space<vmem>>, vector<128x512xf32>
    %cst_62 = arith.constant dense<0.000000e+00> : vector<8x512xf32>
    %156 = tpu.matmul %137, %155, %cst_62 {dimension_numbers = #tpu.dot_dimension_numbers<[1], [0], [0], [1], [0, 0, 1, 1], [], []>} : vector<8x128xf32>, vector<128x512xf32>, vector<8x512xf32> -> vector<8x512xf32>
    %157 = arith.addf %154, %156 : vector<8x512xf32>
    %158 = vector.extract_strided_slice %157 {offsets = [0, 0], sizes = [8, 384], strides = [1, 1]} : vector<8x512xf32> to vector<8x384xf32>
    %159 = arith.negf %158 : vector<8x384xf32>
    %160 = math.exp %159 : vector<8x384xf32>
    %cst_63 = arith.constant 1.000000e+00 : f32
    %161 = vector.broadcast %cst_63 : f32 to vector<8x384xf32>
    %162 = arith.addf %161, %160 : vector<8x384xf32>
    %163 = arith.divf %161, %162 : vector<8x384xf32>
    %164 = vector.extract_strided_slice %163 {offsets = [0, 0], sizes = [8, 128], strides = [1, 1]} : vector<8x384xf32> to vector<8x128xf32>
    %165 = vector.extract_strided_slice %163 {offsets = [0, 128], sizes = [8, 128], strides = [1, 1]} : vector<8x384xf32> to vector<8x128xf32>
    %166 = vector.extract_strided_slice %163 {offsets = [0, 256], sizes = [8, 128], strides = [1, 1]} : vector<8x384xf32> to vector<8x128xf32>
    %167 = vector.extract_strided_slice %157 {offsets = [0, 384], sizes = [8, 128], strides = [1, 1]} : vector<8x512xf32> to vector<8x128xf32>
    %168 = math.tanh %167 : vector<8x128xf32>
    %169 = arith.mulf %165, %143 : vector<8x128xf32>
    %170 = arith.mulf %164, %168 : vector<8x128xf32>
    %171 = arith.addf %169, %170 : vector<8x128xf32>
    %172 = math.tanh %171 : vector<8x128xf32>
    %173 = arith.mulf %166, %172 : vector<8x128xf32>
    %174 = arith.addi %10, %c3_i32 : i32
    %c8_i32_64 = arith.constant 8 : i32
    %175 = arith.cmpi slt, %174, %c8_i32_64 : i32
    %176 = arith.extui %175 : i1 to i32
    %177 = arith.sitofp %176 : i32 to f32
    %178 = vector.broadcast %177 : f32 to vector<8x128xf32>
    %179 = arith.mulf %178, %173 : vector<8x128xf32>
    %cst_65 = arith.constant 1.000000e+00 : f32
    %180 = arith.subf %cst_65, %177 : f32
    %181 = vector.broadcast %180 : f32 to vector<8x128xf32>
    %182 = arith.mulf %181, %137 : vector<8x128xf32>
    %183 = arith.addf %179, %182 : vector<8x128xf32>
    %184 = vector.broadcast %177 : f32 to vector<8x128xf32>
    %185 = arith.mulf %184, %171 : vector<8x128xf32>
    %cst_66 = arith.constant 1.000000e+00 : f32
    %186 = arith.subf %cst_66, %177 : f32
    %187 = vector.broadcast %186 : f32 to vector<8x128xf32>
    %188 = arith.mulf %187, %143 : vector<8x128xf32>
    %189 = arith.addf %185, %188 : vector<8x128xf32>
    %c0_67 = arith.constant 0 : index
    %c0_68 = arith.constant 0 : index
    %190 = vector.load %arg7[%c0_67, %c0_68] : memref<128x128xf32, #tpu.memory_space<vmem>>, vector<128x128xf32>
    %cst_69 = arith.constant dense<0.000000e+00> : vector<8x128xf32>
    %191 = tpu.matmul %183, %190, %cst_69 {dimension_numbers = #tpu.dot_dimension_numbers<[1], [0], [0], [1], [0, 0, 1, 1], [], []>} : vector<8x128xf32>, vector<128x128xf32>, vector<8x128xf32> -> vector<8x128xf32>
    %c0_70 = arith.constant 0 : index
    %c0_71 = arith.constant 0 : index
    %192 = vector.load %arg8[%c0_70, %c0_71] : memref<1x128xf32, #tpu.memory_space<vmem>>, vector<1x128xf32>
    %193 = vector.broadcast %192 : vector<1x128xf32> to vector<8x128xf32>
    %194 = arith.addf %191, %193 : vector<8x128xf32>
    %195 = arith.index_cast %152 : i32 to index
    %c0_72 = arith.constant 0 : index
    %196 = vector.load %arg9[%195, %c0_72] : memref<64x128xf32, #tpu.memory_space<vmem>>, vector<8x128xf32>
    tpu.vector_store %arg9[%195, %c0_72], %194 {strides = array<i32>} : memref<64x128xf32, #tpu.memory_space<vmem>>, vector<8x128xf32>,
    %c4_i32 = arith.constant 4 : i32
    %c8_i32_73 = arith.constant 8 : i32
    %197 = arith.muli %c4_i32, %c8_i32_73 : i32
    %198 = tpu.assume_multiple %197, 8 : i32
    %199 = arith.index_cast %198 : i32 to index
    %c0_74 = arith.constant 0 : index
    %200 = vector.load %arg12[%199, %c0_74] : memref<64x512xf32, #tpu.memory_space<vmem>>, vector<8x512xf32>
    %c0_75 = arith.constant 0 : index
    %c0_76 = arith.constant 0 : index
    %201 = vector.load %arg3[%c0_75, %c0_76] : memref<128x512xf32, #tpu.memory_space<vmem>>, vector<128x512xf32>
    %cst_77 = arith.constant dense<0.000000e+00> : vector<8x512xf32>
    %202 = tpu.matmul %183, %201, %cst_77 {dimension_numbers = #tpu.dot_dimension_numbers<[1], [0], [0], [1], [0, 0, 1, 1], [], []>} : vector<8x128xf32>, vector<128x512xf32>, vector<8x512xf32> -> vector<8x512xf32>
    %203 = arith.addf %200, %202 : vector<8x512xf32>
    %204 = vector.extract_strided_slice %203 {offsets = [0, 0], sizes = [8, 384], strides = [1, 1]} : vector<8x512xf32> to vector<8x384xf32>
    %205 = arith.negf %204 : vector<8x384xf32>
    %206 = math.exp %205 : vector<8x384xf32>
    %cst_78 = arith.constant 1.000000e+00 : f32
    %207 = vector.broadcast %cst_78 : f32 to vector<8x384xf32>
    %208 = arith.addf %207, %206 : vector<8x384xf32>
    %209 = arith.divf %207, %208 : vector<8x384xf32>
    %210 = vector.extract_strided_slice %209 {offsets = [0, 0], sizes = [8, 128], strides = [1, 1]} : vector<8x384xf32> to vector<8x128xf32>
    %211 = vector.extract_strided_slice %209 {offsets = [0, 128], sizes = [8, 128], strides = [1, 1]} : vector<8x384xf32> to vector<8x128xf32>
    %212 = vector.extract_strided_slice %209 {offsets = [0, 256], sizes = [8, 128], strides = [1, 1]} : vector<8x384xf32> to vector<8x128xf32>
    %213 = vector.extract_strided_slice %203 {offsets = [0, 384], sizes = [8, 128], strides = [1, 1]} : vector<8x512xf32> to vector<8x128xf32>
    %214 = math.tanh %213 : vector<8x128xf32>
    %215 = arith.mulf %211, %189 : vector<8x128xf32>
    %216 = arith.mulf %210, %214 : vector<8x128xf32>
    %217 = arith.addf %215, %216 : vector<8x128xf32>
    %218 = math.tanh %217 : vector<8x128xf32>
    %219 = arith.mulf %212, %218 : vector<8x128xf32>
    %220 = arith.addi %10, %c4_i32 : i32
    %c8_i32_79 = arith.constant 8 : i32
    %221 = arith.cmpi slt, %220, %c8_i32_79 : i32
    %222 = arith.extui %221 : i1 to i32
    %223 = arith.sitofp %222 : i32 to f32
    %224 = vector.broadcast %223 : f32 to vector<8x128xf32>
    %225 = arith.mulf %224, %219 : vector<8x128xf32>
    %cst_80 = arith.constant 1.000000e+00 : f32
    %226 = arith.subf %cst_80, %223 : f32
    %227 = vector.broadcast %226 : f32 to vector<8x128xf32>
    %228 = arith.mulf %227, %183 : vector<8x128xf32>
    %229 = arith.addf %225, %228 : vector<8x128xf32>
    %230 = vector.broadcast %223 : f32 to vector<8x128xf32>
    %231 = arith.mulf %230, %217 : vector<8x128xf32>
    %cst_81 = arith.constant 1.000000e+00 : f32
    %232 = arith.subf %cst_81, %223 : f32
    %233 = vector.broadcast %232 : f32 to vector<8x128xf32>
    %234 = arith.mulf %233, %189 : vector<8x128xf32>
    %235 = arith.addf %231, %234 : vector<8x128xf32>
    %c0_82 = arith.constant 0 : index
    %c0_83 = arith.constant 0 : index
    %236 = vector.load %arg7[%c0_82, %c0_83] : memref<128x128xf32, #tpu.memory_space<vmem>>, vector<128x128xf32>
    %cst_84 = arith.constant dense<0.000000e+00> : vector<8x128xf32>
    %237 = tpu.matmul %229, %236, %cst_84 {dimension_numbers = #tpu.dot_dimension_numbers<[1], [0], [0], [1], [0, 0, 1, 1], [], []>} : vector<8x128xf32>, vector<128x128xf32>, vector<8x128xf32> -> vector<8x128xf32>
    %c0_85 = arith.constant 0 : index
    %c0_86 = arith.constant 0 : index
    %238 = vector.load %arg8[%c0_85, %c0_86] : memref<1x128xf32, #tpu.memory_space<vmem>>, vector<1x128xf32>
    %239 = vector.broadcast %238 : vector<1x128xf32> to vector<8x128xf32>
    %240 = arith.addf %237, %239 : vector<8x128xf32>
    %241 = arith.index_cast %198 : i32 to index
    %c0_87 = arith.constant 0 : index
    %242 = vector.load %arg9[%241, %c0_87] : memref<64x128xf32, #tpu.memory_space<vmem>>, vector<8x128xf32>
    tpu.vector_store %arg9[%241, %c0_87], %240 {strides = array<i32>} : memref<64x128xf32, #tpu.memory_space<vmem>>, vector<8x128xf32>,
    %c5_i32 = arith.constant 5 : i32
    %c8_i32_88 = arith.constant 8 : i32
    %243 = arith.muli %c5_i32, %c8_i32_88 : i32
    %244 = tpu.assume_multiple %243, 8 : i32
    %245 = arith.index_cast %244 : i32 to index
    %c0_89 = arith.constant 0 : index
    %246 = vector.load %arg12[%245, %c0_89] : memref<64x512xf32, #tpu.memory_space<vmem>>, vector<8x512xf32>
    %c0_90 = arith.constant 0 : index
    %c0_91 = arith.constant 0 : index
    %247 = vector.load %arg3[%c0_90, %c0_91] : memref<128x512xf32, #tpu.memory_space<vmem>>, vector<128x512xf32>
    %cst_92 = arith.constant dense<0.000000e+00> : vector<8x512xf32>
    %248 = tpu.matmul %229, %247, %cst_92 {dimension_numbers = #tpu.dot_dimension_numbers<[1], [0], [0], [1], [0, 0, 1, 1], [], []>} : vector<8x128xf32>, vector<128x512xf32>, vector<8x512xf32> -> vector<8x512xf32>
    %249 = arith.addf %246, %248 : vector<8x512xf32>
    %250 = vector.extract_strided_slice %249 {offsets = [0, 0], sizes = [8, 384], strides = [1, 1]} : vector<8x512xf32> to vector<8x384xf32>
    %251 = arith.negf %250 : vector<8x384xf32>
    %252 = math.exp %251 : vector<8x384xf32>
    %cst_93 = arith.constant 1.000000e+00 : f32
    %253 = vector.broadcast %cst_93 : f32 to vector<8x384xf32>
    %254 = arith.addf %253, %252 : vector<8x384xf32>
    %255 = arith.divf %253, %254 : vector<8x384xf32>
    %256 = vector.extract_strided_slice %255 {offsets = [0, 0], sizes = [8, 128], strides = [1, 1]} : vector<8x384xf32> to vector<8x128xf32>
    %257 = vector.extract_strided_slice %255 {offsets = [0, 128], sizes = [8, 128], strides = [1, 1]} : vector<8x384xf32> to vector<8x128xf32>
    %258 = vector.extract_strided_slice %255 {offsets = [0, 256], sizes = [8, 128], strides = [1, 1]} : vector<8x384xf32> to vector<8x128xf32>
    %259 = vector.extract_strided_slice %249 {offsets = [0, 384], sizes = [8, 128], strides = [1, 1]} : vector<8x512xf32> to vector<8x128xf32>
    %260 = math.tanh %259 : vector<8x128xf32>
    %261 = arith.mulf %257, %235 : vector<8x128xf32>
    %262 = arith.mulf %256, %260 : vector<8x128xf32>
    %263 = arith.addf %261, %262 : vector<8x128xf32>
    %264 = math.tanh %263 : vector<8x128xf32>
    %265 = arith.mulf %258, %264 : vector<8x128xf32>
    %266 = arith.addi %10, %c5_i32 : i32
    %c8_i32_94 = arith.constant 8 : i32
    %267 = arith.cmpi slt, %266, %c8_i32_94 : i32
    %268 = arith.extui %267 : i1 to i32
    %269 = arith.sitofp %268 : i32 to f32
    %270 = vector.broadcast %269 : f32 to vector<8x128xf32>
    %271 = arith.mulf %270, %265 : vector<8x128xf32>
    %cst_95 = arith.constant 1.000000e+00 : f32
    %272 = arith.subf %cst_95, %269 : f32
    %273 = vector.broadcast %272 : f32 to vector<8x128xf32>
    %274 = arith.mulf %273, %229 : vector<8x128xf32>
    %275 = arith.addf %271, %274 : vector<8x128xf32>
    %276 = vector.broadcast %269 : f32 to vector<8x128xf32>
    %277 = arith.mulf %276, %263 : vector<8x128xf32>
    %cst_96 = arith.constant 1.000000e+00 : f32
    %278 = arith.subf %cst_96, %269 : f32
    %279 = vector.broadcast %278 : f32 to vector<8x128xf32>
    %280 = arith.mulf %279, %235 : vector<8x128xf32>
    %281 = arith.addf %277, %280 : vector<8x128xf32>
    %c0_97 = arith.constant 0 : index
    %c0_98 = arith.constant 0 : index
    %282 = vector.load %arg7[%c0_97, %c0_98] : memref<128x128xf32, #tpu.memory_space<vmem>>, vector<128x128xf32>
    %cst_99 = arith.constant dense<0.000000e+00> : vector<8x128xf32>
    %283 = tpu.matmul %275, %282, %cst_99 {dimension_numbers = #tpu.dot_dimension_numbers<[1], [0], [0], [1], [0, 0, 1, 1], [], []>} : vector<8x128xf32>, vector<128x128xf32>, vector<8x128xf32> -> vector<8x128xf32>
    %c0_100 = arith.constant 0 : index
    %c0_101 = arith.constant 0 : index
    %284 = vector.load %arg8[%c0_100, %c0_101] : memref<1x128xf32, #tpu.memory_space<vmem>>, vector<1x128xf32>
    %285 = vector.broadcast %284 : vector<1x128xf32> to vector<8x128xf32>
    %286 = arith.addf %283, %285 : vector<8x128xf32>
    %287 = arith.index_cast %244 : i32 to index
    %c0_102 = arith.constant 0 : index
    %288 = vector.load %arg9[%287, %c0_102] : memref<64x128xf32, #tpu.memory_space<vmem>>, vector<8x128xf32>
    tpu.vector_store %arg9[%287, %c0_102], %286 {strides = array<i32>} : memref<64x128xf32, #tpu.memory_space<vmem>>, vector<8x128xf32>,
    %c6_i32 = arith.constant 6 : i32
    %c8_i32_103 = arith.constant 8 : i32
    %289 = arith.muli %c6_i32, %c8_i32_103 : i32
    %290 = tpu.assume_multiple %289, 8 : i32
    %291 = arith.index_cast %290 : i32 to index
    %c0_104 = arith.constant 0 : index
    %292 = vector.load %arg12[%291, %c0_104] : memref<64x512xf32, #tpu.memory_space<vmem>>, vector<8x512xf32>
    %c0_105 = arith.constant 0 : index
    %c0_106 = arith.constant 0 : index
    %293 = vector.load %arg3[%c0_105, %c0_106] : memref<128x512xf32, #tpu.memory_space<vmem>>, vector<128x512xf32>
    %cst_107 = arith.constant dense<0.000000e+00> : vector<8x512xf32>
    %294 = tpu.matmul %275, %293, %cst_107 {dimension_numbers = #tpu.dot_dimension_numbers<[1], [0], [0], [1], [0, 0, 1, 1], [], []>} : vector<8x128xf32>, vector<128x512xf32>, vector<8x512xf32> -> vector<8x512xf32>
    %295 = arith.addf %292, %294 : vector<8x512xf32>
    %296 = vector.extract_strided_slice %295 {offsets = [0, 0], sizes = [8, 384], strides = [1, 1]} : vector<8x512xf32> to vector<8x384xf32>
    %297 = arith.negf %296 : vector<8x384xf32>
    %298 = math.exp %297 : vector<8x384xf32>
    %cst_108 = arith.constant 1.000000e+00 : f32
    %299 = vector.broadcast %cst_108 : f32 to vector<8x384xf32>
    %300 = arith.addf %299, %298 : vector<8x384xf32>
    %301 = arith.divf %299, %300 : vector<8x384xf32>
    %302 = vector.extract_strided_slice %301 {offsets = [0, 0], sizes = [8, 128], strides = [1, 1]} : vector<8x384xf32> to vector<8x128xf32>
    %303 = vector.extract_strided_slice %301 {offsets = [0, 128], sizes = [8, 128], strides = [1, 1]} : vector<8x384xf32> to vector<8x128xf32>
    %304 = vector.extract_strided_slice %301 {offsets = [0, 256], sizes = [8, 128], strides = [1, 1]} : vector<8x384xf32> to vector<8x128xf32>
    %305 = vector.extract_strided_slice %295 {offsets = [0, 384], sizes = [8, 128], strides = [1, 1]} : vector<8x512xf32> to vector<8x128xf32>
    %306 = math.tanh %305 : vector<8x128xf32>
    %307 = arith.mulf %303, %281 : vector<8x128xf32>
    %308 = arith.mulf %302, %306 : vector<8x128xf32>
    %309 = arith.addf %307, %308 : vector<8x128xf32>
    %310 = math.tanh %309 : vector<8x128xf32>
    %311 = arith.mulf %304, %310 : vector<8x128xf32>
    %312 = arith.addi %10, %c6_i32 : i32
    %c8_i32_109 = arith.constant 8 : i32
    %313 = arith.cmpi slt, %312, %c8_i32_109 : i32
    %314 = arith.extui %313 : i1 to i32
    %315 = arith.sitofp %314 : i32 to f32
    %316 = vector.broadcast %315 : f32 to vector<8x128xf32>
    %317 = arith.mulf %316, %311 : vector<8x128xf32>
    %cst_110 = arith.constant 1.000000e+00 : f32
    %318 = arith.subf %cst_110, %315 : f32
    %319 = vector.broadcast %318 : f32 to vector<8x128xf32>
    %320 = arith.mulf %319, %275 : vector<8x128xf32>
    %321 = arith.addf %317, %320 : vector<8x128xf32>
    %322 = vector.broadcast %315 : f32 to vector<8x128xf32>
    %323 = arith.mulf %322, %309 : vector<8x128xf32>
    %cst_111 = arith.constant 1.000000e+00 : f32
    %324 = arith.subf %cst_111, %315 : f32
    %325 = vector.broadcast %324 : f32 to vector<8x128xf32>
    %326 = arith.mulf %325, %281 : vector<8x128xf32>
    %327 = arith.addf %323, %326 : vector<8x128xf32>
    %c0_112 = arith.constant 0 : index
    %c0_113 = arith.constant 0 : index
    %328 = vector.load %arg7[%c0_112, %c0_113] : memref<128x128xf32, #tpu.memory_space<vmem>>, vector<128x128xf32>
    %cst_114 = arith.constant dense<0.000000e+00> : vector<8x128xf32>
    %329 = tpu.matmul %321, %328, %cst_114 {dimension_numbers = #tpu.dot_dimension_numbers<[1], [0], [0], [1], [0, 0, 1, 1], [], []>} : vector<8x128xf32>, vector<128x128xf32>, vector<8x128xf32> -> vector<8x128xf32>
    %c0_115 = arith.constant 0 : index
    %c0_116 = arith.constant 0 : index
    %330 = vector.load %arg8[%c0_115, %c0_116] : memref<1x128xf32, #tpu.memory_space<vmem>>, vector<1x128xf32>
    %331 = vector.broadcast %330 : vector<1x128xf32> to vector<8x128xf32>
    %332 = arith.addf %329, %331 : vector<8x128xf32>
    %333 = arith.index_cast %290 : i32 to index
    %c0_117 = arith.constant 0 : index
    %334 = vector.load %arg9[%333, %c0_117] : memref<64x128xf32, #tpu.memory_space<vmem>>, vector<8x128xf32>
    tpu.vector_store %arg9[%333, %c0_117], %332 {strides = array<i32>} : memref<64x128xf32, #tpu.memory_space<vmem>>, vector<8x128xf32>,
    %c7_i32 = arith.constant 7 : i32
    %c8_i32_118 = arith.constant 8 : i32
    %335 = arith.muli %c7_i32, %c8_i32_118 : i32
    %336 = tpu.assume_multiple %335, 8 : i32
    %337 = arith.index_cast %336 : i32 to index
    %c0_119 = arith.constant 0 : index
    %338 = vector.load %arg12[%337, %c0_119] : memref<64x512xf32, #tpu.memory_space<vmem>>, vector<8x512xf32>
    %c0_120 = arith.constant 0 : index
    %c0_121 = arith.constant 0 : index
    %339 = vector.load %arg3[%c0_120, %c0_121] : memref<128x512xf32, #tpu.memory_space<vmem>>, vector<128x512xf32>
    %cst_122 = arith.constant dense<0.000000e+00> : vector<8x512xf32>
    %340 = tpu.matmul %321, %339, %cst_122 {dimension_numbers = #tpu.dot_dimension_numbers<[1], [0], [0], [1], [0, 0, 1, 1], [], []>} : vector<8x128xf32>, vector<128x512xf32>, vector<8x512xf32> -> vector<8x512xf32>
    %341 = arith.addf %338, %340 : vector<8x512xf32>
    %342 = vector.extract_strided_slice %341 {offsets = [0, 0], sizes = [8, 384], strides = [1, 1]} : vector<8x512xf32> to vector<8x384xf32>
    %343 = arith.negf %342 : vector<8x384xf32>
    %344 = math.exp %343 : vector<8x384xf32>
    %cst_123 = arith.constant 1.000000e+00 : f32
    %345 = vector.broadcast %cst_123 : f32 to vector<8x384xf32>
    %346 = arith.addf %345, %344 : vector<8x384xf32>
    %347 = arith.divf %345, %346 : vector<8x384xf32>
    %348 = vector.extract_strided_slice %347 {offsets = [0, 0], sizes = [8, 128], strides = [1, 1]} : vector<8x384xf32> to vector<8x128xf32>
    %349 = vector.extract_strided_slice %347 {offsets = [0, 128], sizes = [8, 128], strides = [1, 1]} : vector<8x384xf32> to vector<8x128xf32>
    %350 = vector.extract_strided_slice %347 {offsets = [0, 256], sizes = [8, 128], strides = [1, 1]} : vector<8x384xf32> to vector<8x128xf32>
    %351 = vector.extract_strided_slice %341 {offsets = [0, 384], sizes = [8, 128], strides = [1, 1]} : vector<8x512xf32> to vector<8x128xf32>
    %352 = math.tanh %351 : vector<8x128xf32>
    %353 = arith.mulf %349, %327 : vector<8x128xf32>
    %354 = arith.mulf %348, %352 : vector<8x128xf32>
    %355 = arith.addf %353, %354 : vector<8x128xf32>
    %356 = math.tanh %355 : vector<8x128xf32>
    %357 = arith.mulf %350, %356 : vector<8x128xf32>
    %358 = arith.addi %10, %c7_i32 : i32
    %c8_i32_124 = arith.constant 8 : i32
    %359 = arith.cmpi slt, %358, %c8_i32_124 : i32
    %360 = arith.extui %359 : i1 to i32
    %361 = arith.sitofp %360 : i32 to f32
    %362 = vector.broadcast %361 : f32 to vector<8x128xf32>
    %363 = arith.mulf %362, %357 : vector<8x128xf32>
    %cst_125 = arith.constant 1.000000e+00 : f32
    %364 = arith.subf %cst_125, %361 : f32
    %365 = vector.broadcast %364 : f32 to vector<8x128xf32>
    %366 = arith.mulf %365, %321 : vector<8x128xf32>
    %367 = arith.addf %363, %366 : vector<8x128xf32>
    %368 = vector.broadcast %361 : f32 to vector<8x128xf32>
    %369 = arith.mulf %368, %355 : vector<8x128xf32>
    %cst_126 = arith.constant 1.000000e+00 : f32
    %370 = arith.subf %cst_126, %361 : f32
    %371 = vector.broadcast %370 : f32 to vector<8x128xf32>
    %372 = arith.mulf %371, %327 : vector<8x128xf32>
    %373 = arith.addf %369, %372 : vector<8x128xf32>
    %c0_127 = arith.constant 0 : index
    %c0_128 = arith.constant 0 : index
    %374 = vector.load %arg7[%c0_127, %c0_128] : memref<128x128xf32, #tpu.memory_space<vmem>>, vector<128x128xf32>
    %cst_129 = arith.constant dense<0.000000e+00> : vector<8x128xf32>
    %375 = tpu.matmul %367, %374, %cst_129 {dimension_numbers = #tpu.dot_dimension_numbers<[1], [0], [0], [1], [0, 0, 1, 1], [], []>} : vector<8x128xf32>, vector<128x128xf32>, vector<8x128xf32> -> vector<8x128xf32>
    %c0_130 = arith.constant 0 : index
    %c0_131 = arith.constant 0 : index
    %376 = vector.load %arg8[%c0_130, %c0_131] : memref<1x128xf32, #tpu.memory_space<vmem>>, vector<1x128xf32>
    %377 = vector.broadcast %376 : vector<1x128xf32> to vector<8x128xf32>
    %378 = arith.addf %375, %377 : vector<8x128xf32>
    %379 = arith.index_cast %336 : i32 to index
    %c0_132 = arith.constant 0 : index
    %380 = vector.load %arg9[%379, %c0_132] : memref<64x128xf32, #tpu.memory_space<vmem>>, vector<8x128xf32>
    tpu.vector_store %arg9[%379, %c0_132], %378 {strides = array<i32>} : memref<64x128xf32, #tpu.memory_space<vmem>>, vector<8x128xf32>,
    %c8_i32_133 = arith.constant 8 : i32
    %c0_134 = arith.constant 0 : index
    %c0_135 = arith.constant 0 : index
    %381 = vector.load %arg13[%c0_134, %c0_135] : memref<8x128xf32, #tpu.memory_space<vmem>>, vector<8x128xf32>
    tpu.vector_store %arg13[%c0_134, %c0_135], %367 {strides = array<i32>} : memref<8x128xf32, #tpu.memory_space<vmem>>, vector<8x128xf32>,
    %c0_136 = arith.constant 0 : index
    %c0_137 = arith.constant 0 : index
    %382 = vector.load %arg14[%c0_136, %c0_137] : memref<8x128xf32, #tpu.memory_space<vmem>>, vector<8x128xf32>
    tpu.vector_store %arg14[%c0_136, %c0_137], %373 {strides = array<i32>} : memref<8x128xf32, #tpu.memory_space<vmem>>, vector<8x128xf32>,
    %c0_138 = arith.constant 0 : index
    %c0_139 = arith.constant 0 : index
    %383 = vector.load %arg10[%c0_138, %c0_139] : memref<8x128xf32, #tpu.memory_space<vmem>>, vector<8x128xf32>
    tpu.vector_store %arg10[%c0_138, %c0_139], %367 {strides = array<i32>} : memref<8x128xf32, #tpu.memory_space<vmem>>, vector<8x128xf32>,
    %c0_140 = arith.constant 0 : index
    %c0_141 = arith.constant 0 : index
    %384 = vector.load %arg11[%c0_140, %c0_141] : memref<8x128xf32, #tpu.memory_space<vmem>>, vector<8x128xf32>
    tpu.vector_store %arg11[%c0_140, %c0_141], %373 {strides = array<i32>} : memref<8x128xf32, #tpu.memory_space<vmem>>, vector<8x128xf32>,
    return
  }
  func.func @transform_0(%arg0: i32) -> (i32, i32) {
    %c0_i32 = arith.constant 0 : i32
    %c0_i32_0 = arith.constant 0 : i32
    return %arg0, %c0_i32 : i32, i32
  }
  func.func @transform_1(%arg0: i32) -> (i32, i32) {
    %c0_i32 = arith.constant 0 : i32
    %c0_i32_0 = arith.constant 0 : i32
    %c0_i32_1 = arith.constant 0 : i32
    return %c0_i32, %c0_i32_0 : i32, i32
  }
  func.func @transform_2(%arg0: i32) -> (i32, i32) {
    %c0_i32 = arith.constant 0 : i32
    %c0_i32_0 = arith.constant 0 : i32
    %c0_i32_1 = arith.constant 0 : i32
    return %c0_i32, %c0_i32_0 : i32, i32
  }
  func.func @transform_3(%arg0: i32) -> (i32, i32) {
    %c0_i32 = arith.constant 0 : i32
    %c0_i32_0 = arith.constant 0 : i32
    %c0_i32_1 = arith.constant 0 : i32
    return %c0_i32, %c0_i32_0 : i32, i32
  }
  func.func @transform_4(%arg0: i32) -> (i32, i32) {
    %c0_i32 = arith.constant 0 : i32
    %c0_i32_0 = arith.constant 0 : i32
    %c0_i32_1 = arith.constant 0 : i32
    return %c0_i32, %c0_i32_0 : i32, i32
  }
  func.func @transform_5(%arg0: i32) -> (i32, i32) {
    %c0_i32 = arith.constant 0 : i32
    %c0_i32_0 = arith.constant 0 : i32
    %c0_i32_1 = arith.constant 0 : i32
    return %c0_i32, %c0_i32_0 : i32, i32
  }
  func.func @transform_6(%arg0: i32) -> (i32, i32) {
    %c0_i32 = arith.constant 0 : i32
    %c0_i32_0 = arith.constant 0 : i32
    %c0_i32_1 = arith.constant 0 : i32
    return %c0_i32, %c0_i32_0 : i32, i32
  }
  func.func @transform_7(%arg0: i32) -> (i32, i32) {
    %c0_i32 = arith.constant 0 : i32
    %c0_i32_0 = arith.constant 0 : i32
    %c0_i32_1 = arith.constant 0 : i32
    return %c0_i32, %c0_i32_0 : i32, i32
  }
  func.func @transform_8(%arg0: i32) -> (i32, i32) {
    %c0_i32 = arith.constant 0 : i32
    %c0_i32_0 = arith.constant 0 : i32
    return %arg0, %c0_i32 : i32, i32
  }
  func.func @transform_9(%arg0: i32) -> (i32, i32) {
    %c0_i32 = arith.constant 0 : i32
    %c0_i32_0 = arith.constant 0 : i32
    %c0_i32_1 = arith.constant 0 : i32
    return %c0_i32, %c0_i32_0 : i32, i32
  }
  func.func @transform_10(%arg0: i32) -> (i32, i32) {
    %c0_i32 = arith.constant 0 : i32
    %c0_i32_0 = arith.constant 0 : i32
    %c0_i32_1 = arith.constant 0 : i32
    return %c0_i32, %c0_i32_0 : i32, i32
  }
}

</mosaic_0001>

<bundles_post_ra>
// kernel: lstm_model_forward.2
= control target key start
LH: loop header
LB: loop body
LE: loop exit
PB: predicated region body
PF: predicated region fallthrough
CT: control target
= control target key end

     0   :  { %v3258_v3 = vmov 0.0   ;;  %s4588_s1 = inlined_call_operand.vmem [shape: f32[128,512], index: 1, kind: input, shape index: {}]   ;;  %s4589_s2 = inlined_call_operand.vmem [shape: f32[128,512], index: 2, kind: input, shape index: {}]   ;;  %s4590_s0 = inlined_call_operand.vmem [shape: f32[64,128], index: 0, kind: input, shape index: {}]   ;;  %s4591_s4 = inlined_call_operand.vmem [shape: f32[8,128], index: 4, kind: input, shape index: {}]   ;;  %s4592_s3 = inlined_call_operand.vmem [shape: f32[1,512], index: 3, kind: input, shape index: {}]   ;;  %s4593_s5 = inlined_call_operand.vmem [shape: f32[8,128], index: 5, kind: input, shape index: {}]   ;;  %s4594_s6 = inlined_call_operand.vmem [shape: f32[64,128], index: 6, kind: output, shape index: {0}]   ;;  %s4595_s8 = inlined_call_operand.vmem [shape: f32[8,128], index: 8, kind: output, shape index: {2}]   ;;  %s4596_s7 = inlined_call_operand.vmem [shape: f32[8,128], index: 7, kind: output, shape index: {1}]  }
   0x1   :  { %v43_v0 = vld [vmem:[%s4588_s1 + $0x8] sm:$0xff]  ;;  %v45_v2 = vld [vmem:[%s4588_s1 + $0x18] sm:$0xff]  ;;  %192 = vmatprep.mubr.f32.mxu0 %v3258_v3  ;;  %305 = vmatprep.mubr.f32.mxu1 %v3258_v3  ;;  %v42_v6 = vld [vmem:[%s4588_s1] sm:$0xff] }
   0x2   :  { %v47_v1 = vld [vmem:[%s4588_s1 + $0x28] sm:$0xff]  ;;  %v49_v5 = vld [vmem:[%s4588_s1 + $0x38] sm:$0xff]  ;;  %v46_v7 = vld [vmem:[%s4588_s1 + $0x20] sm:$0xff] }
   0x3   :  { %v2489_v4 = vpack.c.bf16 %v47_v1, %v43_v0  ;;  %v2521_v8 = vpack.c.bf16 %v49_v5, %v45_v2  ;;  %v2491_v9 = vpack.c.bf16 %v46_v7, %v42_v6  ;;  %v44_v10 = vld [vmem:[%s4588_s1 + $0x10] sm:$0xff]  ;;  %v51_v12 = vld [vmem:[%s4588_s1 + $0x48] sm:$0xff]  ;;  %v53_v15 = vld [vmem:[%s4588_s1 + $0x58] sm:$0xff] }
   0x4   :  { %v48_v11 = vld [vmem:[%s4588_s1 + $0x30] sm:$0xff]  ;;  %v55_v14 = vld [vmem:[%s4588_s1 + $0x68] sm:$0xff]  ;;  %v57_v16 = vld [vmem:[%s4588_s1 + $0x78] sm:$0xff] }
   0x5   :  { %2490 = vmatprep.subr.bf16.mxu0 %v2489_v4  ;;  %v2523_v13 = vpack.c.bf16 %v48_v11, %v44_v10  ;;  %2522 = vmatprep.subr.bf16.mxu1 %v2521_v8  ;;  %v2493_v17 = vpack.c.bf16 %v55_v14, %v51_v12  ;;  %v2525_v18 = vpack.c.bf16 %v57_v16, %v53_v15  ;;  %v50_v19 = vld [vmem:[%s4588_s1 + $0x40] sm:$0xff]  ;;  %v52_v21 = vld [vmem:[%s4588_s1 + $0x50] sm:$0xff]  ;;  %v59_v24 = vld [vmem:[%s4588_s1 + $0x88] sm:$0xff] }
   0x6   :  { %2492 = vmatpush1.bf16.msra.mxu0 %v2491_v9  ;;  %v54_v20 = vld [vmem:[%s4588_s1 + $0x60] sm:$0xff]  ;;  %v56_v23 = vld [vmem:[%s4588_s1 + $0x70] sm:$0xff]  ;;  %v63_v25 = vld [vmem:[%s4588_s1 + $0xa8] sm:$0xff] }
   0x7   :  { %2524 = vmatpush1.bf16.msra.mxu1 %v2523_v13  ;;  %v2495_v22 = vpack.c.bf16 %v54_v20, %v50_v19  ;;  %2494 = vmatprep.subr.bf16.mxu0 %v2493_v17  ;;  %v2527_v26 = vpack.c.bf16 %v56_v23, %v52_v21  ;;  %v2497_v27 = vpack.c.bf16 %v63_v25, %v59_v24  ;;  %v61_v28 = vld [vmem:[%s4588_s1 + $0x98] sm:$0xff]  ;;  %v58_v30 = vld [vmem:[%s4588_s1 + $0x80] sm:$0xff]  ;;  %v60_v33 = vld [vmem:[%s4588_s1 + $0x90] sm:$0xff] }
   0x8   :  { %2526 = vmatprep.subr.bf16.mxu1 %v2525_v18  ;;  %v65_v29 = vld [vmem:[%s4588_s1 + $0xb8] sm:$0xff]  ;;  %v62_v32 = vld [vmem:[%s4588_s1 + $0xa0] sm:$0xff]  ;;  %v64_v34 = vld [vmem:[%s4588_s1 + $0xb0] sm:$0xff] }
   0x9   :  { %v2529_v31 = vpack.c.bf16 %v65_v29, %v61_v28  ;;  %v2499_v35 = vpack.c.bf16 %v62_v32, %v58_v30  ;;  %v67_v36 = vld [vmem:[%s4588_s1 + $0xc8] sm:$0xff]  ;;  %v69_v38 = vld [vmem:[%s4588_s1 + $0xd8] sm:$0xff]  ;;  %v2531_v39 = vpack.c.bf16 %v64_v34, %v60_v33  ;;  %v66_v42 = vld [vmem:[%s4588_s1 + $0xc0] sm:$0xff] }
   0xa   :  { %2496 = vmatpush1.bf16.msra.mxu0 %v2495_v22  ;;  %v71_v37 = vld [vmem:[%s4588_s1 + $0xe8] sm:$0xff]  ;;  %v73_v41 = vld [vmem:[%s4588_s1 + $0xf8] sm:$0xff]  ;;  %v70_v43 = vld [vmem:[%s4588_s1 + $0xe0] sm:$0xff] }
   0xb   :  { %2528 = vmatpush1.bf16.msra.mxu1 %v2527_v26  ;;  %2498 = vmatprep.subr.bf16.mxu0 %v2497_v27  ;;  %v2501_v40 = vpack.c.bf16 %v71_v37, %v67_v36  ;;  %v2533_v44 = vpack.c.bf16 %v73_v41, %v69_v38  ;;  %v68_v45 = vld [vmem:[%s4588_s1 + $0xd0] sm:$0xff]  ;;  %v75_v47 = vld [vmem:[%s4588_s1 + $0x108] sm:$0xff]  ;;  %v77_v49 = vld [vmem:[%s4588_s1 + $0x118] sm:$0xff]  ;;  %v2503_v51 = vpack.c.bf16 %v70_v43, %v66_v42 }
   0xc   :  { %2530 = vmatprep.subr.bf16.mxu1 %v2529_v31  ;;  %v72_v46 = vld [vmem:[%s4588_s1 + $0xf0] sm:$0xff]  ;;  %v79_v48 = vld [vmem:[%s4588_s1 + $0x128] sm:$0xff]  ;;  %v81_v50 = vld [vmem:[%s4588_s1 + $0x138] sm:$0xff] }
   0xd   :  { %v2535_v52 = vpack.c.bf16 %v72_v46, %v68_v45  ;;  %v2505_v53 = vpack.c.bf16 %v79_v48, %v75_v47  ;;  %v74_v54 = vld [vmem:[%s4588_s1 + $0x100] sm:$0xff]  ;;  %v76_v56 = vld [vmem:[%s4588_s1 + $0x110] sm:$0xff]  ;;  %v2537_v57 = vpack.c.bf16 %v81_v50, %v77_v49  ;;  %v83_v59 = vld [vmem:[%s4588_s1 + $0x148] sm:$0xff] }
   0xe   :  { %2500 = vmatpush1.bf16.msra.mxu0 %v2499_v35  ;;  %v78_v55 = vld [vmem:[%s4588_s1 + $0x120] sm:$0xff]  ;;  %v80_v58 = vld [vmem:[%s4588_s1 + $0x130] sm:$0xff]  ;;  %v87_v60 = vld [vmem:[%s4588_s1 + $0x168] sm:$0xff] }
   0xf   :  { %2532 = vmatpush1.bf16.msra.mxu1 %v2531_v39  ;;  %2502 = vmatprep.subr.bf16.mxu0 %v2501_v40  ;;  %v85_v61 = vld [vmem:[%s4588_s1 + $0x158] sm:$0xff]  ;;  %v2507_v63 = vpack.c.bf16 %v78_v55, %v74_v54  ;;  %v2539_v0 = vpack.c.bf16 %v80_v58, %v76_v56  ;;  %v2509_v1 = vpack.c.bf16 %v87_v60, %v83_v59  ;;  %v82_v2 = vld [vmem:[%s4588_s1 + $0x140] sm:$0xff]  ;;  %v84_v5 = vld [vmem:[%s4588_s1 + $0x150] sm:$0xff] }
  0x10   :  { %2534 = vmatprep.subr.bf16.mxu1 %v2533_v44  ;;  %v89_v62 = vld [vmem:[%s4588_s1 + $0x178] sm:$0xff]  ;;  %v86_v4 = vld [vmem:[%s4588_s1 + $0x160] sm:$0xff]  ;;  %v88_v7 = vld [vmem:[%s4588_s1 + $0x170] sm:$0xff] }
  0x11   :  { %v2541_v6 = vpack.c.bf16 %v89_v62, %v85_v61  ;;  %v91_v8 = vld [vmem:[%s4588_s1 + $0x188] sm:$0xff]  ;;  %v93_v10 = vld [vmem:[%s4588_s1 + $0x198] sm:$0xff]  ;;  %v2511_v12 = vpack.c.bf16 %v86_v4, %v82_v2  ;;  %v2543_v13 = vpack.c.bf16 %v88_v7, %v84_v5  ;;  %v90_v15 = vld [vmem:[%s4588_s1 + $0x180] sm:$0xff] }
  0x12   :  { %2504 = vmatpush1.bf16.msra.mxu0 %v2503_v51  ;;  %v95_v9 = vld [vmem:[%s4588_s1 + $0x1a8] sm:$0xff]  ;;  %v97_v11 = vld [vmem:[%s4588_s1 + $0x1b8] sm:$0xff]  ;;  %v94_v16 = vld [vmem:[%s4588_s1 + $0x1a0] sm:$0xff] }
  0x13   :  { %2536 = vmatpush1.bf16.msra.mxu1 %v2535_v52  ;;  %2506 = vmatprep.subr.bf16.mxu0 %v2505_v53  ;;  %v2513_v14 = vpack.c.bf16 %v95_v9, %v91_v8  ;;  %v92_v17 = vld [vmem:[%s4588_s1 + $0x190] sm:$0xff]  ;;  %v2545_v18 = vpack.c.bf16 %v97_v11, %v93_v10  ;;  %v99_v20 = vld [vmem:[%s4588_s1 + $0x1c8] sm:$0xff]  ;;  %v101_v22 = vld [vmem:[%s4588_s1 + $0x1d8] sm:$0xff]  ;;  %v2515_v24 = vpack.c.bf16 %v94_v16, %v90_v15 }
  0x14   :  { %2538 = vmatprep.subr.bf16.mxu1 %v2537_v57  ;;  %v96_v19 = vld [vmem:[%s4588_s1 + $0x1b0] sm:$0xff]  ;;  %v103_v21 = vld [vmem:[%s4588_s1 + $0x1e8] sm:$0xff]  ;;  %v105_v23 = vld [vmem:[%s4588_s1 + $0x1f8] sm:$0xff] }
  0x15   :  { %v2547_v25 = vpack.c.bf16 %v96_v19, %v92_v17  ;;  %v2517_v26 = vpack.c.bf16 %v103_v21, %v99_v20  ;;  %v98_v27 = vld [vmem:[%s4588_s1 + $0x1c0] sm:$0xff]  ;;  %v100_v29 = vld [vmem:[%s4588_s1 + $0x1d0] sm:$0xff]  ;;  %v2549_v30 = vpack.c.bf16 %v105_v23, %v101_v22  ;;  %v397_v32 = vld [vmem:[%s4589_s2 + $0x8] sm:$0xff] }
  0x16   :  { %2508 = vmatpush1.bf16.msra.mxu0 %v2507_v63  ;;  %v102_v28 = vld [vmem:[%s4588_s1 + $0x1e0] sm:$0xff]  ;;  %v104_v31 = vld [vmem:[%s4588_s1 + $0x1f0] sm:$0xff]  ;;  %v401_v33 = vld [vmem:[%s4589_s2 + $0x28] sm:$0xff] }
  0x17   :  { %2540 = vmatpush1.bf16.msra.mxu1 %v2539_v0  ;;  %2510 = vmatprep.subr.bf16.mxu0 %v2509_v1  ;;  %v399_v34 = vld [vmem:[%s4589_s2 + $0x18] sm:$0xff]  ;;  %v2519_v36 = vpack.c.bf16 %v102_v28, %v98_v27  ;;  %v2551_v37 = vpack.c.bf16 %v104_v31, %v100_v29  ;;  %v3510_v38 = vpack.c.bf16 %v401_v33, %v397_v32  ;;  %v396_v39 = vld [vmem:[%s4589_s2] sm:$0xff]  ;;  %v398_v42 = vld [vmem:[%s4589_s2 + $0x10] sm:$0xff] }
  0x18   :  { %2542 = vmatprep.subr.bf16.mxu1 %v2541_v6  ;;  %v403_v35 = vld [vmem:[%s4589_s2 + $0x38] sm:$0xff]  ;;  %v400_v40 = vld [vmem:[%s4589_s2 + $0x20] sm:$0xff]  ;;  %v402_v43 = vld [vmem:[%s4589_s2 + $0x30] sm:$0xff] }
  0x19   :  { %v3518_v41 = vpack.c.bf16 %v403_v35, %v399_v34  ;;  %v405_v44 = vld [vmem:[%s4589_s2 + $0x48] sm:$0xff]  ;;  %v34_v46 = vld [vmem:[%s4590_s0] sm:$0xff]  ;;  %v3535_v47 = vpack.c.bf16 %v400_v40, %v396_v39  ;;  %v407_v48 = vld [vmem:[%s4589_s2 + $0x58] sm:$0xff]  ;;  %v3544_v50 = vpack.c.bf16 %v402_v43, %v398_v42 }
  0x1a   :  { %2512 = vmatpush1.bf16.msra.mxu0 %v2511_v12  ;;  %v409_v45 = vld [vmem:[%s4589_s2 + $0x68] sm:$0xff]  ;;  %v411_v49 = vld [vmem:[%s4589_s2 + $0x78] sm:$0xff]  ;;  %v404_v51 = vld [vmem:[%s4589_s2 + $0x40] sm:$0xff] }
  0x1b   :  { %2544 = vmatpush1.bf16.msra.mxu1 %v2543_v13  ;;  %2514 = vmatprep.subr.bf16.mxu0 %v2513_v14  ;;  %v408_v52 = vld [vmem:[%s4589_s2 + $0x60] sm:$0xff]  ;;  %v3553_v53 = vpack.c.bf16 %v409_v45, %v405_v44  ;;  %v406_v54 = vld [vmem:[%s4589_s2 + $0x50] sm:$0xff]  ;;  %v3561_v56 = vpack.c.bf16 %v411_v49, %v407_v48  ;;  %v413_v57 = vld [vmem:[%s4589_s2 + $0x88] sm:$0xff] }
  0x1c   :  { %2546 = vmatprep.subr.bf16.mxu1 %v2545_v18  ;;  %v410_v55 = vld [vmem:[%s4589_s2 + $0x70] sm:$0xff]  ;;  %v417_v58 = vld [vmem:[%s4589_s2 + $0xa8] sm:$0xff]  ;;  %v3573_v60 = vpack.c.bf16 %v408_v52, %v404_v51  ;;  %v415_v61 = vld [vmem:[%s4589_s2 + $0x98] sm:$0xff] }
  0x1d   :  { %v35_v59 = vld [vmem:[%s4590_s0 + $0x8] sm:$0xff]  ;;  %v419_v62 = vld [vmem:[%s4589_s2 + $0xb8] sm:$0xff]  ;;  %v3583_v63 = vpack.c.bf16 %v410_v55, %v406_v54  ;;  %v412_v0 = vld [vmem:[%s4589_s2 + $0x80] sm:$0xff]  ;;  %v3593_v2 = vpack.c.bf16 %v417_v58, %v413_v57 }
  0x1e   :  { %2516 = vmatpush1.bf16.msra.mxu0 %v2515_v24  ;;  %v416_v1 = vld [vmem:[%s4589_s2 + $0xa0] sm:$0xff]  ;;  %v414_v4 = vld [vmem:[%s4589_s2 + $0x90] sm:$0xff]  ;;  %v3602_v6 = vpack.c.bf16 %v419_v62, %v415_v61  ;;  %v421_v7 = vld [vmem:[%s4589_s2 + $0xc8] sm:$0xff] }
  0x1f   :  { %2548 = vmatpush1.bf16.msra.mxu1 %v2547_v25  ;;  %2518 = vmatprep.subr.bf16.mxu0 %v2517_v26  ;;  %v418_v5 = vld [vmem:[%s4589_s2 + $0xb0] sm:$0xff]  ;;  %v425_v8 = vld [vmem:[%s4589_s2 + $0xe8] sm:$0xff]  ;;  %v3614_v10 = vpack.c.bf16 %v416_v1, %v412_v0  ;;  %v423_v11 = vld [vmem:[%s4589_s2 + $0xd8] sm:$0xff] }
  0x20   :  { %2550 = vmatprep.subr.bf16.mxu1 %v2549_v30  ;;  %v36_v9 = vld [vmem:[%s4590_s0 + $0x10] sm:$0xff]  ;;  %v427_v12 = vld [vmem:[%s4589_s2 + $0xf8] sm:$0xff]  ;;  %v3624_v13 = vpack.c.bf16 %v418_v5, %v414_v4  ;;  %v420_v14 = vld [vmem:[%s4589_s2 + $0xc0] sm:$0xff]  ;;  %v3634_v16 = vpack.c.bf16 %v425_v8, %v421_v7 }
  0x21   :  { %v424_v15 = vld [vmem:[%s4589_s2 + $0xe0] sm:$0xff]  ;;  %v422_v17 = vld [vmem:[%s4589_s2 + $0xd0] sm:$0xff]  ;;  %v3643_v19 = vpack.c.bf16 %v427_v12, %v423_v11  ;;  %v429_v20 = vld [vmem:[%s4589_s2 + $0x108] sm:$0xff] }
  0x22   :  { %2520 = vmatpush1.bf16.msra.mxu0 %v2519_v36  ;;  %v426_v18 = vld [vmem:[%s4589_s2 + $0xf0] sm:$0xff]  ;;  %v433_v21 = vld [vmem:[%s4589_s2 + $0x128] sm:$0xff]  ;;  %v37_v22 = vld [vmem:[%s4590_s0 + $0x18] sm:$0xff]  ;;  %v3655_v23 = vpack.c.bf16 %v424_v15, %v420_v14 }
  0x23   :  { %2552 = vmatpush1.bf16.msra.mxu1 %v2551_v37  ;;  %2554 = vmatprep.subr.bf16.mxu0 %v3510_v38  ;;  %v431_v24 = vld [vmem:[%s4589_s2 + $0x118] sm:$0xff]  ;;  %v3665_v26 = vpack.c.bf16 %v426_v18, %v422_v17  ;;  %v428_v27 = vld [vmem:[%s4589_s2 + $0x100] sm:$0xff]  ;;  %v3675_v29 = vpack.c.bf16 %v433_v21, %v429_v20  ;;  %v430_v30 = vld [vmem:[%s4589_s2 + $0x110] sm:$0xff] }
  0x24   :  { %2586 = vmatprep.subr.bf16.mxu1 %v3518_v41  ;;  %v435_v25 = vld [vmem:[%s4589_s2 + $0x138] sm:$0xff]  ;;  %v432_v28 = vld [vmem:[%s4589_s2 + $0x120] sm:$0xff]  ;;  %v434_v31 = vld [vmem:[%s4589_s2 + $0x130] sm:$0xff] }
  0x25   :  { %193 = vmatmul.mubr.f32.vlgmr.msra.gmra.mrb[0].mxu0 %v34_v46  ;;  %v3684_v32 = vpack.c.bf16 %v435_v25, %v431_v24  ;;  %v437_v33 = vld [vmem:[%s4589_s2 + $0x148] sm:$0xff]  ;;  %v38_v35 = vld [vmem:[%s4590_s0 + $0x20] sm:$0xff]  ;;  %v3696_v36 = vpack.c.bf16 %v432_v28, %v428_v27  ;;  %v439_v37 = vld [vmem:[%s4589_s2 + $0x158] sm:$0xff]  ;;  %v3706_v40 = vpack.c.bf16 %v434_v31, %v430_v30  ;;  %v108_v30 = vlaneseq }
  0x26   :  { %306 = vmatmul.mubr.f32.vlgmr.msra.gmra.mrb[0].mxu1 %v34_v46  ;;  %2556 = vmatpush1.bf16.msra.mxu0 %v3535_v47  ;;  %v441_v34 = vld [vmem:[%s4589_s2 + $0x168] sm:$0xff]  ;;  %v443_v39 = vld [vmem:[%s4589_s2 + $0x178] sm:$0xff]  ;;  %v436_v42 = vld [vmem:[%s4589_s2 + $0x140] sm:$0xff] }
  0x27   :  { %2588 = vmatpush1.bf16.msra.mxu1 %v3544_v50  ;;  %198 = vmatprep.mubr.f32.mxu0 %v3258_v3  ;;  %v440_v43 = vld [vmem:[%s4589_s2 + $0x160] sm:$0xff]  ;;  %v3716_v44 = vpack.c.bf16 %v441_v34, %v437_v33  ;;  %v438_v45 = vld [vmem:[%s4589_s2 + $0x150] sm:$0xff]  ;;  %v3725_v48 = vpack.c.bf16 %v443_v39, %v439_v37  ;;  %v445_v49 = vld [vmem:[%s4589_s2 + $0x188] sm:$0xff]  ;;  %v109_v31 = vshrl.u32 %v108_v30, 7 }
  0x28   :  { %311 = vmatprep.mubr.f32.mxu1 %v3258_v3  ;;  %2558 = vmatprep.subr.bf16.mxu0 %v3553_v53  ;;  %v442_v46 = vld [vmem:[%s4589_s2 + $0x170] sm:$0xff]  ;;  %v449_v51 = vld [vmem:[%s4589_s2 + $0x1a8] sm:$0xff]  ;;  %v3737_v54 = vpack.c.bf16 %v440_v43, %v436_v42  ;;  %v447_v55 = vld [vmem:[%s4589_s2 + $0x198] sm:$0xff] }
  0x29   :  { %199 = vmatmul.mubr.f32.gmra.mrb[2].mxu0 %v35_v59  ;;  %2590 = vmatprep.subr.bf16.mxu1 %v3561_v56  ;;  %v39_v52 = vld [vmem:[%s4590_s0 + $0x28] sm:$0xff]  ;;  %v451_v57 = vld [vmem:[%s4589_s2 + $0x1b8] sm:$0xff]  ;;  %v3747_v58 = vpack.c.bf16 %v442_v46, %v438_v45  ;;  %v448_v61 = vld [vmem:[%s4589_s2 + $0x1a0] sm:$0xff]  ;;  %v3757_v62 = vpack.c.bf16 %v449_v51, %v445_v49  ;;  %v110_v33 = vsub.s32 0, %v109_v31  ;;  %v118_v43 = vsub.s32 2, %v109_v31 }
  0x2a   :  { %312 = vmatmul.mubr.f32.gmra.mrb[2].mxu1 %v35_v59  ;;  %2560 = vmatpush1.bf16.msra.mxu0 %v3573_v60  ;;  %v444_v59 = vld [vmem:[%s4589_s2 + $0x180] sm:$0xff]  ;;  %v446_v0 = vld [vmem:[%s4589_s2 + $0x190] sm:$0xff]  ;;  %v3766_v4 = vpack.c.bf16 %v451_v57, %v447_v55  ;;  %v453_v5 = vld [vmem:[%s4589_s2 + $0x1c8] sm:$0xff]  ;;  %v122_v57 = vsub.s32 3, %v109_v31 }
  0x2b   :  { %2592 = vmatpush1.bf16.msra.mxu1 %v3583_v63  ;;  %204 = vmatprep.mubr.f32.mxu0 %v3258_v3  ;;  %v450_v1 = vld [vmem:[%s4589_s2 + $0x1b0] sm:$0xff]  ;;  %v457_v7 = vld [vmem:[%s4589_s2 + $0x1e8] sm:$0xff]  ;;  %v455_v11 = vld [vmem:[%s4589_s2 + $0x1d8] sm:$0xff] }
  0x2c   :  { %317 = vmatprep.mubr.f32.mxu1 %v3258_v3  ;;  %2562 = vmatprep.subr.bf16.mxu0 %v3593_v2  ;;  %v40_v8 = vld [vmem:[%s4590_s0 + $0x30] sm:$0xff]  ;;  %v459_v12 = vld [vmem:[%s4589_s2 + $0x1f8] sm:$0xff]  ;;  %v3788_v14 = vpack.c.bf16 %v450_v1, %v446_v0  ;;  %v452_v15 = vld [vmem:[%s4589_s2 + $0x1c0] sm:$0xff]  ;;  %v3798_v18 = vpack.c.bf16 %v457_v7, %v453_v5 }
  0x2d   :  { %205 = vmatmul.mubr.f32.gmra.mrb[4].mxu0 %v36_v9  ;;  %2594 = vmatprep.subr.bf16.mxu1 %v3602_v6  ;;  %v456_v17 = vld [vmem:[%s4589_s2 + $0x1e0] sm:$0xff]  ;;  %v454_v20 = vld [vmem:[%s4589_s2 + $0x1d0] sm:$0xff]  ;;  %v41_v24 = vld [vmem:[%s4590_s0 + $0x38] sm:$0xff] }
  0x2e   :  { %318 = vmatmul.mubr.f32.gmra.mrb[4].mxu1 %v36_v9  ;;  %2564 = vmatpush1.bf16.msra.mxu0 %v3614_v10  ;;  %v3778_v9 = vpack.c.bf16 %v448_v61, %v444_v59  ;;  %v458_v21 = vld [vmem:[%s4589_s2 + $0x1f0] sm:$0xff]  ;;  %v3813_v25 = vpack.c.bf16 %v456_v17, %v452_v15  ;;  %v3826_v28 = vld [vmem:[%s4591_s4] sm:$0xff] }
  0x2f   :  { %2596 = vmatpush1.bf16.msra.mxu1 %v3624_v13  ;;  %210 = vmatprep.mubr.f32.mxu0 %v3258_v3  ;;  %v3817_v27 = vpack.c.bf16 %v458_v21, %v454_v20  ;;  %v106_v34 = vld [vmem:[%s4592_s3] sm:$0xf] }
  0x30   :  { %323 = vmatprep.mubr.f32.mxu1 %v3258_v3  ;;  %2566 = vmatprep.subr.bf16.mxu0 %v3634_v16  ;;  %v3872_v37 = vrot.slane %v106_v34, %v110_v33  ;;  %v3881_v61 = vrot.slane %v106_v34, %v122_v57  ;;  %v3887_v20 = vld [vmem:[%s4593_s5] sm:$0xff] }
  0x31   :  { %211 = vmatmul.mubr.f32.gmra.mrb[6].mxu0 %v37_v22  ;;  %2598 = vmatprep.subr.bf16.mxu1 %v3643_v19 }
  0x32   :  { %324 = vmatmul.mubr.f32.gmra.mrb[6].mxu1 %v37_v22  ;;  %2568 = vmatpush1.bf16.msra.mxu0 %v3655_v23  ;;  %v3807_v22 = vpack.c.bf16 %v459_v12, %v455_v11 }
  0x33   :  { %2600 = vmatpush1.bf16.msra.mxu1 %v3665_v26  ;;  %216 = vmatprep.mubr.f32.mxu0 %v3258_v3 }
  0x34   :  { %329 = vmatprep.mubr.f32.mxu1 %v3258_v3  ;;  %2570 = vmatprep.subr.bf16.mxu0 %v3675_v29 }
  0x35   :  { %217 = vmatmul.mubr.f32.gmra.mrb[8].mxu0 %v38_v35  ;;  %2602 = vmatprep.subr.bf16.mxu1 %v3684_v32 }
  0x36   :  { %330 = vmatmul.mubr.f32.gmra.mrb[8].mxu1 %v38_v35  ;;  %2572 = vmatpush1.bf16.msra.mxu0 %v3696_v36  ;;  %v114_v35 = vsub.s32 1, %v109_v31 }
  0x37   :  { %2604 = vmatpush1.bf16.msra.mxu1 %v3706_v40  ;;  %222 = vmatprep.mubr.f32.mxu0 %v3258_v3 }
  0x38   :  { %335 = vmatprep.mubr.f32.mxu1 %v3258_v3  ;;  %2574 = vmatprep.subr.bf16.mxu0 %v3716_v44  ;;  %v3874_v39 = vrot.slane %v106_v34, %v114_v35  ;;  %v637_v35 = vmul.f32 0.0, %v3826_v28 }
  0x39   :  { %223 = vmatmul.mubr.f32.gmra.mrb[10].mxu0 %v39_v52  ;;  %2606 = vmatprep.subr.bf16.mxu1 %v3725_v48 }
  0x3a   :  { %336 = vmatmul.mubr.f32.gmra.mrb[10].mxu1 %v39_v52  ;;  %2576 = vmatpush1.bf16.msra.mxu0 %v3737_v54  ;;  %v3878_v52 = vrot.slane %v106_v34, %v118_v43 }
  0x3b   :  { %2608 = vmatpush1.bf16.msra.mxu1 %v3747_v58  ;;  %228 = vmatprep.mubr.f32.mxu0 %v3258_v3 }
  0x3c   :  { %341 = vmatprep.mubr.f32.mxu1 %v3258_v3  ;;  %2578 = vmatprep.subr.bf16.mxu0 %v3757_v62 }
  0x3d   :  { %229 = vmatmul.mubr.f32.gmra.mrb[12].mxu0 %v40_v8  ;;  %2610 = vmatprep.subr.bf16.mxu1 %v3766_v4 }
  0x3e   :  { %342 = vmatmul.mubr.f32.gmra.mrb[12].mxu1 %v40_v8  ;;  %2580 = vmatpush1.bf16.msra.mxu0 %v3778_v9 }
  0x3f   :  { %2612 = vmatpush1.bf16.msra.mxu1 %v3788_v14  ;;  %234 = vmatprep.mubr.f32.mxu0 %v3258_v3 }
  0x40   :  { %347 = vmatprep.mubr.f32.mxu1 %v3258_v3  ;;  %2582 = vmatprep.subr.bf16.mxu0 %v3798_v18 }
  0x41   :  { %235 = vmatmul.mubr.f32.gmra.mrb[14].mxu0 %v41_v24  ;;  %2614 = vmatprep.subr.bf16.mxu1 %v3807_v22 }
  0x42   :  { %348 = vmatmul.mubr.f32.gmra.mrb[14].mxu1 %v41_v24  ;;  %2584 = vmatpush1.bf16.msra.mxu0 %v3813_v25 }
  0x43   :  { %2616 = vmatpush1.bf16.msra.mxu1 %v3817_v27  ;;  %524 = vmatprep.mubr.f32.mxu0 %v3258_v3 }
  0x44   :  { %595 = vmatprep.mubr.f32.mxu1 %v3258_v3  ;;  %2618 = vmatprep.subr.bf16.mxu0 %v3510_v38 }
  0x45   :  { %525 = vmatmul.mubr.f32.vlgmr.msra.gmra.mrb[0].mxu0 %v3826_v28  ;;  %2650 = vmatprep.subr.bf16.mxu1 %v3518_v41 }
  0x46   :  { %596 = vmatmul.mubr.f32.vlgmr.msra.gmra.mrb[0].mxu1 %v3826_v28  ;;  %2620 = vmatpush1.bf16.msra.mxu0 %v3535_v47 }
  0x47   :  { %2652 = vmatpush1.bf16.msra.mxu1 %v3544_v50  ;;  %2622 = vmatprep.subr.bf16.mxu0 %v3553_v53 }
  0x48   :  { %2654 = vmatprep.subr.bf16.mxu1 %v3561_v56  ;;  %778 = vmatprep.mubr.f32.mxu0 %v3258_v3 }
  0x49   :  { %849 = vmatprep.mubr.f32.mxu1 %v3258_v3 }
  0x4a   :  { %2624 = vmatpush1.bf16.msra.mxu0 %v3573_v60 }
  0x4b   :  { %2656 = vmatpush1.bf16.msra.mxu1 %v3583_v63  ;;  %2626 = vmatprep.subr.bf16.mxu0 %v3593_v2 }
  0x4c   :  { %2658 = vmatprep.subr.bf16.mxu1 %v3602_v6 }
  0x4e   :  { %2628 = vmatpush1.bf16.msra.mxu0 %v3614_v10 }
  0x4f   :  { %2660 = vmatpush1.bf16.msra.mxu1 %v3624_v13  ;;  %2630 = vmatprep.subr.bf16.mxu0 %v3634_v16 }
  0x50   :  { %2662 = vmatprep.subr.bf16.mxu1 %v3643_v19 }
  0x52   :  { %2632 = vmatpush1.bf16.msra.mxu0 %v3655_v23 }
  0x53   :  { %2664 = vmatpush1.bf16.msra.mxu1 %v3665_v26  ;;  %2634 = vmatprep.subr.bf16.mxu0 %v3675_v29 }
  0x54   :  { %2666 = vmatprep.subr.bf16.mxu1 %v3684_v32 }
  0x56   :  { %2636 = vmatpush1.bf16.msra.mxu0 %v3696_v36 }
  0x57   :  { %2668 = vmatpush1.bf16.msra.mxu1 %v3706_v40  ;;  %2638 = vmatprep.subr.bf16.mxu0 %v3716_v44 }
  0x58   :  { %2670 = vmatprep.subr.bf16.mxu1 %v3725_v48 }
  0x5a   :  { %2640 = vmatpush1.bf16.msra.mxu0 %v3737_v54 }
  0x5b   :  { %2672 = vmatpush1.bf16.msra.mxu1 %v3747_v58  ;;  %2642 = vmatprep.subr.bf16.mxu0 %v3757_v62 }
  0x5c   :  { %2674 = vmatprep.subr.bf16.mxu1 %v3766_v4 }
  0x5e   :  { %2644 = vmatpush1.bf16.msra.mxu0 %v3778_v9 }
  0x5f   :  { %2676 = vmatpush1.bf16.msra.mxu1 %v3788_v14  ;;  %2646 = vmatprep.subr.bf16.mxu0 %v3798_v18 }
  0x60   :  { %2678 = vmatprep.subr.bf16.mxu1 %v3807_v22 }
  0x62   :  { %2648 = vmatpush1.bf16.msra.mxu0 %v3813_v25 }
  0x63   :  { %2680 = vmatpush1.bf16.msra.mxu1 %v3817_v27  ;;  %2682 = vmatprep.subr.bf16.mxu0 %v3510_v38 }
  0x64   :  { %2714 = vmatprep.subr.bf16.mxu1 %v3518_v41 }
 0x118   :  { %v526_v42 = vpop.f32.mrb[0].mxu0 }
 0x119   :  { %v3065_v45 = vadd.f32 %v526_v42, %v3872_v37  ;;  %v597_v46 = vpop.f32.mrb[0].mxu1  ;;  %v528_v38 = vpop.f32.mrb[1].mxu0 }
 0x11a   :  { %v3066_v41 = vadd.f32 %v528_v38, %v3874_v39  ;;  %v599_v49 = vpop.f32.mrb[1].mxu1  ;;  %v3081_v59 = vadd.f32 %v597_v46, %v3878_v52 }
 0x11b   :  { %v2458_v51 = vmul.f32 -1.442695, %v3065_v45  ;;  %v3082_v1 = vadd.f32 %v599_v49, %v3881_v61 }
 0x11c   :  { %v2459_v55 = vmul.f32 -1.442695, %v3066_v41  ;;  %v2460_v0 = vmul.f32 -1.442695, %v3081_v59 }
 0x11d   :  { %3130 = vpow2.f32 %v2458_v51 }
 0x11e   :  { %3132 = vpow2.f32 %v2459_v55 }
 0x11f   :  { %3134 = vpow2.f32 %v2460_v0 }
 0x120   :  { %3136 = vtanh.f32 %v3082_v1 }
 0x127   :  { %v3131_v5 = vpop.eup %3130 }
 0x128   :  { %v615_v7 = vadd.f32 1.0, %v3131_v5  ;;  %v3133_v8 = vpop.eup %3132 }
 0x129   :  { %v616_v11 = vadd.f32 1.0, %v3133_v8  ;;  %v3135_v12 = vpop.eup %3134  ;;  %v1167_v8 = vld [vmem:[%s4589_s2 + $0x28] sm:$0xff] }
 0x12a   :  { %3138 = vrcp.f32 %v615_v7  ;;  %v3137_v15 = vpop.eup %3136  ;;  %v617_v30 = vadd.f32 1.0, %v3135_v12  ;;  %v1163_v7 = vld [vmem:[%s4589_s2 + $0x8] sm:$0xff] }
 0x12b   :  { %3140 = vrcp.f32 %v616_v11  ;;  %v1165_v11 = vld [vmem:[%s4589_s2 + $0x18] sm:$0xff]  ;;  %v3966_v12 = vpack.c.bf16 %v1167_v8, %v1163_v7  ;;  %v1188_v8 = vld [vmem:[%s4589_s2 + $0xd0] sm:$0xff] }
 0x12c   :  { %3142 = vrcp.f32 %v617_v30  ;;  %v1164_v30 = vld [vmem:[%s4589_s2 + $0x10] sm:$0xff] }
 0x134   :  { %v3139_v17 = vpop.eup %3138 }
 0x135   :  { %v626_v21 = vmul.f32 %v3139_v17, %v3137_v15  ;;  %v3141_v24 = vpop.eup %3140  ;;  %v1169_v15 = vld [vmem:[%s4589_s2 + $0x38] sm:$0xff]  ;;  %v1162_v17 = vld [vmem:[%s4589_s2] sm:$0xff] }
 0x136   :  { %v625_v31 = vmul.f32 %v3141_v24, %v3887_v20  ;;  %v3143_v34 = vpop.eup %3142 }
 0x138   :  { %v3890_v33 = vadd.f32 %v626_v21, %v625_v31  ;;  %v3977_v21 = vpack.c.bf16 %v1169_v15, %v1165_v11  ;;  %v1168_v31 = vld [vmem:[%s4589_s2 + $0x30] sm:$0xff] }
 0x139   :  { %v1192_v11 = vld [vmem:[%s4589_s2 + $0xf0] sm:$0xff] }
 0x13a   :  { %3144 = vtanh.f32 %v3890_v33  ;;  %v4096_v15 = vpack.c.bf16 %v1192_v11, %v1188_v8 }
 0x144   :  { %v3145_v42 = vpop.eup %3144 }
 0x145   :  { %v629_v43 = vmul.f32 %v3145_v42, %v3143_v34  ;;  %v1171_v34 = vld [vmem:[%s4589_s2 + $0x48] sm:$0xff]  ;;  %v1173_v42 = vld [vmem:[%s4589_s2 + $0x58] sm:$0xff] }
 0x147   :  { %v3894_v45 = vadd.f32 %v637_v35, %v629_v43  ;;  %v1175_v35 = vld [vmem:[%s4589_s2 + $0x68] sm:$0xff] }
 0x148   :  { %v4002_v43 = vpack.c.bf16 %v1175_v35, %v1171_v34  ;;  %v1201_v34 = vld [vmem:[%s4589_s2 + $0x138] sm:$0xff]  ;;  %v1194_v35 = vld [vmem:[%s4589_s2 + $0x100] sm:$0xff] }
 0x149   :  { %642 = vst [vmem:[%s4594_s6] sm:$0xff] %v3894_v45  ;;  %779 = vmatmul.mubr.f32.vlgmr.msra.gmra.mrb[2].mxu0 %v3894_v45  ;;  %850 = vmatmul.mubr.f32.vlgmr.msra.gmra.mrb[2].mxu1 %v3894_v45  ;;  %v892_v1 = vmul.f32 0.0, %v3894_v45  ;;  %v1177_v45 = vld [vmem:[%s4589_s2 + $0x78] sm:$0xff] }
 0x14a   :  { %2684 = vmatpush1.bf16.msra.mxu0 %v3535_v47  ;;  %2716 = vmatpush1.bf16.msra.mxu1 %v3544_v50 }
 0x14b   :  { %2686 = vmatprep.subr.bf16.mxu0 %v3553_v53  ;;  %2718 = vmatprep.subr.bf16.mxu1 %v3561_v56 }
 0x14c   :  { %1034 = vmatprep.mubr.f32.mxu0 %v3258_v3  ;;  %1105 = vmatprep.mubr.f32.mxu1 %v3258_v3 }
 0x14e   :  { %2688 = vmatpush1.bf16.msra.mxu0 %v3573_v60  ;;  %2720 = vmatpush1.bf16.msra.mxu1 %v3583_v63 }
 0x14f   :  { %2690 = vmatprep.subr.bf16.mxu0 %v3593_v2  ;;  %2722 = vmatprep.subr.bf16.mxu1 %v3602_v6 }
 0x152   :  { %2692 = vmatpush1.bf16.msra.mxu0 %v3614_v10  ;;  %2724 = vmatpush1.bf16.msra.mxu1 %v3624_v13 }
 0x153   :  { %2694 = vmatprep.subr.bf16.mxu0 %v3634_v16  ;;  %2726 = vmatprep.subr.bf16.mxu1 %v3643_v19 }
 0x156   :  { %2696 = vmatpush1.bf16.msra.mxu0 %v3655_v23  ;;  %2728 = vmatpush1.bf16.msra.mxu1 %v3665_v26 }
 0x157   :  { %2698 = vmatprep.subr.bf16.mxu0 %v3675_v29  ;;  %2730 = vmatprep.subr.bf16.mxu1 %v3684_v32  ;;  %v640_v32 = vmul.f32 0.0, %v3887_v20  ;;  %v1166_v20 = vld [vmem:[%s4589_s2 + $0x20] sm:$0xff] }
 0x158   :  { %v3979_v24 = vpack.c.bf16 %v1166_v20, %v1162_v17  ;;  %v1195_v17 = vld [vmem:[%s4589_s2 + $0x108] sm:$0xff] }
 0x159   :  { %v3940_v46 = vadd.f32 %v640_v32, %v3890_v33  ;;  %v3988_v33 = vpack.c.bf16 %v1168_v31, %v1164_v30  ;;  %v1199_v20 = vld [vmem:[%s4589_s2 + $0x128] sm:$0xff]  ;;  %v1197_v30 = vld [vmem:[%s4589_s2 + $0x118] sm:$0xff] }
 0x15a   :  { %2700 = vmatpush1.bf16.msra.mxu0 %v3696_v36  ;;  %2732 = vmatpush1.bf16.msra.mxu1 %v3706_v40  ;;  %v4110_v31 = vpack.c.bf16 %v1199_v20, %v1195_v17  ;;  %v1461_v20 = vld [vmem:[%s4589_s2 + $0x158] sm:$0xff] }
 0x15b   :  { %2702 = vmatprep.subr.bf16.mxu0 %v3716_v44  ;;  %2734 = vmatprep.subr.bf16.mxu1 %v3725_v48 }
 0x15e   :  { %2704 = vmatpush1.bf16.msra.mxu0 %v3737_v54  ;;  %2736 = vmatpush1.bf16.msra.mxu1 %v3747_v58 }
 0x15f   :  { %2706 = vmatprep.subr.bf16.mxu0 %v3757_v62  ;;  %2738 = vmatprep.subr.bf16.mxu1 %v3766_v4 }
 0x162   :  { %2708 = vmatpush1.bf16.msra.mxu0 %v3778_v9  ;;  %2740 = vmatpush1.bf16.msra.mxu1 %v3788_v14 }
 0x163   :  { %2710 = vmatprep.subr.bf16.mxu0 %v3798_v18  ;;  %2742 = vmatprep.subr.bf16.mxu1 %v3807_v22 }
 0x166   :  { %2712 = vmatpush1.bf16.msra.mxu0 %v3813_v25  ;;  %2744 = vmatpush1.bf16.msra.mxu1 %v3817_v27 }
 0x167   :  { %2746 = vmatprep.subr.bf16.mxu0 %v3966_v12  ;;  %2778 = vmatprep.subr.bf16.mxu1 %v3977_v21 }
 0x21c   :  { %v780_v47 = vpop.f32.mrb[2].mxu0  ;;  %v851_v50 = vpop.f32.mrb[2].mxu1 }
 0x21d   :  { %v3067_v53 = vadd.f32 %v780_v47, %v3872_v37  ;;  %v782_v56 = vpop.f32.mrb[3].mxu0  ;;  %v853_v60 = vpop.f32.mrb[3].mxu1  ;;  %v3083_v10 = vadd.f32 %v851_v50, %v3878_v52  ;;  %v1170_v47 = vld [vmem:[%s4589_s2 + $0x40] sm:$0xff] }
 0x21e   :  { %v3068_v63 = vadd.f32 %v782_v56, %v3874_v39  ;;  %v3084_v13 = vadd.f32 %v853_v60, %v3881_v61  ;;  %v1174_v50 = vld [vmem:[%s4589_s2 + $0x60] sm:$0xff]  ;;  %v1172_v60 = vld [vmem:[%s4589_s2 + $0x50] sm:$0xff] }
 0x21f   :  { %v2461_v2 = vmul.f32 -1.442695, %v3067_v53  ;;  %v2463_v16 = vmul.f32 -1.442695, %v3083_v10  ;;  %v4013_v53 = vpack.c.bf16 %v1177_v45, %v1173_v42  ;;  %v4015_v56 = vpack.c.bf16 %v1174_v50, %v1170_v47  ;;  %v1183_v10 = vld [vmem:[%s4589_s2 + $0xa8] sm:$0xff]  ;;  %v1198_v42 = vld [vmem:[%s4589_s2 + $0x120] sm:$0xff] }
 0x220   :  { %v2462_v6 = vmul.f32 -1.442695, %v3068_v63  ;;  %v1176_v63 = vld [vmem:[%s4589_s2 + $0x70] sm:$0xff]  ;;  %v4121_v45 = vpack.c.bf16 %v1201_v34, %v1197_v30  ;;  %v4123_v47 = vpack.c.bf16 %v1198_v42, %v1194_v35  ;;  %v1465_v34 = vld [vmem:[%s4589_s2 + $0x178] sm:$0xff]  ;;  %v1458_v35 = vld [vmem:[%s4589_s2 + $0x140] sm:$0xff] }
 0x221   :  { %3146 = vpow2.f32 %v2461_v2  ;;  %v4024_v2 = vpack.c.bf16 %v1176_v63, %v1172_v60  ;;  %v1196_v50 = vld [vmem:[%s4589_s2 + $0x110] sm:$0xff]  ;;  %v1462_v42 = vld [vmem:[%s4589_s2 + $0x160] sm:$0xff] }
 0x222   :  { %3148 = vpow2.f32 %v2462_v6  ;;  %v1179_v6 = vld [vmem:[%s4589_s2 + $0x88] sm:$0xff]  ;;  %v1200_v60 = vld [vmem:[%s4589_s2 + $0x130] sm:$0xff] }
 0x223   :  { %3150 = vtanh.f32 %v3084_v13  ;;  %v1181_v13 = vld [vmem:[%s4589_s2 + $0x98] sm:$0xff]  ;;  %v4132_v63 = vpack.c.bf16 %v1200_v60, %v1196_v50  ;;  %v4212_v50 = vpack.c.bf16 %v1465_v34, %v1461_v20  ;;  %v4214_v60 = vpack.c.bf16 %v1462_v42, %v1458_v35 }
 0x224   :  { %3152 = vpow2.f32 %v2463_v16  ;;  %v4038_v16 = vpack.c.bf16 %v1183_v10, %v1179_v6 }
 0x22b   :  { %v3147_v19 = vpop.eup %3146 }
 0x22c   :  { %v869_v23 = vadd.f32 1.0, %v3147_v19  ;;  %v3149_v26 = vpop.eup %3148  ;;  %v1185_v19 = vld [vmem:[%s4589_s2 + $0xb8] sm:$0xff] }
 0x22d   :  { %v870_v29 = vadd.f32 1.0, %v3149_v26  ;;  %v3151_v36 = vpop.eup %3150  ;;  %v1182_v26 = vld [vmem:[%s4589_s2 + $0xa0] sm:$0xff] }
 0x22e   :  { %3154 = vrcp.f32 %v869_v23  ;;  %v3153_v40 = vpop.eup %3152  ;;  %v1178_v23 = vld [vmem:[%s4589_s2 + $0x80] sm:$0xff] }
 0x22f   :  { %3156 = vrcp.f32 %v870_v29  ;;  %v871_v49 = vadd.f32 1.0, %v3153_v40  ;;  %v4049_v29 = vpack.c.bf16 %v1185_v19, %v1181_v13  ;;  %v4051_v32 = vpack.c.bf16 %v1182_v26, %v1178_v23  ;;  %v1184_v40 = vld [vmem:[%s4589_s2 + $0xb0] sm:$0xff] }
 0x230   :  { %v895_v26 = vmul.f32 0.0, %v3940_v46 }
 0x231   :  { %3158 = vrcp.f32 %v871_v49  ;;  %v1189_v49 = vld [vmem:[%s4589_s2 + $0xd8] sm:$0xff] }
 0x238   :  { %v3155_v28 = vpop.eup %3154 }
 0x239   :  { %v880_v38 = vmul.f32 %v3155_v28, %v3151_v36  ;;  %v3157_v41 = vpop.eup %3156  ;;  %v1180_v36 = vld [vmem:[%s4589_s2 + $0x90] sm:$0xff] }
 0x23a   :  { %v879_v51 = vmul.f32 %v3157_v41, %v3940_v46  ;;  %v4060_v28 = vpack.c.bf16 %v1184_v40, %v1180_v36  ;;  %v1191_v41 = vld [vmem:[%s4589_s2 + $0xe8] sm:$0xff] }
 0x23b   :  { %v3159_v57 = vpop.eup %3158 }
 0x23c   :  { %v3943_v55 = vadd.f32 %v880_v38, %v879_v51  ;;  %v1187_v38 = vld [vmem:[%s4589_s2 + $0xc8] sm:$0xff] }
 0x23d   :  { %v4074_v51 = vpack.c.bf16 %v1191_v41, %v1187_v38 }
 0x23e   :  { %3160 = vtanh.f32 %v3943_v55  ;;  %v4157_v40 = vadd.f32 %v895_v26, %v3943_v55  ;;  %v1459_v55 = vld [vmem:[%s4589_s2 + $0x148] sm:$0xff] }
 0x248   :  { %v3161_v59 = vpop.eup %3160 }
 0x249   :  { %v883_v0 = vmul.f32 %v3161_v59, %v3159_v57  ;;  %v1193_v57 = vld [vmem:[%s4589_s2 + $0xf8] sm:$0xff]  ;;  %v1186_v59 = vld [vmem:[%s4589_s2 + $0xc0] sm:$0xff] }
 0x24b   :  { %v3947_v5 = vadd.f32 %v892_v1, %v883_v0  ;;  %v1190_v0 = vld [vmem:[%s4589_s2 + $0xe0] sm:$0xff]  ;;  %v4085_v1 = vpack.c.bf16 %v1193_v57, %v1189_v49 }
 0x24c   :  { %v4087_v7 = vpack.c.bf16 %v1190_v0, %v1186_v59 }
 0x24d   :  { %2464 = vst [vmem:[%s4594_s6 + $0x8] sm:$0xff] %v3947_v5  ;;  %1035 = vmatmul.mubr.f32.vlgmr.msra.gmra.mrb[4].mxu0 %v3947_v5  ;;  %1106 = vmatmul.mubr.f32.vlgmr.msra.gmra.mrb[4].mxu1 %v3947_v5  ;;  %v1148_v17 = vmul.f32 0.0, %v3947_v5  ;;  %v1463_v5 = vld [vmem:[%s4589_s2 + $0x168] sm:$0xff] }
 0x24e   :  { %1290 = vmatprep.mubr.f32.mxu0 %v3258_v3  ;;  %1361 = vmatprep.mubr.f32.mxu1 %v3258_v3  ;;  %v4201_v30 = vpack.c.bf16 %v1463_v5, %v1459_v55 }
 0x24f   :  { %2748 = vmatpush1.bf16.msra.mxu0 %v3979_v24  ;;  %2780 = vmatpush1.bf16.msra.mxu1 %v3988_v33 }
 0x250   :  { %2750 = vmatprep.subr.bf16.mxu0 %v4002_v43  ;;  %2782 = vmatprep.subr.bf16.mxu1 %v4013_v53 }
 0x253   :  { %2752 = vmatpush1.bf16.msra.mxu0 %v4015_v56  ;;  %2784 = vmatpush1.bf16.msra.mxu1 %v4024_v2 }
 0x254   :  { %2754 = vmatprep.subr.bf16.mxu0 %v4038_v16  ;;  %2786 = vmatprep.subr.bf16.mxu1 %v4049_v29 }
 0x257   :  { %2756 = vmatpush1.bf16.msra.mxu0 %v4051_v32  ;;  %2788 = vmatpush1.bf16.msra.mxu1 %v4060_v28 }
 0x258   :  { %2758 = vmatprep.subr.bf16.mxu0 %v4074_v51  ;;  %2790 = vmatprep.subr.bf16.mxu1 %v4085_v1 }
 0x25b   :  { %2760 = vmatpush1.bf16.msra.mxu0 %v4087_v7  ;;  %2792 = vmatpush1.bf16.msra.mxu1 %v4096_v15 }
 0x25c   :  { %2762 = vmatprep.subr.bf16.mxu0 %v4110_v31  ;;  %2794 = vmatprep.subr.bf16.mxu1 %v4121_v45 }
 0x25f   :  { %2764 = vmatpush1.bf16.msra.mxu0 %v4123_v47  ;;  %2796 = vmatpush1.bf16.msra.mxu1 %v4132_v63 }
 0x260   :  { %2766 = vmatprep.subr.bf16.mxu0 %v3716_v44  ;;  %2798 = vmatprep.subr.bf16.mxu1 %v3725_v48 }
 0x263   :  { %2768 = vmatpush1.bf16.msra.mxu0 %v3737_v54  ;;  %2800 = vmatpush1.bf16.msra.mxu1 %v3747_v58 }
 0x264   :  { %2770 = vmatprep.subr.bf16.mxu0 %v3757_v62  ;;  %2802 = vmatprep.subr.bf16.mxu1 %v3766_v4 }
 0x267   :  { %2772 = vmatpush1.bf16.msra.mxu0 %v3778_v9  ;;  %2804 = vmatpush1.bf16.msra.mxu1 %v3788_v14 }
 0x268   :  { %2774 = vmatprep.subr.bf16.mxu0 %v3798_v18  ;;  %2806 = vmatprep.subr.bf16.mxu1 %v3807_v22 }
 0x26b   :  { %2776 = vmatpush1.bf16.msra.mxu0 %v3813_v25  ;;  %2808 = vmatpush1.bf16.msra.mxu1 %v3817_v27 }
 0x26c   :  { %2810 = vmatprep.subr.bf16.mxu0 %v3966_v12  ;;  %2842 = vmatprep.subr.bf16.mxu1 %v3977_v21 }
 0x320   :  { %v1036_v44 = vpop.f32.mrb[4].mxu0  ;;  %v1107_v48 = vpop.f32.mrb[4].mxu1 }
 0x321   :  { %v3069_v54 = vadd.f32 %v1036_v44, %v3872_v37  ;;  %v1038_v58 = vpop.f32.mrb[5].mxu0  ;;  %v1109_v62 = vpop.f32.mrb[5].mxu1  ;;  %v3085_v18 = vadd.f32 %v1107_v48, %v3878_v52  ;;  %v1460_v44 = vld [vmem:[%s4589_s2 + $0x150] sm:$0xff] }
 0x322   :  { %v3070_v4 = vadd.f32 %v1038_v58, %v3874_v39  ;;  %v3086_v22 = vadd.f32 %v1109_v62, %v3881_v61  ;;  %v1464_v48 = vld [vmem:[%s4589_s2 + $0x170] sm:$0xff]  ;;  %v1471_v62 = vld [vmem:[%s4589_s2 + $0x1a8] sm:$0xff] }
 0x323   :  { %v2465_v9 = vmul.f32 -1.442695, %v3069_v54  ;;  %v2467_v25 = vmul.f32 -1.442695, %v3085_v18  ;;  %v1467_v54 = vld [vmem:[%s4589_s2 + $0x188] sm:$0xff]  ;;  %v4226_v58 = vpack.c.bf16 %v1464_v48, %v1460_v44 }
 0x324   :  { %v2466_v14 = vmul.f32 -1.442695, %v3070_v4  ;;  %v1469_v4 = vld [vmem:[%s4589_s2 + $0x198] sm:$0xff] }
 0x325   :  { %3162 = vpow2.f32 %v2465_v9  ;;  %v1473_v9 = vld [vmem:[%s4589_s2 + $0x1b8] sm:$0xff] }
 0x326   :  { %3164 = vpow2.f32 %v2466_v14  ;;  %v4239_v14 = vpack.c.bf16 %v1471_v62, %v1467_v54  ;;  %v4241_v18 = vpack.c.bf16 %v1473_v9, %v1469_v4 }
 0x327   :  { %3166 = vtanh.f32 %v3086_v22  ;;  %v1466_v22 = vld [vmem:[%s4589_s2 + $0x180] sm:$0xff] }
 0x328   :  { %3168 = vpow2.f32 %v2467_v25  ;;  %v1470_v25 = vld [vmem:[%s4589_s2 + $0x1a0] sm:$0xff] }
 0x32f   :  { %v3163_v27 = vpop.eup %3162 }
 0x330   :  { %v1125_v6 = vadd.f32 1.0, %v3163_v27  ;;  %v3165_v10 = vpop.eup %3164  ;;  %v1468_v27 = vld [vmem:[%s4589_s2 + $0x190] sm:$0xff] }
 0x331   :  { %v1126_v13 = vadd.f32 1.0, %v3165_v10  ;;  %v3167_v19 = vpop.eup %3166  ;;  %v1472_v10 = vld [vmem:[%s4589_s2 + $0x1b0] sm:$0xff] }
 0x332   :  { %3170 = vrcp.f32 %v1125_v6  ;;  %v3169_v23 = vpop.eup %3168  ;;  %v4253_v6 = vpack.c.bf16 %v1470_v25, %v1466_v22 }
 0x333   :  { %3172 = vrcp.f32 %v1126_v13  ;;  %v1127_v49 = vadd.f32 1.0, %v3169_v23  ;;  %v1475_v13 = vld [vmem:[%s4589_s2 + $0x1c8] sm:$0xff]  ;;  %v4266_v23 = vpack.c.bf16 %v1472_v10, %v1468_v27 }
 0x335   :  { %3174 = vrcp.f32 %v1127_v49 }
 0x33c   :  { %v3171_v36 = vpop.eup %3170 }
 0x33d   :  { %v1136_v38 = vmul.f32 %v3171_v36, %v3167_v19  ;;  %v3173_v41 = vpop.eup %3172  ;;  %v1479_v19 = vld [vmem:[%s4589_s2 + $0x1e8] sm:$0xff]  ;;  %v1477_v36 = vld [vmem:[%s4589_s2 + $0x1d8] sm:$0xff] }
 0x33e   :  { %v1135_v57 = vmul.f32 %v3173_v41, %v4157_v40  ;;  %v4268_v26 = vpack.c.bf16 %v1479_v19, %v1475_v13  ;;  %v1474_v41 = vld [vmem:[%s4589_s2 + $0x1c0] sm:$0xff]  ;;  %v1151_v19 = vmul.f32 0.0, %v4157_v40 }
 0x33f   :  { %v3175_v0 = vpop.eup %3174 }
 0x340   :  { %v4160_v59 = vadd.f32 %v1136_v38, %v1135_v57  ;;  %v1481_v38 = vld [vmem:[%s4589_s2 + $0x1f8] sm:$0xff]  ;;  %v1478_v57 = vld [vmem:[%s4589_s2 + $0x1e0] sm:$0xff] }
 0x341   :  { %v4279_v49 = vpack.c.bf16 %v1481_v38, %v1477_v36 }
 0x342   :  { %3176 = vtanh.f32 %v4160_v59  ;;  %v4308_v38 = vadd.f32 %v1151_v19, %v4160_v59 }
 0x34c   :  { %v3177_v8 = vpop.eup %3176 }
 0x34d   :  { %v1139_v11 = vmul.f32 %v3177_v8, %v3175_v0  ;;  %v1476_v0 = vld [vmem:[%s4589_s2 + $0x1d0] sm:$0xff] }
 0x34e   :  { %v1480_v8 = vld [vmem:[%s4589_s2 + $0x1f0] sm:$0xff] }
 0x34f   :  { %v4164_v46 = vadd.f32 %v1148_v17, %v1139_v11  ;;  %v4291_v11 = vpack.c.bf16 %v1478_v57, %v1474_v41  ;;  %v4295_v17 = vpack.c.bf16 %v1480_v8, %v1476_v0 }
 0x351   :  { %2468 = vst [vmem:[%s4594_s6 + $0x10] sm:$0xff] %v4164_v46  ;;  %1291 = vmatmul.mubr.f32.vlgmr.msra.gmra.mrb[6].mxu0 %v4164_v46  ;;  %1362 = vmatmul.mubr.f32.vlgmr.msra.gmra.mrb[6].mxu1 %v4164_v46 }
 0x352   :  { %2812 = vmatpush1.bf16.msra.mxu0 %v3979_v24  ;;  %2844 = vmatpush1.bf16.msra.mxu1 %v3988_v33 }
 0x353   :  { %2814 = vmatprep.subr.bf16.mxu0 %v4002_v43  ;;  %2846 = vmatprep.subr.bf16.mxu1 %v4013_v53 }
 0x354   :  { %1546 = vmatprep.mubr.f32.mxu0 %v3258_v3  ;;  %1617 = vmatprep.mubr.f32.mxu1 %v3258_v3 }
 0x356   :  { %2816 = vmatpush1.bf16.msra.mxu0 %v4015_v56  ;;  %2848 = vmatpush1.bf16.msra.mxu1 %v4024_v2 }
 0x357   :  { %2818 = vmatprep.subr.bf16.mxu0 %v4038_v16  ;;  %2850 = vmatprep.subr.bf16.mxu1 %v4049_v29 }
 0x35a   :  { %2820 = vmatpush1.bf16.msra.mxu0 %v4051_v32  ;;  %2852 = vmatpush1.bf16.msra.mxu1 %v4060_v28 }
 0x35b   :  { %2822 = vmatprep.subr.bf16.mxu0 %v4074_v51  ;;  %2854 = vmatprep.subr.bf16.mxu1 %v4085_v1 }
 0x35e   :  { %2824 = vmatpush1.bf16.msra.mxu0 %v4087_v7  ;;  %2856 = vmatpush1.bf16.msra.mxu1 %v4096_v15 }
 0x35f   :  { %2826 = vmatprep.subr.bf16.mxu0 %v4110_v31  ;;  %2858 = vmatprep.subr.bf16.mxu1 %v4121_v45 }
 0x362   :  { %2828 = vmatpush1.bf16.msra.mxu0 %v4123_v47  ;;  %2860 = vmatpush1.bf16.msra.mxu1 %v4132_v63 }
 0x363   :  { %2830 = vmatprep.subr.bf16.mxu0 %v4201_v30  ;;  %2862 = vmatprep.subr.bf16.mxu1 %v4212_v50 }
 0x366   :  { %2832 = vmatpush1.bf16.msra.mxu0 %v4214_v60  ;;  %2864 = vmatpush1.bf16.msra.mxu1 %v4226_v58 }
 0x367   :  { %2834 = vmatprep.subr.bf16.mxu0 %v4239_v14  ;;  %2866 = vmatprep.subr.bf16.mxu1 %v4241_v18 }
 0x36a   :  { %2836 = vmatpush1.bf16.msra.mxu0 %v4253_v6  ;;  %2868 = vmatpush1.bf16.msra.mxu1 %v4266_v23 }
 0x36b   :  { %2838 = vmatprep.subr.bf16.mxu0 %v4268_v26  ;;  %2870 = vmatprep.subr.bf16.mxu1 %v4279_v49 }
 0x36e   :  { %2840 = vmatpush1.bf16.msra.mxu0 %v4291_v11  ;;  %2872 = vmatpush1.bf16.msra.mxu1 %v4295_v17 }
 0x36f   :  { %2874 = vmatprep.subr.bf16.mxu0 %v3966_v12  ;;  %2906 = vmatprep.subr.bf16.mxu1 %v3977_v21 }
 0x424   :  { %v1292_v55 = vpop.f32.mrb[6].mxu0  ;;  %v1363_v5 = vpop.f32.mrb[6].mxu1 }
 0x425   :  { %v3071_v20 = vadd.f32 %v1292_v55, %v3872_v37  ;;  %v1294_v34 = vpop.f32.mrb[7].mxu0  ;;  %v1365_v35 = vpop.f32.mrb[7].mxu1  ;;  %v3087_v54 = vadd.f32 %v1363_v5, %v3878_v52 }
 0x426   :  { %v3072_v42 = vadd.f32 %v1294_v34, %v3874_v39  ;;  %v3088_v62 = vadd.f32 %v1365_v35, %v3881_v61  ;;  %v1404_v35 = vmul.f32 0.0, %v4164_v46 }
 0x427   :  { %v2469_v44 = vmul.f32 -1.442695, %v3071_v20  ;;  %v2471_v4 = vmul.f32 -1.442695, %v3087_v54 }
 0x428   :  { %v2470_v48 = vmul.f32 -1.442695, %v3072_v42 }
 0x429   :  { %3178 = vpow2.f32 %v2469_v44 }
 0x42a   :  { %3180 = vpow2.f32 %v2470_v48 }
 0x42b   :  { %3182 = vtanh.f32 %v3088_v62 }
 0x42c   :  { %3184 = vpow2.f32 %v2471_v4 }
 0x433   :  { %v3179_v9 = vpop.eup %3178 }
 0x434   :  { %v1381_v22 = vadd.f32 1.0, %v3179_v9  ;;  %v3181_v25 = vpop.eup %3180 }
 0x435   :  { %v1382_v27 = vadd.f32 1.0, %v3181_v25  ;;  %v3183_v10 = vpop.eup %3182 }
 0x436   :  { %3186 = vrcp.f32 %v1381_v22  ;;  %v3185_v13 = vpop.eup %3184 }
 0x437   :  { %3188 = vrcp.f32 %v1382_v27  ;;  %v1383_v0 = vadd.f32 1.0, %v3185_v13 }
 0x439   :  { %3190 = vrcp.f32 %v1383_v0 }
 0x440   :  { %v3187_v36 = vpop.eup %3186 }
 0x441   :  { %v1392_v41 = vmul.f32 %v3187_v36, %v3183_v10  ;;  %v3189_v57 = vpop.eup %3188  ;;  %v1407_v36 = vmul.f32 0.0, %v4308_v38 }
 0x442   :  { %v1391_v8 = vmul.f32 %v3189_v57, %v4308_v38 }
 0x443   :  { %v3191_v5 = vpop.eup %3190 }
 0x444   :  { %v4311_v55 = vadd.f32 %v1392_v41, %v1391_v8 }
 0x446   :  { %3192 = vtanh.f32 %v4311_v55  ;;  %v4363_v57 = vadd.f32 %v1407_v36, %v4311_v55  ;;  %v2193_v36 = vld [vmem:[%s4589_s2 + $0x38] sm:$0xff] }
 0x450   :  { %v3193_v20 = vpop.eup %3192 }
 0x451   :  { %v1395_v34 = vmul.f32 %v3193_v20, %v3191_v5 }
 0x453   :  { %v4315_v40 = vadd.f32 %v1404_v35, %v1395_v34 }
 0x455   :  { %2472 = vst [vmem:[%s4594_s6 + $0x18] sm:$0xff] %v4315_v40  ;;  %1547 = vmatmul.mubr.f32.vlgmr.msra.gmra.mrb[8].mxu0 %v4315_v40  ;;  %1618 = vmatmul.mubr.f32.vlgmr.msra.gmra.mrb[8].mxu1 %v4315_v40 }
 0x456   :  { %2876 = vmatpush1.bf16.msra.mxu0 %v3979_v24  ;;  %2908 = vmatpush1.bf16.msra.mxu1 %v3988_v33 }
 0x457   :  { %2878 = vmatprep.subr.bf16.mxu0 %v4002_v43  ;;  %2910 = vmatprep.subr.bf16.mxu1 %v4013_v53 }
 0x458   :  { %1802 = vmatprep.mubr.f32.mxu0 %v3258_v3  ;;  %1873 = vmatprep.mubr.f32.mxu1 %v3258_v3 }
 0x45a   :  { %2880 = vmatpush1.bf16.msra.mxu0 %v4015_v56  ;;  %2912 = vmatpush1.bf16.msra.mxu1 %v4024_v2 }
 0x45b   :  { %2882 = vmatprep.subr.bf16.mxu0 %v4038_v16  ;;  %2914 = vmatprep.subr.bf16.mxu1 %v4049_v29 }
 0x45e   :  { %2884 = vmatpush1.bf16.msra.mxu0 %v4051_v32  ;;  %2916 = vmatpush1.bf16.msra.mxu1 %v4060_v28 }
 0x45f   :  { %2886 = vmatprep.subr.bf16.mxu0 %v4074_v51  ;;  %2918 = vmatprep.subr.bf16.mxu1 %v4085_v1 }
 0x462   :  { %2888 = vmatpush1.bf16.msra.mxu0 %v4087_v7  ;;  %2920 = vmatpush1.bf16.msra.mxu1 %v4096_v15 }
 0x463   :  { %2890 = vmatprep.subr.bf16.mxu0 %v4110_v31  ;;  %2922 = vmatprep.subr.bf16.mxu1 %v4121_v45 }
 0x466   :  { %2892 = vmatpush1.bf16.msra.mxu0 %v4123_v47  ;;  %2924 = vmatpush1.bf16.msra.mxu1 %v4132_v63 }
 0x467   :  { %2894 = vmatprep.subr.bf16.mxu0 %v4201_v30  ;;  %2926 = vmatprep.subr.bf16.mxu1 %v4212_v50 }
 0x46a   :  { %2896 = vmatpush1.bf16.msra.mxu0 %v4214_v60  ;;  %2928 = vmatpush1.bf16.msra.mxu1 %v4226_v58 }
 0x46b   :  { %2898 = vmatprep.subr.bf16.mxu0 %v4239_v14  ;;  %2930 = vmatprep.subr.bf16.mxu1 %v4241_v18 }
 0x46e   :  { %2900 = vmatpush1.bf16.msra.mxu0 %v4253_v6  ;;  %2932 = vmatpush1.bf16.msra.mxu1 %v4266_v23 }
 0x46f   :  { %2902 = vmatprep.subr.bf16.mxu0 %v4268_v26  ;;  %2934 = vmatprep.subr.bf16.mxu1 %v4279_v49 }
 0x472   :  { %2904 = vmatpush1.bf16.msra.mxu0 %v4291_v11  ;;  %2936 = vmatpush1.bf16.msra.mxu1 %v4295_v17 }
 0x473   :  { %2938 = vmatprep.subr.bf16.mxu0 %v3966_v12  ;;  %2970 = vmatprep.subr.bf16.mxu1 %v3977_v21 }
 0x528   :  { %v1548_v59 = vpop.f32.mrb[8].mxu0  ;;  %v1619_v46 = vpop.f32.mrb[8].mxu1 }
 0x529   :  { %v3073_v42 = vadd.f32 %v1548_v59, %v3872_v37  ;;  %v1550_v44 = vpop.f32.mrb[9].mxu0  ;;  %v1621_v48 = vpop.f32.mrb[9].mxu1  ;;  %v3089_v9 = vadd.f32 %v1619_v46, %v3878_v52 }
 0x52a   :  { %v3074_v54 = vadd.f32 %v1550_v44, %v3874_v39  ;;  %v3090_v22 = vadd.f32 %v1621_v48, %v3881_v61 }
 0x52b   :  { %v2473_v62 = vmul.f32 -1.442695, %v3073_v42  ;;  %v2475_v25 = vmul.f32 -1.442695, %v3089_v9  ;;  %v1660_v42 = vmul.f32 0.0, %v4315_v40 }
 0x52c   :  { %v2474_v4 = vmul.f32 -1.442695, %v3074_v54 }
 0x52d   :  { %3194 = vpow2.f32 %v2473_v62 }
 0x52e   :  { %3196 = vpow2.f32 %v2474_v4 }
 0x52f   :  { %3198 = vtanh.f32 %v3090_v22 }
 0x530   :  { %3200 = vpow2.f32 %v2475_v25 }
 0x537   :  { %v3195_v12 = vpop.eup %3194 }
 0x538   :  { %v1637_v27 = vadd.f32 1.0, %v3195_v12  ;;  %v3197_v21 = vpop.eup %3196 }
 0x539   :  { %v1638_v10 = vadd.f32 1.0, %v3197_v21  ;;  %v3199_v13 = vpop.eup %3198  ;;  %v2187_v21 = vld [vmem:[%s4589_s2 + $0x8] sm:$0xff] }
 0x53a   :  { %3202 = vrcp.f32 %v1637_v27  ;;  %v3201_v19 = vpop.eup %3200 }
 0x53b   :  { %3204 = vrcp.f32 %v1638_v10  ;;  %v1639_v5 = vadd.f32 1.0, %v3201_v19  ;;  %v2191_v10 = vld [vmem:[%s4589_s2 + $0x28] sm:$0xff] }
 0x53c   :  { %v3001_v19 = vpack.c.bf16 %v2191_v10, %v2187_v21  ;;  %v2212_v21 = vld [vmem:[%s4589_s2 + $0xd0] sm:$0xff] }
 0x53d   :  { %3206 = vrcp.f32 %v1639_v5  ;;  %v2192_v5 = vld [vmem:[%s4589_s2 + $0x30] sm:$0xff] }
 0x53e   :  { %v2216_v10 = vld [vmem:[%s4589_s2 + $0xf0] sm:$0xff] }
 0x544   :  { %v3203_v41 = vpop.eup %3202 }
 0x545   :  { %v1648_v0 = vmul.f32 %v3203_v41, %v3199_v13  ;;  %v3205_v8 = vpop.eup %3204  ;;  %v2189_v13 = vld [vmem:[%s4589_s2 + $0x18] sm:$0xff]  ;;  %v2190_v41 = vld [vmem:[%s4589_s2 + $0x20] sm:$0xff] }
 0x546   :  { %v1647_v20 = vmul.f32 %v3205_v8, %v4363_v57  ;;  %v2188_v8 = vld [vmem:[%s4589_s2 + $0x10] sm:$0xff] }
 0x547   :  { %v3207_v35 = vpop.eup %3206 }
 0x548   :  { %v4366_v34 = vadd.f32 %v1648_v0, %v1647_v20  ;;  %v3035_v20 = vpack.c.bf16 %v2192_v5, %v2188_v8  ;;  %v2222_v8 = vld [vmem:[%s4589_s2 + $0x120] sm:$0xff] }
 0x54a   :  { %3208 = vtanh.f32 %v4366_v34 }
 0x554   :  { %v3209_v59 = vpop.eup %3208 }
 0x555   :  { %v1651_v46 = vmul.f32 %v3209_v59, %v3207_v35  ;;  %v2199_v35 = vld [vmem:[%s4589_s2 + $0x68] sm:$0xff]  ;;  %v2197_v59 = vld [vmem:[%s4589_s2 + $0x58] sm:$0xff] }
 0x557   :  { %v4370_v38 = vadd.f32 %v1660_v42, %v1651_v46  ;;  %v2201_v42 = vld [vmem:[%s4589_s2 + $0x78] sm:$0xff] }
 0x559   :  { %2476 = vst [vmem:[%s4594_s6 + $0x20] sm:$0xff] %v4370_v38  ;;  %1803 = vmatmul.mubr.f32.vlgmr.msra.gmra.mrb[10].mxu0 %v4370_v38  ;;  %1874 = vmatmul.mubr.f32.vlgmr.msra.gmra.mrb[10].mxu1 %v4370_v38  ;;  %v1916_v12 = vmul.f32 0.0, %v4370_v38  ;;  %v2194_v38 = vld [vmem:[%s4589_s2 + $0x40] sm:$0xff] }
 0x55a   :  { %2940 = vmatpush1.bf16.msra.mxu0 %v3979_v24  ;;  %2972 = vmatpush1.bf16.msra.mxu1 %v3988_v33 }
 0x55b   :  { %2942 = vmatprep.subr.bf16.mxu0 %v4002_v43  ;;  %2974 = vmatprep.subr.bf16.mxu1 %v4013_v53 }
 0x55c   :  { %2058 = vmatprep.mubr.f32.mxu0 %v3258_v3  ;;  %2129 = vmatprep.mubr.f32.mxu1 %v3258_v3 }
 0x55e   :  { %2944 = vmatpush1.bf16.msra.mxu0 %v4015_v56  ;;  %2976 = vmatpush1.bf16.msra.mxu1 %v4024_v2 }
 0x55f   :  { %2946 = vmatprep.subr.bf16.mxu0 %v4038_v16  ;;  %2978 = vmatprep.subr.bf16.mxu1 %v4049_v29 }
 0x562   :  { %2948 = vmatpush1.bf16.msra.mxu0 %v4051_v32  ;;  %2980 = vmatpush1.bf16.msra.mxu1 %v4060_v28 }
 0x563   :  { %2950 = vmatprep.subr.bf16.mxu0 %v4074_v51  ;;  %2982 = vmatprep.subr.bf16.mxu1 %v4085_v1 }
 0x566   :  { %2952 = vmatpush1.bf16.msra.mxu0 %v4087_v7  ;;  %2984 = vmatpush1.bf16.msra.mxu1 %v4096_v15 }
 0x567   :  { %2954 = vmatprep.subr.bf16.mxu0 %v4110_v31  ;;  %2986 = vmatprep.subr.bf16.mxu1 %v4121_v45 }
 0x56a   :  { %2956 = vmatpush1.bf16.msra.mxu0 %v4123_v47  ;;  %2988 = vmatpush1.bf16.msra.mxu1 %v4132_v63  ;;  %v1663_v63 = vmul.f32 0.0, %v4363_v57  ;;  %v3033_v57 = vpack.c.bf16 %v2193_v36, %v2189_v13  ;;  %v3047_v13 = vpack.c.bf16 %v2216_v10, %v2212_v21  ;;  %v2223_v36 = vld [vmem:[%s4589_s2 + $0x128] sm:$0xff] }
 0x56b   :  { %2958 = vmatprep.subr.bf16.mxu0 %v4201_v30  ;;  %2990 = vmatprep.subr.bf16.mxu1 %v4212_v50 }
 0x56c   :  { %v4416_v40 = vadd.f32 %v1663_v63, %v4366_v34  ;;  %v2195_v34 = vld [vmem:[%s4589_s2 + $0x48] sm:$0xff] }
 0x56d   :  { %v3005_v46 = vpack.c.bf16 %v2199_v35, %v2195_v34  ;;  %v2220_v34 = vld [vmem:[%s4589_s2 + $0x110] sm:$0xff] }
 0x56e   :  { %2960 = vmatpush1.bf16.msra.mxu0 %v4214_v60  ;;  %2992 = vmatpush1.bf16.msra.mxu1 %v4226_v58  ;;  %v2224_v35 = vld [vmem:[%s4589_s2 + $0x130] sm:$0xff] }
 0x56f   :  { %2962 = vmatprep.subr.bf16.mxu0 %v4239_v14  ;;  %2994 = vmatprep.subr.bf16.mxu1 %v4241_v18 }
 0x572   :  { %2964 = vmatpush1.bf16.msra.mxu0 %v4253_v6  ;;  %2996 = vmatpush1.bf16.msra.mxu1 %v4266_v23 }
 0x573   :  { %2966 = vmatprep.subr.bf16.mxu0 %v4268_v26  ;;  %2998 = vmatprep.subr.bf16.mxu1 %v4279_v49 }
 0x576   :  { %2968 = vmatpush1.bf16.msra.mxu0 %v4291_v11  ;;  %3000 = vmatpush1.bf16.msra.mxu1 %v4295_v17 }
 0x577   :  { %3002 = vmatprep.subr.bf16.mxu0 %v3001_v19  ;;  %3034 = vmatprep.subr.bf16.mxu1 %v3033_v57  ;;  %v2219_v19 = vld [vmem:[%s4589_s2 + $0x108] sm:$0xff]  ;;  %v2225_v57 = vld [vmem:[%s4589_s2 + $0x138] sm:$0xff] }
 0x62c   :  { %v1804_v24 = vpop.f32.mrb[10].mxu0  ;;  %v1875_v33 = vpop.f32.mrb[10].mxu1 }
 0x62d   :  { %v3075_v43 = vadd.f32 %v1804_v24, %v3872_v37  ;;  %v1806_v53 = vpop.f32.mrb[11].mxu0  ;;  %v1877_v56 = vpop.f32.mrb[11].mxu1  ;;  %v3091_v32 = vadd.f32 %v1875_v33, %v3878_v52  ;;  %v2198_v24 = vld [vmem:[%s4589_s2 + $0x60] sm:$0xff]  ;;  %v3037_v33 = vpack.c.bf16 %v2201_v42, %v2197_v59  ;;  %v3051_v59 = vpack.c.bf16 %v2224_v35, %v2220_v34 }
 0x62e   :  { %v3076_v2 = vadd.f32 %v1806_v53, %v3874_v39  ;;  %v3092_v28 = vadd.f32 %v1877_v56, %v3881_v61  ;;  %v2196_v53 = vld [vmem:[%s4589_s2 + $0x50] sm:$0xff] }
 0x62f   :  { %v2477_v16 = vmul.f32 -1.442695, %v3075_v43  ;;  %v2479_v51 = vmul.f32 -1.442695, %v3091_v32  ;;  %v3007_v43 = vpack.c.bf16 %v2198_v24, %v2194_v38  ;;  %v2200_v56 = vld [vmem:[%s4589_s2 + $0x70] sm:$0xff]  ;;  %v2205_v32 = vld [vmem:[%s4589_s2 + $0x98] sm:$0xff] }
 0x630   :  { %v2478_v29 = vmul.f32 -1.442695, %v3076_v2  ;;  %v3039_v2 = vpack.c.bf16 %v2200_v56, %v2196_v53 }
 0x631   :  { %3210 = vpow2.f32 %v2477_v16  ;;  %v2203_v16 = vld [vmem:[%s4589_s2 + $0x88] sm:$0xff] }
 0x632   :  { %3212 = vpow2.f32 %v2478_v29  ;;  %v2207_v29 = vld [vmem:[%s4589_s2 + $0xa8] sm:$0xff] }
 0x633   :  { %3214 = vtanh.f32 %v3092_v28  ;;  %v3009_v28 = vpack.c.bf16 %v2207_v29, %v2203_v16 }
 0x634   :  { %3216 = vpow2.f32 %v2479_v51  ;;  %v2209_v51 = vld [vmem:[%s4589_s2 + $0xb8] sm:$0xff] }
 0x63b   :  { %v3211_v1 = vpop.eup %3210 }
 0x63c   :  { %v1893_v7 = vadd.f32 1.0, %v3211_v1  ;;  %v3213_v15 = vpop.eup %3212  ;;  %v2202_v1 = vld [vmem:[%s4589_s2 + $0x80] sm:$0xff] }
 0x63d   :  { %v1894_v31 = vadd.f32 1.0, %v3213_v15  ;;  %v3215_v45 = vpop.eup %3214  ;;  %v3041_v15 = vpack.c.bf16 %v2209_v51, %v2205_v32 }
 0x63e   :  { %3218 = vrcp.f32 %v1893_v7  ;;  %v3217_v47 = vpop.eup %3216  ;;  %v2206_v7 = vld [vmem:[%s4589_s2 + $0xa0] sm:$0xff] }
 0x63f   :  { %3220 = vrcp.f32 %v1894_v31  ;;  %v1895_v54 = vadd.f32 1.0, %v3217_v47  ;;  %v3011_v31 = vpack.c.bf16 %v2206_v7, %v2202_v1  ;;  %v2208_v47 = vld [vmem:[%s4589_s2 + $0xb0] sm:$0xff] }
 0x641   :  { %3222 = vrcp.f32 %v1895_v54 }
 0x648   :  { %v3219_v55 = vpop.eup %3218 }
 0x649   :  { %v1904_v44 = vmul.f32 %v3219_v55, %v3215_v45  ;;  %v3221_v48 = vpop.eup %3220  ;;  %v2204_v45 = vld [vmem:[%s4589_s2 + $0x90] sm:$0xff]  ;;  %v2211_v55 = vld [vmem:[%s4589_s2 + $0xc8] sm:$0xff] }
 0x64a   :  { %v1903_v62 = vmul.f32 %v3221_v48, %v4416_v40  ;;  %v3043_v63 = vpack.c.bf16 %v2208_v47, %v2204_v45  ;;  %v2213_v48 = vld [vmem:[%s4589_s2 + $0xd8] sm:$0xff] }
 0x64b   :  { %v3223_v9 = vpop.eup %3222 }
 0x64c   :  { %v4419_v4 = vadd.f32 %v1904_v44, %v1903_v62  ;;  %v2215_v44 = vld [vmem:[%s4589_s2 + $0xe8] sm:$0xff]  ;;  %v2217_v62 = vld [vmem:[%s4589_s2 + $0xf8] sm:$0xff] }
 0x64d   :  { %v3013_v54 = vpack.c.bf16 %v2215_v44, %v2211_v55 }
 0x64e   :  { %3224 = vtanh.f32 %v4419_v4 }
 0x658   :  { %v3225_v22 = vpop.eup %3224 }
 0x659   :  { %v1907_v25 = vmul.f32 %v3225_v22, %v3223_v9  ;;  %v2210_v9 = vld [vmem:[%s4589_s2 + $0xc0] sm:$0xff] }
 0x65a   :  { %v2214_v22 = vld [vmem:[%s4589_s2 + $0xe0] sm:$0xff] }
 0x65b   :  { %v4423_v27 = vadd.f32 %v1916_v12, %v1907_v25  ;;  %v3045_v25 = vpack.c.bf16 %v2217_v62, %v2213_v48  ;;  %v3015_v12 = vpack.c.bf16 %v2214_v22, %v2210_v9 }
 0x65d   :  { %2480 = vst [vmem:[%s4594_s6 + $0x28] sm:$0xff] %v4423_v27  ;;  %2059 = vmatmul.mubr.f32.vlgmr.msra.gmra.mrb[12].mxu0 %v4423_v27  ;;  %2130 = vmatmul.mubr.f32.vlgmr.msra.gmra.mrb[12].mxu1 %v4423_v27 }
 0x65e   :  { %2314 = vmatprep.mubr.f32.mxu0 %v3258_v3  ;;  %2385 = vmatprep.mubr.f32.mxu1 %v3258_v3  ;;  %v2186_v3 = vld [vmem:[%s4589_s2] sm:$0xff] }
 0x65f   :  { %v3003_v0 = vpack.c.bf16 %v2190_v41, %v2186_v3  ;;  %3036 = vmatpush1.bf16.msra.mxu1 %v3035_v20  ;;  %v2221_v3 = vld [vmem:[%s4589_s2 + $0x118] sm:$0xff]  ;;  %v3017_v41 = vpack.c.bf16 %v2223_v36, %v2219_v19 }
 0x660   :  { %3038 = vmatprep.subr.bf16.mxu1 %v3037_v33  ;;  %v3049_v5 = vpack.c.bf16 %v2225_v57, %v2221_v3 }
 0x661   :  { %3004 = vmatpush1.bf16.msra.mxu0 %v3003_v0  ;;  %v2218_v0 = vld [vmem:[%s4589_s2 + $0x100] sm:$0xff] }
 0x662   :  { %3006 = vmatprep.subr.bf16.mxu0 %v3005_v46  ;;  %v3019_v20 = vpack.c.bf16 %v2222_v8, %v2218_v0 }
 0x663   :  { %3040 = vmatpush1.bf16.msra.mxu1 %v3039_v2 }
 0x664   :  { %3042 = vmatprep.subr.bf16.mxu1 %v3041_v15  ;;  %v2172_v15 = vmul.f32 0.0, %v4423_v27 }
 0x665   :  { %3008 = vmatpush1.bf16.msra.mxu0 %v3007_v43  ;;  %v1919_v43 = vmul.f32 0.0, %v4416_v40 }
 0x666   :  { %3010 = vmatprep.subr.bf16.mxu0 %v3009_v28 }
 0x667   :  { %3044 = vmatpush1.bf16.msra.mxu1 %v3043_v63  ;;  %v1920_v56 = vadd.f32 %v1919_v43, %v4419_v4 }
 0x668   :  { %3046 = vmatprep.subr.bf16.mxu1 %v3045_v25 }
 0x669   :  { %3012 = vmatpush1.bf16.msra.mxu0 %v3011_v31 }
 0x66a   :  { %3014 = vmatprep.subr.bf16.mxu0 %v3013_v54 }
 0x66b   :  { %3048 = vmatpush1.bf16.msra.mxu1 %v3047_v13 }
 0x66c   :  { %3050 = vmatprep.subr.bf16.mxu1 %v3049_v5 }
 0x66d   :  { %3016 = vmatpush1.bf16.msra.mxu0 %v3015_v12 }
 0x66e   :  { %3018 = vmatprep.subr.bf16.mxu0 %v3017_v41 }
 0x66f   :  { %3052 = vmatpush1.bf16.msra.mxu1 %v3051_v59 }
 0x670   :  { %3054 = vmatprep.subr.bf16.mxu1 %v4212_v50 }
 0x671   :  { %3020 = vmatpush1.bf16.msra.mxu0 %v3019_v20 }
 0x672   :  { %3022 = vmatprep.subr.bf16.mxu0 %v4201_v30 }
 0x673   :  { %3056 = vmatpush1.bf16.msra.mxu1 %v4226_v58 }
 0x674   :  { %3058 = vmatprep.subr.bf16.mxu1 %v4241_v18 }
 0x675   :  { %3024 = vmatpush1.bf16.msra.mxu0 %v4214_v60 }
 0x676   :  { %3026 = vmatprep.subr.bf16.mxu0 %v4239_v14 }
 0x677   :  { %3060 = vmatpush1.bf16.msra.mxu1 %v4266_v23 }
 0x678   :  { %3062 = vmatprep.subr.bf16.mxu1 %v4279_v49 }
 0x679   :  { %3028 = vmatpush1.bf16.msra.mxu0 %v4253_v6 }
 0x67a   :  { %3030 = vmatprep.subr.bf16.mxu0 %v4268_v26 }
 0x67b   :  { %3064 = vmatpush1.bf16.msra.mxu1 %v4295_v17 }
 0x67d   :  { %3032 = vmatpush1.bf16.msra.mxu0 %v4291_v11 }
 0x730   :  { %v2060_v30 = vpop.f32.mrb[12].mxu0  ;;  %v2131_v50 = vpop.f32.mrb[12].mxu1 }
 0x731   :  { %v3077_v60 = vadd.f32 %v2060_v30, %v3872_v37  ;;  %v2062_v58 = vpop.f32.mrb[13].mxu0  ;;  %v2133_v14 = vpop.f32.mrb[13].mxu1  ;;  %v3093_v23 = vadd.f32 %v2131_v50, %v3878_v52 }
 0x732   :  { %v3078_v18 = vadd.f32 %v2062_v58, %v3874_v39  ;;  %v3094_v26 = vadd.f32 %v2133_v14, %v3881_v61 }
 0x733   :  { %v2481_v46 = vmul.f32 -1.442695, %v3077_v60  ;;  %v2483_v49 = vmul.f32 -1.442695, %v3093_v23 }
 0x734   :  { %v2482_v6 = vmul.f32 -1.442695, %v3078_v18 }
 0x735   :  { %3226 = vpow2.f32 %v2481_v46 }
 0x736   :  { %3228 = vpow2.f32 %v2482_v6 }
 0x737   :  { %3230 = vtanh.f32 %v3094_v26 }
 0x738   :  { %3232 = vpow2.f32 %v2483_v49 }
 0x73f   :  { %v3227_v11 = vpop.eup %3226 }
 0x740   :  { %v2149_v42 = vadd.f32 1.0, %v3227_v11  ;;  %v3229_v17 = vpop.eup %3228 }
 0x741   :  { %v2150_v38 = vadd.f32 1.0, %v3229_v17  ;;  %v3231_v24 = vpop.eup %3230 }
 0x742   :  { %3234 = vrcp.f32 %v2149_v42  ;;  %v3233_v33 = vpop.eup %3232 }
 0x743   :  { %3236 = vrcp.f32 %v2150_v38  ;;  %v2151_v29 = vadd.f32 1.0, %v3233_v33 }
 0x745   :  { %3238 = vrcp.f32 %v2151_v29 }
 0x74c   :  { %v3235_v53 = vpop.eup %3234 }
 0x74d   :  { %v2160_v2 = vmul.f32 %v3235_v53, %v3231_v24  ;;  %v3237_v16 = vpop.eup %3236 }
 0x74e   :  { %v2159_v32 = vmul.f32 %v3237_v16, %v1920_v56 }
 0x74f   :  { %v3239_v51 = vpop.eup %3238 }
 0x750   :  { %v2161_v28 = vadd.f32 %v2160_v2, %v2159_v32 }
 0x752   :  { %3240 = vtanh.f32 %v2161_v28 }
 0x75c   :  { %v3241_v1 = vpop.eup %3240 }
 0x75d   :  { %v2163_v7 = vmul.f32 %v3241_v1, %v3239_v51 }
 0x75f   :  { %v2173_v31 = vadd.f32 %v2172_v15, %v2163_v7 }
 0x761   :  { %2484 = vst [vmem:[%s4594_s6 + $0x30] sm:$0xff] %v2173_v31  ;;  %2315 = vmatmul.mubr.f32.vlgmr.msra.gmra.mrb[14].mxu0 %v2173_v31  ;;  %2386 = vmatmul.mubr.f32.vlgmr.msra.gmra.mrb[14].mxu1 %v2173_v31  ;;  %v2428_v5 = vmul.f32 0.0, %v2173_v31 }
 0x834   :  { %v2316_v40 = vpop.f32.mrb[14].mxu0  ;;  %v2387_v4 = vpop.f32.mrb[14].mxu1 }
 0x835   :  { %v3079_v45 = vadd.f32 %v2316_v40, %v3872_v37  ;;  %v2318_v47 = vpop.f32.mrb[15].mxu0  ;;  %v2389_v63 = vpop.f32.mrb[15].mxu1  ;;  %v3095_v27 = vadd.f32 %v2387_v4, %v3878_v52 }
 0x836   :  { %v3080_v55 = vadd.f32 %v2318_v47, %v3874_v39  ;;  %v3096_v54 = vadd.f32 %v2389_v63, %v3881_v61  ;;  %v2175_v39 = vmul.f32 0.0, %v1920_v56 }
 0x837   :  { %v2485_v44 = vmul.f32 -1.442695, %v3079_v45  ;;  %v2487_v62 = vmul.f32 -1.442695, %v3095_v27 }
 0x838   :  { %v2486_v48 = vmul.f32 -1.442695, %v3080_v55  ;;  %v2176_v13 = vadd.f32 %v2175_v39, %v2161_v28 }
 0x839   :  { %3242 = vpow2.f32 %v2485_v44 }
 0x83a   :  { %3244 = vpow2.f32 %v2486_v48  ;;  %v2431_v61 = vmul.f32 0.0, %v2176_v13 }
 0x83b   :  { %3246 = vtanh.f32 %v3096_v54 }
 0x83c   :  { %3248 = vpow2.f32 %v2487_v62 }
 0x843   :  { %v3243_v9 = vpop.eup %3242 }
 0x844   :  { %v2405_v22 = vadd.f32 1.0, %v3243_v9  ;;  %v3245_v25 = vpop.eup %3244 }
 0x845   :  { %v2406_v37 = vadd.f32 1.0, %v3245_v25  ;;  %v3247_v12 = vpop.eup %3246 }
 0x846   :  { %3250 = vrcp.f32 %v2405_v22  ;;  %v3249_v21 = vpop.eup %3248 }
 0x847   :  { %3252 = vrcp.f32 %v2406_v37  ;;  %v2407_v3 = vadd.f32 1.0, %v3249_v21 }
 0x849   :  { %3254 = vrcp.f32 %v2407_v3 }
 0x850   :  { %v3251_v10 = vpop.eup %3250 }
 0x851   :  { %v2416_v19 = vmul.f32 %v3251_v10, %v3247_v12  ;;  %v3253_v36 = vpop.eup %3252 }
 0x852   :  { %v2415_v52 = vmul.f32 %v3253_v36, %v2176_v13 }
 0x853   :  { %v3255_v0 = vpop.eup %3254 }
 0x854   :  { %v2417_v41 = vadd.f32 %v2416_v19, %v2415_v52 }
 0x856   :  { %3256 = vtanh.f32 %v2417_v41  ;;  %v2432_v57 = vadd.f32 %v2431_v61, %v2417_v41 }
 0x858   :  { %2438 = vst [vmem:[%s4595_s8] sm:$0xff] %v2432_v57 }
 0x860   :  { %v3257_v8 = vpop.eup %3256 }
 0x861   :  { %v2419_v20 = vmul.f32 %v3257_v8, %v3255_v0 }
 0x863   :  { %v2429_v34 = vadd.f32 %v2428_v5, %v2419_v20 }
 0x865   :  { %2488 = vst [vmem:[%s4594_s6 + $0x38] sm:$0xff] %v2429_v34  ;;  %2437 = vst [vmem:[%s4596_s7] sm:$0xff] %v2429_v34 }

// kernel: lstm_model_forward.3
= control target key start
LH: loop header
LB: loop body
LE: loop exit
PB: predicated region body
PF: predicated region fallthrough
CT: control target
= control target key end

     0   :  { %v4626_v3 = vmov 0.0   ;;  %vm4628_vm0 = vmmov 0   ;;  %s6445_s1 = inlined_call_operand.vmem [shape: f32[128,512], index: 1, kind: input, shape index: {}]   ;;  %s6446_s2 = inlined_call_operand.vmem [shape: f32[128,512], index: 2, kind: input, shape index: {}]   ;;  %s6447_s0 = inlined_call_operand.vmem [shape: f32[64,128], index: 0, kind: input, shape index: {}]   ;;  %s6448_s4 = inlined_call_operand.vmem [shape: f32[8,128], index: 4, kind: input, shape index: {}]   ;;  %s6449_s6 = inlined_call_operand.vmem [shape: f32[128,128], index: 6, kind: input, shape index: {}]   ;;  %s6450_s3 = inlined_call_operand.vmem [shape: f32[1,512], index: 3, kind: input, shape index: {}]   ;;  %s6451_s5 = inlined_call_operand.vmem [shape: f32[8,128], index: 5, kind: input, shape index: {}]   ;;  %s6452_s7 = inlined_call_operand.vmem [shape: f32[1,128], index: 7, kind: input, shape index: {}]   ;;  %s6453_s8 = inlined_call_operand.vmem [shape: f32[64,128], index: 8, kind: output, shape index: {0}]   ;;  %s6454_s10 = inlined_call_operand.vmem [shape: f32[8,128], index: 10, kind: output, shape index: {2}]   ;;  %s6455_s9 = inlined_call_operand.vmem [shape: f32[8,128], index: 9, kind: output, shape index: {1}]  }
   0x1   :  { %v49_v0 = vld [vmem:[%s6445_s1 + $0x8] sm:$0xff]  ;;  %v51_v2 = vld [vmem:[%s6445_s1 + $0x18] sm:$0xff]  ;;  %198 = vmatprep.mubr.f32.mxu0 %v4626_v3  ;;  %311 = vmatprep.mubr.f32.mxu1 %v4626_v3  ;;  %v48_v6 = vld [vmem:[%s6445_s1] sm:$0xff] }
   0x2   :  { %v53_v1 = vld [vmem:[%s6445_s1 + $0x28] sm:$0xff]  ;;  %v55_v5 = vld [vmem:[%s6445_s1 + $0x38] sm:$0xff]  ;;  %v52_v7 = vld [vmem:[%s6445_s1 + $0x20] sm:$0xff] }
   0x3   :  { %v3663_v4 = vpack.c.bf16 %v53_v1, %v49_v0  ;;  %v3695_v8 = vpack.c.bf16 %v55_v5, %v51_v2  ;;  %v3665_v9 = vpack.c.bf16 %v52_v7, %v48_v6  ;;  %v50_v10 = vld [vmem:[%s6445_s1 + $0x10] sm:$0xff]  ;;  %v57_v12 = vld [vmem:[%s6445_s1 + $0x48] sm:$0xff]  ;;  %v59_v15 = vld [vmem:[%s6445_s1 + $0x58] sm:$0xff] }
   0x4   :  { %v54_v11 = vld [vmem:[%s6445_s1 + $0x30] sm:$0xff]  ;;  %v61_v14 = vld [vmem:[%s6445_s1 + $0x68] sm:$0xff]  ;;  %v63_v16 = vld [vmem:[%s6445_s1 + $0x78] sm:$0xff] }
   0x5   :  { %3664 = vmatprep.subr.bf16.mxu0 %v3663_v4  ;;  %v3697_v13 = vpack.c.bf16 %v54_v11, %v50_v10  ;;  %3696 = vmatprep.subr.bf16.mxu1 %v3695_v8  ;;  %v3667_v17 = vpack.c.bf16 %v61_v14, %v57_v12  ;;  %v3699_v18 = vpack.c.bf16 %v63_v16, %v59_v15  ;;  %v56_v19 = vld [vmem:[%s6445_s1 + $0x40] sm:$0xff]  ;;  %v58_v21 = vld [vmem:[%s6445_s1 + $0x50] sm:$0xff]  ;;  %v65_v24 = vld [vmem:[%s6445_s1 + $0x88] sm:$0xff] }
   0x6   :  { %3666 = vmatpush1.bf16.msra.mxu0 %v3665_v9  ;;  %v60_v20 = vld [vmem:[%s6445_s1 + $0x60] sm:$0xff]  ;;  %v62_v23 = vld [vmem:[%s6445_s1 + $0x70] sm:$0xff]  ;;  %v69_v25 = vld [vmem:[%s6445_s1 + $0xa8] sm:$0xff] }
   0x7   :  { %3698 = vmatpush1.bf16.msra.mxu1 %v3697_v13  ;;  %v3669_v22 = vpack.c.bf16 %v60_v20, %v56_v19  ;;  %3668 = vmatprep.subr.bf16.mxu0 %v3667_v17  ;;  %v3701_v26 = vpack.c.bf16 %v62_v23, %v58_v21  ;;  %v3671_v27 = vpack.c.bf16 %v69_v25, %v65_v24  ;;  %v67_v28 = vld [vmem:[%s6445_s1 + $0x98] sm:$0xff]  ;;  %v64_v30 = vld [vmem:[%s6445_s1 + $0x80] sm:$0xff]  ;;  %v66_v33 = vld [vmem:[%s6445_s1 + $0x90] sm:$0xff] }
   0x8   :  { %3700 = vmatprep.subr.bf16.mxu1 %v3699_v18  ;;  %v71_v29 = vld [vmem:[%s6445_s1 + $0xb8] sm:$0xff]  ;;  %v68_v32 = vld [vmem:[%s6445_s1 + $0xa0] sm:$0xff]  ;;  %v70_v34 = vld [vmem:[%s6445_s1 + $0xb0] sm:$0xff] }
   0x9   :  { %v3703_v31 = vpack.c.bf16 %v71_v29, %v67_v28  ;;  %v3673_v35 = vpack.c.bf16 %v68_v32, %v64_v30  ;;  %v73_v36 = vld [vmem:[%s6445_s1 + $0xc8] sm:$0xff]  ;;  %v75_v38 = vld [vmem:[%s6445_s1 + $0xd8] sm:$0xff]  ;;  %v3705_v39 = vpack.c.bf16 %v70_v34, %v66_v33  ;;  %v72_v42 = vld [vmem:[%s6445_s1 + $0xc0] sm:$0xff] }
   0xa   :  { %3670 = vmatpush1.bf16.msra.mxu0 %v3669_v22  ;;  %v77_v37 = vld [vmem:[%s6445_s1 + $0xe8] sm:$0xff]  ;;  %v79_v41 = vld [vmem:[%s6445_s1 + $0xf8] sm:$0xff]  ;;  %v76_v43 = vld [vmem:[%s6445_s1 + $0xe0] sm:$0xff] }
   0xb   :  { %3702 = vmatpush1.bf16.msra.mxu1 %v3701_v26  ;;  %3672 = vmatprep.subr.bf16.mxu0 %v3671_v27  ;;  %v3675_v40 = vpack.c.bf16 %v77_v37, %v73_v36  ;;  %v3707_v44 = vpack.c.bf16 %v79_v41, %v75_v38  ;;  %v74_v45 = vld [vmem:[%s6445_s1 + $0xd0] sm:$0xff]  ;;  %v81_v47 = vld [vmem:[%s6445_s1 + $0x108] sm:$0xff]  ;;  %v83_v49 = vld [vmem:[%s6445_s1 + $0x118] sm:$0xff]  ;;  %v3677_v51 = vpack.c.bf16 %v76_v43, %v72_v42 }
   0xc   :  { %3704 = vmatprep.subr.bf16.mxu1 %v3703_v31  ;;  %v78_v46 = vld [vmem:[%s6445_s1 + $0xf0] sm:$0xff]  ;;  %v85_v48 = vld [vmem:[%s6445_s1 + $0x128] sm:$0xff]  ;;  %v87_v50 = vld [vmem:[%s6445_s1 + $0x138] sm:$0xff] }
   0xd   :  { %v3709_v52 = vpack.c.bf16 %v78_v46, %v74_v45  ;;  %v3679_v53 = vpack.c.bf16 %v85_v48, %v81_v47  ;;  %v80_v54 = vld [vmem:[%s6445_s1 + $0x100] sm:$0xff]  ;;  %v82_v56 = vld [vmem:[%s6445_s1 + $0x110] sm:$0xff]  ;;  %v3711_v57 = vpack.c.bf16 %v87_v50, %v83_v49  ;;  %v89_v59 = vld [vmem:[%s6445_s1 + $0x148] sm:$0xff] }
   0xe   :  { %3674 = vmatpush1.bf16.msra.mxu0 %v3673_v35  ;;  %v84_v55 = vld [vmem:[%s6445_s1 + $0x120] sm:$0xff]  ;;  %v86_v58 = vld [vmem:[%s6445_s1 + $0x130] sm:$0xff]  ;;  %v93_v60 = vld [vmem:[%s6445_s1 + $0x168] sm:$0xff] }
   0xf   :  { %3706 = vmatpush1.bf16.msra.mxu1 %v3705_v39  ;;  %3676 = vmatprep.subr.bf16.mxu0 %v3675_v40  ;;  %v91_v61 = vld [vmem:[%s6445_s1 + $0x158] sm:$0xff]  ;;  %v3681_v63 = vpack.c.bf16 %v84_v55, %v80_v54  ;;  %v3713_v0 = vpack.c.bf16 %v86_v58, %v82_v56  ;;  %v3683_v1 = vpack.c.bf16 %v93_v60, %v89_v59  ;;  %v88_v2 = vld [vmem:[%s6445_s1 + $0x140] sm:$0xff]  ;;  %v90_v5 = vld [vmem:[%s6445_s1 + $0x150] sm:$0xff] }
  0x10   :  { %3708 = vmatprep.subr.bf16.mxu1 %v3707_v44  ;;  %v95_v62 = vld [vmem:[%s6445_s1 + $0x178] sm:$0xff]  ;;  %v92_v4 = vld [vmem:[%s6445_s1 + $0x160] sm:$0xff]  ;;  %v94_v7 = vld [vmem:[%s6445_s1 + $0x170] sm:$0xff] }
  0x11   :  { %v3715_v6 = vpack.c.bf16 %v95_v62, %v91_v61  ;;  %v97_v8 = vld [vmem:[%s6445_s1 + $0x188] sm:$0xff]  ;;  %v99_v10 = vld [vmem:[%s6445_s1 + $0x198] sm:$0xff]  ;;  %v3685_v12 = vpack.c.bf16 %v92_v4, %v88_v2  ;;  %v3717_v13 = vpack.c.bf16 %v94_v7, %v90_v5  ;;  %v96_v15 = vld [vmem:[%s6445_s1 + $0x180] sm:$0xff] }
  0x12   :  { %3678 = vmatpush1.bf16.msra.mxu0 %v3677_v51  ;;  %v101_v9 = vld [vmem:[%s6445_s1 + $0x1a8] sm:$0xff]  ;;  %v103_v11 = vld [vmem:[%s6445_s1 + $0x1b8] sm:$0xff]  ;;  %v100_v16 = vld [vmem:[%s6445_s1 + $0x1a0] sm:$0xff] }
  0x13   :  { %3710 = vmatpush1.bf16.msra.mxu1 %v3709_v52  ;;  %3680 = vmatprep.subr.bf16.mxu0 %v3679_v53  ;;  %v3687_v14 = vpack.c.bf16 %v101_v9, %v97_v8  ;;  %v98_v17 = vld [vmem:[%s6445_s1 + $0x190] sm:$0xff]  ;;  %v3719_v18 = vpack.c.bf16 %v103_v11, %v99_v10  ;;  %v105_v20 = vld [vmem:[%s6445_s1 + $0x1c8] sm:$0xff]  ;;  %v107_v22 = vld [vmem:[%s6445_s1 + $0x1d8] sm:$0xff]  ;;  %v3689_v24 = vpack.c.bf16 %v100_v16, %v96_v15 }
  0x14   :  { %3712 = vmatprep.subr.bf16.mxu1 %v3711_v57  ;;  %v102_v19 = vld [vmem:[%s6445_s1 + $0x1b0] sm:$0xff]  ;;  %v109_v21 = vld [vmem:[%s6445_s1 + $0x1e8] sm:$0xff]  ;;  %v111_v23 = vld [vmem:[%s6445_s1 + $0x1f8] sm:$0xff] }
  0x15   :  { %v3721_v25 = vpack.c.bf16 %v102_v19, %v98_v17  ;;  %v3691_v26 = vpack.c.bf16 %v109_v21, %v105_v20  ;;  %v104_v27 = vld [vmem:[%s6445_s1 + $0x1c0] sm:$0xff]  ;;  %v106_v29 = vld [vmem:[%s6445_s1 + $0x1d0] sm:$0xff]  ;;  %v3723_v30 = vpack.c.bf16 %v111_v23, %v107_v22  ;;  %v403_v32 = vld [vmem:[%s6446_s2 + $0x8] sm:$0xff] }
  0x16   :  { %3682 = vmatpush1.bf16.msra.mxu0 %v3681_v63  ;;  %v108_v28 = vld [vmem:[%s6445_s1 + $0x1e0] sm:$0xff]  ;;  %v110_v31 = vld [vmem:[%s6445_s1 + $0x1f0] sm:$0xff]  ;;  %v407_v33 = vld [vmem:[%s6446_s2 + $0x28] sm:$0xff] }
  0x17   :  { %3714 = vmatpush1.bf16.msra.mxu1 %v3713_v0  ;;  %3684 = vmatprep.subr.bf16.mxu0 %v3683_v1  ;;  %v405_v34 = vld [vmem:[%s6446_s2 + $0x18] sm:$0xff]  ;;  %v3693_v36 = vpack.c.bf16 %v108_v28, %v104_v27  ;;  %v3725_v37 = vpack.c.bf16 %v110_v31, %v106_v29  ;;  %v4890_v38 = vpack.c.bf16 %v407_v33, %v403_v32  ;;  %v402_v39 = vld [vmem:[%s6446_s2] sm:$0xff]  ;;  %v404_v42 = vld [vmem:[%s6446_s2 + $0x10] sm:$0xff] }
  0x18   :  { %3716 = vmatprep.subr.bf16.mxu1 %v3715_v6  ;;  %v409_v35 = vld [vmem:[%s6446_s2 + $0x38] sm:$0xff]  ;;  %v406_v40 = vld [vmem:[%s6446_s2 + $0x20] sm:$0xff]  ;;  %v408_v43 = vld [vmem:[%s6446_s2 + $0x30] sm:$0xff] }
  0x19   :  { %v4898_v41 = vpack.c.bf16 %v409_v35, %v405_v34  ;;  %v411_v44 = vld [vmem:[%s6446_s2 + $0x48] sm:$0xff]  ;;  %v40_v46 = vld [vmem:[%s6447_s0] sm:$0xff]  ;;  %v4915_v47 = vpack.c.bf16 %v406_v40, %v402_v39  ;;  %v413_v48 = vld [vmem:[%s6446_s2 + $0x58] sm:$0xff]  ;;  %v4924_v50 = vpack.c.bf16 %v408_v43, %v404_v42 }
  0x1a   :  { %3686 = vmatpush1.bf16.msra.mxu0 %v3685_v12  ;;  %v415_v45 = vld [vmem:[%s6446_s2 + $0x68] sm:$0xff]  ;;  %v417_v49 = vld [vmem:[%s6446_s2 + $0x78] sm:$0xff]  ;;  %v410_v51 = vld [vmem:[%s6446_s2 + $0x40] sm:$0xff] }
  0x1b   :  { %3718 = vmatpush1.bf16.msra.mxu1 %v3717_v13  ;;  %3688 = vmatprep.subr.bf16.mxu0 %v3687_v14  ;;  %v414_v52 = vld [vmem:[%s6446_s2 + $0x60] sm:$0xff]  ;;  %v4933_v53 = vpack.c.bf16 %v415_v45, %v411_v44  ;;  %v412_v54 = vld [vmem:[%s6446_s2 + $0x50] sm:$0xff]  ;;  %v4941_v56 = vpack.c.bf16 %v417_v49, %v413_v48  ;;  %v419_v57 = vld [vmem:[%s6446_s2 + $0x88] sm:$0xff] }
  0x1c   :  { %3720 = vmatprep.subr.bf16.mxu1 %v3719_v18  ;;  %v416_v55 = vld [vmem:[%s6446_s2 + $0x70] sm:$0xff]  ;;  %v423_v58 = vld [vmem:[%s6446_s2 + $0xa8] sm:$0xff]  ;;  %v4953_v60 = vpack.c.bf16 %v414_v52, %v410_v51  ;;  %v421_v61 = vld [vmem:[%s6446_s2 + $0x98] sm:$0xff] }
  0x1d   :  { %v41_v59 = vld [vmem:[%s6447_s0 + $0x8] sm:$0xff]  ;;  %v425_v62 = vld [vmem:[%s6446_s2 + $0xb8] sm:$0xff]  ;;  %v4963_v63 = vpack.c.bf16 %v416_v55, %v412_v54  ;;  %v418_v0 = vld [vmem:[%s6446_s2 + $0x80] sm:$0xff]  ;;  %v4973_v2 = vpack.c.bf16 %v423_v58, %v419_v57 }
  0x1e   :  { %3690 = vmatpush1.bf16.msra.mxu0 %v3689_v24  ;;  %v422_v1 = vld [vmem:[%s6446_s2 + $0xa0] sm:$0xff]  ;;  %v420_v4 = vld [vmem:[%s6446_s2 + $0x90] sm:$0xff]  ;;  %v4982_v6 = vpack.c.bf16 %v425_v62, %v421_v61  ;;  %v427_v7 = vld [vmem:[%s6446_s2 + $0xc8] sm:$0xff] }
  0x1f   :  { %3722 = vmatpush1.bf16.msra.mxu1 %v3721_v25  ;;  %3692 = vmatprep.subr.bf16.mxu0 %v3691_v26  ;;  %v424_v5 = vld [vmem:[%s6446_s2 + $0xb0] sm:$0xff]  ;;  %v431_v8 = vld [vmem:[%s6446_s2 + $0xe8] sm:$0xff]  ;;  %v4994_v10 = vpack.c.bf16 %v422_v1, %v418_v0  ;;  %v429_v11 = vld [vmem:[%s6446_s2 + $0xd8] sm:$0xff] }
  0x20   :  { %3724 = vmatprep.subr.bf16.mxu1 %v3723_v30  ;;  %v42_v9 = vld [vmem:[%s6447_s0 + $0x10] sm:$0xff]  ;;  %v433_v12 = vld [vmem:[%s6446_s2 + $0xf8] sm:$0xff]  ;;  %v5004_v13 = vpack.c.bf16 %v424_v5, %v420_v4  ;;  %v426_v14 = vld [vmem:[%s6446_s2 + $0xc0] sm:$0xff]  ;;  %v5014_v16 = vpack.c.bf16 %v431_v8, %v427_v7 }
  0x21   :  { %v430_v15 = vld [vmem:[%s6446_s2 + $0xe0] sm:$0xff]  ;;  %v428_v17 = vld [vmem:[%s6446_s2 + $0xd0] sm:$0xff]  ;;  %v5023_v19 = vpack.c.bf16 %v433_v12, %v429_v11  ;;  %v435_v20 = vld [vmem:[%s6446_s2 + $0x108] sm:$0xff] }
  0x22   :  { %3694 = vmatpush1.bf16.msra.mxu0 %v3693_v36  ;;  %v432_v18 = vld [vmem:[%s6446_s2 + $0xf0] sm:$0xff]  ;;  %v439_v21 = vld [vmem:[%s6446_s2 + $0x128] sm:$0xff]  ;;  %v43_v22 = vld [vmem:[%s6447_s0 + $0x18] sm:$0xff]  ;;  %v5035_v23 = vpack.c.bf16 %v430_v15, %v426_v14 }
  0x23   :  { %3726 = vmatpush1.bf16.msra.mxu1 %v3725_v37  ;;  %3728 = vmatprep.subr.bf16.mxu0 %v4890_v38  ;;  %v437_v24 = vld [vmem:[%s6446_s2 + $0x118] sm:$0xff]  ;;  %v5045_v26 = vpack.c.bf16 %v432_v18, %v428_v17  ;;  %v434_v27 = vld [vmem:[%s6446_s2 + $0x100] sm:$0xff]  ;;  %v5055_v29 = vpack.c.bf16 %v439_v21, %v435_v20  ;;  %v436_v30 = vld [vmem:[%s6446_s2 + $0x110] sm:$0xff] }
  0x24   :  { %3760 = vmatprep.subr.bf16.mxu1 %v4898_v41  ;;  %v441_v25 = vld [vmem:[%s6446_s2 + $0x138] sm:$0xff]  ;;  %v438_v28 = vld [vmem:[%s6446_s2 + $0x120] sm:$0xff]  ;;  %v440_v31 = vld [vmem:[%s6446_s2 + $0x130] sm:$0xff] }
  0x25   :  { %199 = vmatmul.mubr.f32.vlgmr.msra.gmra.mrb[0].mxu0 %v40_v46  ;;  %v5064_v32 = vpack.c.bf16 %v441_v25, %v437_v24  ;;  %v443_v33 = vld [vmem:[%s6446_s2 + $0x148] sm:$0xff]  ;;  %v44_v35 = vld [vmem:[%s6447_s0 + $0x20] sm:$0xff]  ;;  %v5076_v36 = vpack.c.bf16 %v438_v28, %v434_v27  ;;  %v445_v37 = vld [vmem:[%s6446_s2 + $0x158] sm:$0xff]  ;;  %v5086_v40 = vpack.c.bf16 %v440_v31, %v436_v30 }
  0x26   :  { %312 = vmatmul.mubr.f32.vlgmr.msra.gmra.mrb[0].mxu1 %v40_v46  ;;  %3730 = vmatpush1.bf16.msra.mxu0 %v4915_v47  ;;  %v447_v34 = vld [vmem:[%s6446_s2 + $0x168] sm:$0xff]  ;;  %v449_v39 = vld [vmem:[%s6446_s2 + $0x178] sm:$0xff]  ;;  %v442_v42 = vld [vmem:[%s6446_s2 + $0x140] sm:$0xff] }
  0x27   :  { %3762 = vmatpush1.bf16.msra.mxu1 %v4924_v50  ;;  %204 = vmatprep.mubr.f32.mxu0 %v4626_v3  ;;  %v446_v43 = vld [vmem:[%s6446_s2 + $0x160] sm:$0xff]  ;;  %v5096_v44 = vpack.c.bf16 %v447_v34, %v443_v33  ;;  %v444_v45 = vld [vmem:[%s6446_s2 + $0x150] sm:$0xff]  ;;  %v5105_v48 = vpack.c.bf16 %v449_v39, %v445_v37  ;;  %v451_v49 = vld [vmem:[%s6446_s2 + $0x188] sm:$0xff] }
  0x28   :  { %317 = vmatprep.mubr.f32.mxu1 %v4626_v3  ;;  %3732 = vmatprep.subr.bf16.mxu0 %v4933_v53  ;;  %v448_v46 = vld [vmem:[%s6446_s2 + $0x170] sm:$0xff]  ;;  %v455_v51 = vld [vmem:[%s6446_s2 + $0x1a8] sm:$0xff]  ;;  %v5117_v54 = vpack.c.bf16 %v446_v43, %v442_v42  ;;  %v453_v55 = vld [vmem:[%s6446_s2 + $0x198] sm:$0xff] }
  0x29   :  { %205 = vmatmul.mubr.f32.gmra.mrb[2].mxu0 %v41_v59  ;;  %3764 = vmatprep.subr.bf16.mxu1 %v4941_v56  ;;  %v45_v52 = vld [vmem:[%s6447_s0 + $0x28] sm:$0xff]  ;;  %v457_v57 = vld [vmem:[%s6446_s2 + $0x1b8] sm:$0xff]  ;;  %v5127_v58 = vpack.c.bf16 %v448_v46, %v444_v45  ;;  %v454_v61 = vld [vmem:[%s6446_s2 + $0x1a0] sm:$0xff]  ;;  %v5137_v62 = vpack.c.bf16 %v455_v51, %v451_v49 }
  0x2a   :  { %318 = vmatmul.mubr.f32.gmra.mrb[2].mxu1 %v41_v59  ;;  %3734 = vmatpush1.bf16.msra.mxu0 %v4953_v60  ;;  %v450_v59 = vld [vmem:[%s6446_s2 + $0x180] sm:$0xff]  ;;  %v452_v0 = vld [vmem:[%s6446_s2 + $0x190] sm:$0xff]  ;;  %v5146_v4 = vpack.c.bf16 %v457_v57, %v453_v55  ;;  %v459_v5 = vld [vmem:[%s6446_s2 + $0x1c8] sm:$0xff] }
  0x2b   :  { %3766 = vmatpush1.bf16.msra.mxu1 %v4963_v63  ;;  %210 = vmatprep.mubr.f32.mxu0 %v4626_v3  ;;  %v456_v1 = vld [vmem:[%s6446_s2 + $0x1b0] sm:$0xff]  ;;  %v463_v7 = vld [vmem:[%s6446_s2 + $0x1e8] sm:$0xff]  ;;  %v461_v11 = vld [vmem:[%s6446_s2 + $0x1d8] sm:$0xff] }
  0x2c   :  { %323 = vmatprep.mubr.f32.mxu1 %v4626_v3  ;;  %3736 = vmatprep.subr.bf16.mxu0 %v4973_v2  ;;  %v46_v8 = vld [vmem:[%s6447_s0 + $0x30] sm:$0xff]  ;;  %v465_v12 = vld [vmem:[%s6446_s2 + $0x1f8] sm:$0xff]  ;;  %v5168_v14 = vpack.c.bf16 %v456_v1, %v452_v0  ;;  %v458_v15 = vld [vmem:[%s6446_s2 + $0x1c0] sm:$0xff]  ;;  %v5178_v18 = vpack.c.bf16 %v463_v7, %v459_v5  ;;  %v114_v7 = vlaneseq }
  0x2d   :  { %211 = vmatmul.mubr.f32.gmra.mrb[4].mxu0 %v42_v9  ;;  %3768 = vmatprep.subr.bf16.mxu1 %v4982_v6  ;;  %v462_v17 = vld [vmem:[%s6446_s2 + $0x1e0] sm:$0xff]  ;;  %v460_v20 = vld [vmem:[%s6446_s2 + $0x1d0] sm:$0xff]  ;;  %v47_v24 = vld [vmem:[%s6447_s0 + $0x38] sm:$0xff] }
  0x2e   :  { %324 = vmatmul.mubr.f32.gmra.mrb[4].mxu1 %v42_v9  ;;  %3738 = vmatpush1.bf16.msra.mxu0 %v4994_v10  ;;  %v5158_v9 = vpack.c.bf16 %v454_v61, %v450_v59  ;;  %v464_v21 = vld [vmem:[%s6446_s2 + $0x1f0] sm:$0xff]  ;;  %v5193_v25 = vpack.c.bf16 %v462_v17, %v458_v15  ;;  %v5206_v28 = vld [vmem:[%s6448_s4] sm:$0xff]  ;;  %v651_v31 = vld [vmem:[%s6449_s6 + $0x18] sm:$0xff] }
  0x2f   :  { %3770 = vmatpush1.bf16.msra.mxu1 %v5004_v13  ;;  %216 = vmatprep.mubr.f32.mxu0 %v4626_v3  ;;  %v5197_v27 = vpack.c.bf16 %v464_v21, %v460_v20  ;;  %v650_v30 = vld [vmem:[%s6449_s6 + $0x10] sm:$0xff]  ;;  %v652_v34 = vld [vmem:[%s6449_s6 + $0x20] sm:$0xff]  ;;  %v655_v42 = vld [vmem:[%s6449_s6 + $0x38] sm:$0xff] }
  0x30   :  { %329 = vmatprep.mubr.f32.mxu1 %v4626_v3  ;;  %3740 = vmatprep.subr.bf16.mxu0 %v5014_v16  ;;  %v5248_v33 = vpack.c.bf16 %v651_v31, %v650_v30  ;;  %v654_v39 = vld [vmem:[%s6449_s6 + $0x30] sm:$0xff]  ;;  %v656_v45 = vld [vmem:[%s6449_s6 + $0x40] sm:$0xff]  ;;  %v657_v46 = vld [vmem:[%s6449_s6 + $0x48] sm:$0xff] }
  0x31   :  { %217 = vmatmul.mubr.f32.gmra.mrb[6].mxu0 %v43_v22  ;;  %3772 = vmatprep.subr.bf16.mxu1 %v5023_v19  ;;  %v5268_v43 = vpack.c.bf16 %v655_v42, %v654_v39  ;;  %v5278_v49 = vpack.c.bf16 %v657_v46, %v656_v45  ;;  %v658_v51 = vld [vmem:[%s6449_s6 + $0x50] sm:$0xff]  ;;  %v660_v57 = vld [vmem:[%s6449_s6 + $0x60] sm:$0xff]  ;;  %v661_v59 = vld [vmem:[%s6449_s6 + $0x68] sm:$0xff] }
  0x32   :  { %330 = vmatmul.mubr.f32.gmra.mrb[6].mxu1 %v43_v22  ;;  %3742 = vmatpush1.bf16.msra.mxu0 %v5035_v23  ;;  %v5187_v22 = vpack.c.bf16 %v465_v12, %v461_v11  ;;  %v5299_v61 = vpack.c.bf16 %v661_v59, %v660_v57  ;;  %v662_v0 = vld [vmem:[%s6449_s6 + $0x70] sm:$0xff]  ;;  %v663_v1 = vld [vmem:[%s6449_s6 + $0x78] sm:$0xff]  ;;  %v112_v12 = vld [vmem:[%s6450_s3] sm:$0xf] }
  0x33   :  { %3774 = vmatpush1.bf16.msra.mxu1 %v5045_v26  ;;  %222 = vmatprep.mubr.f32.mxu0 %v4626_v3  ;;  %v5309_v5 = vpack.c.bf16 %v663_v1, %v662_v0 }
  0x34   :  { %335 = vmatprep.mubr.f32.mxu1 %v4626_v3  ;;  %3744 = vmatprep.subr.bf16.mxu0 %v5055_v29 }
  0x35   :  { %223 = vmatmul.mubr.f32.gmra.mrb[8].mxu0 %v44_v35  ;;  %3776 = vmatprep.subr.bf16.mxu1 %v5064_v32 }
  0x36   :  { %336 = vmatmul.mubr.f32.gmra.mrb[8].mxu1 %v44_v35  ;;  %3746 = vmatpush1.bf16.msra.mxu0 %v5076_v36  ;;  %v653_v35 = vld [vmem:[%s6449_s6 + $0x28] sm:$0xff] }
  0x37   :  { %3778 = vmatpush1.bf16.msra.mxu1 %v5086_v40  ;;  %228 = vmatprep.mubr.f32.mxu0 %v4626_v3  ;;  %v5258_v37 = vpack.c.bf16 %v653_v35, %v652_v34 }
  0x38   :  { %341 = vmatprep.mubr.f32.mxu1 %v4626_v3  ;;  %3748 = vmatprep.subr.bf16.mxu0 %v5096_v44 }
  0x39   :  { %229 = vmatmul.mubr.f32.gmra.mrb[10].mxu0 %v45_v52  ;;  %3780 = vmatprep.subr.bf16.mxu1 %v5105_v48 }
  0x3a   :  { %342 = vmatmul.mubr.f32.gmra.mrb[10].mxu1 %v45_v52  ;;  %3750 = vmatpush1.bf16.msra.mxu0 %v5117_v54  ;;  %v659_v52 = vld [vmem:[%s6449_s6 + $0x58] sm:$0xff] }
  0x3b   :  { %3782 = vmatpush1.bf16.msra.mxu1 %v5127_v58  ;;  %234 = vmatprep.mubr.f32.mxu0 %v4626_v3  ;;  %v5288_v55 = vpack.c.bf16 %v659_v52, %v658_v51 }
  0x3c   :  { %347 = vmatprep.mubr.f32.mxu1 %v4626_v3  ;;  %3752 = vmatprep.subr.bf16.mxu0 %v5137_v62 }
  0x3d   :  { %235 = vmatmul.mubr.f32.gmra.mrb[12].mxu0 %v46_v8  ;;  %3784 = vmatprep.subr.bf16.mxu1 %v5146_v4 }
  0x3e   :  { %348 = vmatmul.mubr.f32.gmra.mrb[12].mxu1 %v46_v8  ;;  %3754 = vmatpush1.bf16.msra.mxu0 %v5158_v9  ;;  %v115_v8 = vshrl.u32 %v114_v7, 7 }
  0x3f   :  { %3786 = vmatpush1.bf16.msra.mxu1 %v5168_v14  ;;  %240 = vmatprep.mubr.f32.mxu0 %v4626_v3 }
  0x40   :  { %353 = vmatprep.mubr.f32.mxu1 %v4626_v3  ;;  %3756 = vmatprep.subr.bf16.mxu0 %v5178_v18  ;;  %v116_v11 = vsub.s32 0, %v115_v8  ;;  %v120_v15 = vsub.s32 1, %v115_v8  ;;  %v128_v45 = vsub.s32 3, %v115_v8 }
  0x41   :  { %241 = vmatmul.mubr.f32.gmra.mrb[14].mxu0 %v47_v24  ;;  %3788 = vmatprep.subr.bf16.mxu1 %v5187_v22 }
  0x42   :  { %354 = vmatmul.mubr.f32.gmra.mrb[14].mxu1 %v47_v24  ;;  %3758 = vmatpush1.bf16.msra.mxu0 %v5193_v25  ;;  %v5317_v17 = vrot.slane %v112_v12, %v116_v11  ;;  %v5319_v20 = vrot.slane %v112_v12, %v120_v15  ;;  %v124_v24 = vsub.s32 2, %v115_v8  ;;  %v5326_v51 = vrot.slane %v112_v12, %v128_v45  ;;  %v5332_v8 = vld [vmem:[%s6451_s5] sm:$0xff] }
  0x43   :  { %3790 = vmatpush1.bf16.msra.mxu1 %v5197_v27  ;;  %530 = vmatprep.mubr.f32.mxu0 %v4626_v3 }
  0x44   :  { %601 = vmatprep.mubr.f32.mxu1 %v4626_v3  ;;  %3848 = vmatprep.subr.bf16.mxu1 %v4898_v41  ;;  %v648_v41 = vld [vmem:[%s6449_s6] sm:$0xff]  ;;  %v5323_v39 = vrot.slane %v112_v12, %v124_v24 }
  0x45   :  { %531 = vmatmul.mubr.f32.vlgmr.msra.gmra.mrb[0].mxu0 %v5206_v28 }
  0x46   :  { %602 = vmatmul.mubr.f32.vlgmr.msra.gmra.mrb[0].mxu1 %v5206_v28  ;;  %3415 = vmatprep.mubr.msk.f32.mxu0 %vm4628_vm0, %v4626_v3 }
  0x47   :  { %3850 = vmatpush1.bf16.msra.mxu1 %v4924_v50  ;;  %948 = vmatprep.mubr.f32.mxu1 %v4626_v3  ;;  %v649_v50 = vld [vmem:[%s6449_s6 + $0x8] sm:$0xff] }
  0x48   :  { %3852 = vmatprep.subr.bf16.mxu1 %v4941_v56  ;;  %v5236_v56 = vpack.c.bf16 %v649_v50, %v648_v41 }
  0x4b   :  { %3854 = vmatpush1.bf16.msra.mxu1 %v4963_v63  ;;  %v4627_v63 = vmov 0.0|0.0  }
  0x4c   :  { %3856 = vmatprep.subr.bf16.mxu1 %v4982_v6  ;;  %3791 = vmatprep.subr.bf16.mxu0 %v4627_v63 }
  0x4d   :  { %3793 = vmatpush3.bf16.msra.mxu0 %v5236_v56 }
  0x4e   :  { %3794 = vmatprep.subr.bf16.mxu0 %v4627_v63 }
  0x4f   :  { %3858 = vmatpush1.bf16.msra.mxu1 %v5004_v13 }
  0x50   :  { %3860 = vmatprep.subr.bf16.mxu1 %v5023_v19 }
  0x51   :  { %3796 = vmatpush3.bf16.msra.mxu0 %v5248_v33 }
  0x52   :  { %3797 = vmatprep.subr.bf16.mxu0 %v4627_v63 }
  0x53   :  { %3862 = vmatpush1.bf16.msra.mxu1 %v5045_v26 }
  0x54   :  { %3864 = vmatprep.subr.bf16.mxu1 %v5064_v32 }
  0x55   :  { %3799 = vmatpush3.bf16.msra.mxu0 %v5258_v37 }
  0x56   :  { %3800 = vmatprep.subr.bf16.mxu0 %v4627_v63 }
  0x57   :  { %3866 = vmatpush1.bf16.msra.mxu1 %v5086_v40 }
  0x58   :  { %3868 = vmatprep.subr.bf16.mxu1 %v5105_v48 }
  0x59   :  { %3802 = vmatpush3.bf16.msra.mxu0 %v5268_v43 }
  0x5a   :  { %3803 = vmatprep.subr.bf16.mxu0 %v4627_v63 }
  0x5b   :  { %3870 = vmatpush1.bf16.msra.mxu1 %v5127_v58 }
  0x5c   :  { %3872 = vmatprep.subr.bf16.mxu1 %v5146_v4 }
  0x5d   :  { %3805 = vmatpush3.bf16.msra.mxu0 %v5278_v49 }
  0x5e   :  { %3806 = vmatprep.subr.bf16.mxu0 %v4627_v63 }
  0x5f   :  { %3874 = vmatpush1.bf16.msra.mxu1 %v5168_v14 }
  0x60   :  { %3876 = vmatprep.subr.bf16.mxu1 %v5187_v22 }
  0x61   :  { %3808 = vmatpush3.bf16.msra.mxu0 %v5288_v55 }
  0x62   :  { %3809 = vmatprep.subr.bf16.mxu0 %v4627_v63 }
  0x63   :  { %3878 = vmatpush1.bf16.msra.mxu1 %v5197_v27 }
  0x64   :  { %3879 = vmatprep.subr.bf16.mxu1 %v4627_v63 }
  0x65   :  { %3811 = vmatpush3.bf16.msra.mxu0 %v5299_v61 }
  0x66   :  { %3812 = vmatprep.subr.bf16.mxu0 %v4627_v63 }
  0x69   :  { %3814 = vmatpush3.bf16.msra.mxu0 %v5309_v5 }
  0x6a   :  { %3816 = vmatprep.subr.bf16.mxu0 %v4890_v38 }
 0x118   :  { %v532_v21 = vpop.f32.mrb[0].mxu0 }
 0x119   :  { %v4431_v41 = vadd.f32 %v532_v21, %v5317_v17  ;;  %v603_v50 = vpop.f32.mrb[0].mxu1  ;;  %v534_v30 = vpop.f32.mrb[1].mxu0 }
 0x11a   :  { %v4432_v31 = vadd.f32 %v534_v30, %v5319_v20  ;;  %v605_v34 = vpop.f32.mrb[1].mxu1  ;;  %v4447_v46 = vadd.f32 %v603_v50, %v5323_v39 }
 0x11b   :  { %v3208_v35 = vmul.f32 -1.442695, %v4431_v41  ;;  %v4448_v57 = vadd.f32 %v605_v34, %v5326_v51  ;;  %v643_v34 = vmul.f32 0.0, %v5206_v28 }
 0x11c   :  { %v3209_v42 = vmul.f32 -1.442695, %v4432_v31  ;;  %v3210_v52 = vmul.f32 -1.442695, %v4447_v46 }
 0x11d   :  { %4498 = vpow2.f32 %v3208_v35 }
 0x11e   :  { %4500 = vpow2.f32 %v3209_v42 }
 0x11f   :  { %4502 = vpow2.f32 %v3210_v52 }
 0x120   :  { %4504 = vtanh.f32 %v4448_v57 }
 0x127   :  { %v4499_v59 = vpop.eup %4498 }
 0x128   :  { %v621_v0 = vadd.f32 1.0, %v4499_v59  ;;  %v4501_v1 = vpop.eup %4500 }
 0x129   :  { %v622_v7 = vadd.f32 1.0, %v4501_v1  ;;  %v4503_v11 = vpop.eup %4502  ;;  %v646_v1 = vmul.f32 0.0, %v5332_v8 }
 0x12a   :  { %4506 = vrcp.f32 %v621_v0  ;;  %v4505_v15 = vpop.eup %4504  ;;  %v623_v41 = vadd.f32 1.0, %v4503_v11 }
 0x12b   :  { %4508 = vrcp.f32 %v622_v7 }
 0x12c   :  { %4510 = vrcp.f32 %v623_v41 }
 0x134   :  { %v4507_v21 = vpop.eup %4506 }
 0x135   :  { %v632_v12 = vmul.f32 %v4507_v21, %v4505_v15  ;;  %v4509_v24 = vpop.eup %4508 }
 0x136   :  { %v631_v50 = vmul.f32 %v4509_v24, %v5332_v8  ;;  %v4511_v31 = vpop.eup %4510  ;;  %v1100_v8 = vld [vmem:[%s6446_s2 + $0x10] sm:$0xff] }
 0x138   :  { %v5335_v30 = vadd.f32 %v632_v12, %v631_v50 }
 0x13a   :  { %4512 = vtanh.f32 %v5335_v30  ;;  %v5419_v21 = vadd.f32 %v646_v1, %v5335_v30  ;;  %v1104_v30 = vld [vmem:[%s6446_s2 + $0x30] sm:$0xff]  ;;  %v1448_v1 = vld [vmem:[%s6446_s2 + $0x8] sm:$0xff] }
 0x144   :  { %v4513_v35 = vpop.eup %4512 }
 0x145   :  { %v635_v42 = vmul.f32 %v4513_v35, %v4511_v31 }
 0x147   :  { %v5339_v45 = vadd.f32 %v643_v34, %v635_v42  ;;  %v1109_v42 = vld [vmem:[%s6446_s2 + $0x58] sm:$0xff] }
 0x149   :  { %3416 = vmatmul.mubr.f32.vlgmr.msra.gmra.mrb[16].mxu0 %v5339_v45  ;;  %949 = vmatmul.mubr.f32.vlgmr.msra.gmra.mrb[2].mxu1 %v5339_v45 }
 0x14a   :  { %3818 = vmatpush1.bf16.msra.mxu0 %v4915_v47  ;;  %877 = vmatprep.mubr.f32.mxu0 %v4626_v3 }
 0x14b   :  { %3820 = vmatprep.subr.bf16.mxu0 %v4933_v53  ;;  %3881 = vmatpush3.bf16.msra.mxu1 %v5236_v56 }
 0x14c   :  { %3882 = vmatprep.subr.bf16.mxu1 %v4627_v63  ;;  %3450 = vmatprep.mubr.msk.f32.mxu1 %vm4628_vm0, %v4626_v3 }
 0x14e   :  { %3822 = vmatpush1.bf16.msra.mxu0 %v4953_v60 }
 0x14f   :  { %3824 = vmatprep.subr.bf16.mxu0 %v4973_v2  ;;  %3884 = vmatpush3.bf16.msra.mxu1 %v5248_v33 }
 0x150   :  { %3885 = vmatprep.subr.bf16.mxu1 %v4627_v63 }
 0x152   :  { %3826 = vmatpush1.bf16.msra.mxu0 %v4994_v10 }
 0x153   :  { %3828 = vmatprep.subr.bf16.mxu0 %v5014_v16  ;;  %3887 = vmatpush3.bf16.msra.mxu1 %v5258_v37 }
 0x154   :  { %3888 = vmatprep.subr.bf16.mxu1 %v4627_v63 }
 0x156   :  { %3830 = vmatpush1.bf16.msra.mxu0 %v5035_v23 }
 0x157   :  { %3832 = vmatprep.subr.bf16.mxu0 %v5055_v29  ;;  %3890 = vmatpush3.bf16.msra.mxu1 %v5268_v43 }
 0x158   :  { %3891 = vmatprep.subr.bf16.mxu1 %v4627_v63 }
 0x15a   :  { %3834 = vmatpush1.bf16.msra.mxu0 %v5076_v36 }
 0x15b   :  { %3836 = vmatprep.subr.bf16.mxu0 %v5096_v44  ;;  %3893 = vmatpush3.bf16.msra.mxu1 %v5278_v49 }
 0x15c   :  { %3894 = vmatprep.subr.bf16.mxu1 %v4627_v63 }
 0x15e   :  { %3838 = vmatpush1.bf16.msra.mxu0 %v5117_v54 }
 0x15f   :  { %3840 = vmatprep.subr.bf16.mxu0 %v5137_v62  ;;  %3896 = vmatpush3.bf16.msra.mxu1 %v5288_v55 }
 0x160   :  { %3897 = vmatprep.subr.bf16.mxu1 %v4627_v63 }
 0x162   :  { %3842 = vmatpush1.bf16.msra.mxu0 %v5158_v9 }
 0x163   :  { %3844 = vmatprep.subr.bf16.mxu0 %v5178_v18  ;;  %3899 = vmatpush3.bf16.msra.mxu1 %v5299_v61 }
 0x164   :  { %3900 = vmatprep.subr.bf16.mxu1 %v4627_v63 }
 0x166   :  { %3846 = vmatpush1.bf16.msra.mxu0 %v5193_v25 }
 0x167   :  { %3904 = vmatprep.subr.bf16.mxu0 %v4890_v38  ;;  %3902 = vmatpush3.bf16.msra.mxu1 %v5309_v5  ;;  %v1101_v38 = vld [vmem:[%s6446_s2 + $0x18] sm:$0xff] }
 0x169   :  { %878 = vmatmul.mubr.f32.vlgmr.msra.gmra.mrb[2].mxu0 %v5339_v45 }
 0x16a   :  { %3906 = vmatpush1.bf16.msra.mxu0 %v4915_v47  ;;  %1226 = vmatprep.mubr.f32.mxu0 %v4626_v3  ;;  %v1105_v47 = vld [vmem:[%s6446_s2 + $0x38] sm:$0xff] }
 0x16b   :  { %3908 = vmatprep.subr.bf16.mxu0 %v4933_v53  ;;  %v5401_v53 = vpack.c.bf16 %v1105_v47, %v1101_v38  ;;  %v1113_v38 = vld [vmem:[%s6446_s2 + $0x78] sm:$0xff] }
 0x16d   :  { %3936 = vmatprep.subr.bf16.mxu1 %v5401_v53 }
 0x16e   :  { %3910 = vmatpush1.bf16.msra.mxu0 %v4953_v60  ;;  %v5407_v60 = vld [vmem:[%s6452_s7] ss:$0 sm:$0xff] }
 0x16f   :  { %3912 = vmatprep.subr.bf16.mxu0 %v4973_v2 }
 0x172   :  { %3914 = vmatpush1.bf16.msra.mxu0 %v4994_v10 }
 0x173   :  { %3916 = vmatprep.subr.bf16.mxu0 %v5014_v16 }
 0x176   :  { %3918 = vmatpush1.bf16.msra.mxu0 %v5035_v23 }
 0x177   :  { %3920 = vmatprep.subr.bf16.mxu0 %v5055_v29 }
 0x17a   :  { %3922 = vmatpush1.bf16.msra.mxu0 %v5076_v36 }
 0x17b   :  { %3924 = vmatprep.subr.bf16.mxu0 %v5096_v44 }
 0x17e   :  { %3926 = vmatpush1.bf16.msra.mxu0 %v5117_v54 }
 0x17f   :  { %3928 = vmatprep.subr.bf16.mxu0 %v5137_v62 }
 0x182   :  { %3930 = vmatpush1.bf16.msra.mxu0 %v5158_v9 }
 0x183   :  { %3932 = vmatprep.subr.bf16.mxu0 %v5178_v18 }
 0x186   :  { %3934 = vmatpush1.bf16.msra.mxu0 %v5193_v25 }
 0x187   :  { %3967 = vmatprep.subr.bf16.mxu0 %v4627_v63 }
 0x21c   :  { %v737_v2 = vpop.f32.mrb[16].mxu0  ;;  %v950_v10 = vpop.f32.mrb[2].mxu1 }
 0x21d   :  { %v738_v16 = vadd.f32 %v5407_v60, %v737_v2  ;;  %v3417_v23 = vpop.f32.mrb[17].mxu0  ;;  %v952_v29 = vpop.f32.mrb[3].mxu1  ;;  %v4449_v25 = vadd.f32 %v950_v10, %v5323_v39  ;;  %v991_v2 = vmul.f32 0.0, %v5339_v45  ;;  %v5438_v10 = vpack.c.bf16 %v1104_v30, %v1100_v8 }
 0x21e   :  { %v4450_v46 = vadd.f32 %v952_v29, %v5326_v51  ;;  %v5442_v23 = vpack.c.bf16 %v1113_v38, %v1109_v42  ;;  %v1108_v29 = vld [vmem:[%s6446_s2 + $0x50] sm:$0xff] }
 0x21f   :  { %741 = vst [vmem:[%s6453_s8] sm:$0xff] %v738_v16  ;;  %v3214_v28 = vmul.f32 -1.442695, %v4449_v25  ;;  %v1502_v25 = vld [vmem:[%s6446_s2 + $0x1b8] sm:$0xff] }
 0x23c   :  { %v879_v36 = vpop.f32.mrb[2].mxu0 }
 0x23d   :  { %v4433_v44 = vadd.f32 %v879_v36, %v5317_v17  ;;  %v881_v54 = vpop.f32.mrb[3].mxu0  ;;  %v1112_v36 = vld [vmem:[%s6446_s2 + $0x70] sm:$0xff] }
 0x23e   :  { %v4434_v62 = vadd.f32 %v881_v54, %v5319_v20  ;;  %v5453_v45 = vpack.c.bf16 %v1112_v36, %v1108_v29  ;;  %v1489_v54 = vld [vmem:[%s6446_s2 + $0x150] sm:$0xff] }
 0x23f   :  { %v3212_v9 = vmul.f32 -1.442695, %v4433_v44 }
 0x240   :  { %v3213_v18 = vmul.f32 -1.442695, %v4434_v62  ;;  %v1493_v62 = vld [vmem:[%s6446_s2 + $0x170] sm:$0xff] }
 0x241   :  { %4514 = vpow2.f32 %v3212_v9  ;;  %v1498_v9 = vld [vmem:[%s6446_s2 + $0x198] sm:$0xff] }
 0x242   :  { %4516 = vpow2.f32 %v3213_v18  ;;  %v5564_v18 = vpack.c.bf16 %v1493_v62, %v1489_v54 }
 0x243   :  { %4518 = vpow2.f32 %v3214_v28  ;;  %v1497_v28 = vld [vmem:[%s6446_s2 + $0x190] sm:$0xff] }
 0x244   :  { %4520 = vtanh.f32 %v4450_v46  ;;  %v1501_v46 = vld [vmem:[%s6446_s2 + $0x1b0] sm:$0xff] }
 0x24b   :  { %v4515_v52 = vpop.eup %4514 }
 0x24c   :  { %v4517_v57 = vpop.eup %4516  ;;  %v968_v59 = vadd.f32 1.0, %v4515_v52  ;;  %v5576_v52 = vpack.c.bf16 %v1502_v25, %v1498_v9 }
 0x24d   :  { %v969_v0 = vadd.f32 1.0, %v4517_v57  ;;  %v4519_v7 = vpop.eup %4518  ;;  %v1506_v57 = vld [vmem:[%s6446_s2 + $0x1d8] sm:$0xff] }
 0x24e   :  { %4522 = vrcp.f32 %v968_v59  ;;  %v4521_v11 = vpop.eup %4520  ;;  %v970_v24 = vadd.f32 1.0, %v4519_v7  ;;  %v1510_v59 = vld [vmem:[%s6446_s2 + $0x1f8] sm:$0xff]  ;;  %v1452_v7 = vld [vmem:[%s6446_s2 + $0x28] sm:$0xff] }
 0x24f   :  { %4524 = vrcp.f32 %v969_v0  ;;  %v5585_v0 = vpack.c.bf16 %v1501_v46, %v1497_v28  ;;  %v1456_v46 = vld [vmem:[%s6446_s2 + $0x48] sm:$0xff] }
 0x250   :  { %4526 = vrcp.f32 %v970_v24  ;;  %v5602_v24 = vpack.c.bf16 %v1452_v7, %v1448_v1 }
 0x258   :  { %v4523_v15 = vpop.eup %4522 }
 0x259   :  { %v4525_v12 = vpop.eup %4524  ;;  %v979_v41 = vmul.f32 %v4523_v15, %v4521_v11  ;;  %v5594_v11 = vpack.c.bf16 %v1510_v59, %v1506_v57  ;;  %v1505_v15 = vld [vmem:[%s6446_s2 + $0x1d0] sm:$0xff]  ;;  %v1460_v57 = vld [vmem:[%s6446_s2 + $0x68] sm:$0xff] }
 0x25a   :  { %v978_v50 = vmul.f32 %v4525_v12, %v5419_v21  ;;  %v4527_v34 = vpop.eup %4526  ;;  %v1509_v12 = vld [vmem:[%s6446_s2 + $0x1f0] sm:$0xff] }
 0x25c   :  { %v5422_v31 = vadd.f32 %v979_v41, %v978_v50  ;;  %v5606_v41 = vpack.c.bf16 %v1509_v12, %v1505_v15  ;;  %v5644_v12 = vpack.c.bf16 %v1460_v57, %v1456_v46  ;;  %v1499_v46 = vld [vmem:[%s6446_s2 + $0x1a0] sm:$0xff]  ;;  %v1504_v57 = vld [vmem:[%s6446_s2 + $0x1c8] sm:$0xff] }
 0x25e   :  { %4528 = vtanh.f32 %v5422_v31 }
 0x268   :  { %v4529_v35 = vpop.eup %4528 }
 0x269   :  { %v982_v47 = vmul.f32 %v4529_v35, %v4527_v34 }
 0x26b   :  { %v5440_v16 = vadd.f32 %v991_v2, %v982_v47 }
 0x26d   :  { %3451 = vmatmul.mubr.f32.vlgmr.msra.gmra.mrb[16].mxu1 %v5440_v16  ;;  %1227 = vmatmul.mubr.f32.vlgmr.msra.gmra.mrb[4].mxu0 %v5440_v16  ;;  %v1340_v1 = vmul.f32 0.0, %v5440_v16 }
 0x26e   :  { %3938 = vmatpush1.bf16.msra.mxu1 %v5438_v10  ;;  %1297 = vmatprep.mubr.f32.mxu1 %v4626_v3 }
 0x26f   :  { %3940 = vmatprep.subr.bf16.mxu1 %v5442_v23  ;;  %3969 = vmatpush3.bf16.msra.mxu0 %v5236_v56  ;;  %v1482_v56 = vld [vmem:[%s6446_s2 + $0x118] sm:$0xff] }
 0x270   :  { %3970 = vmatprep.subr.bf16.mxu0 %v4627_v63  ;;  %3485 = vmatprep.mubr.msk.f32.mxu0 %vm4628_vm0, %v4626_v3 }
 0x272   :  { %3942 = vmatpush1.bf16.msra.mxu1 %v5453_v45 }
 0x273   :  { %3944 = vmatprep.subr.bf16.mxu1 %v4982_v6  ;;  %3972 = vmatpush3.bf16.msra.mxu0 %v5248_v33  ;;  %v1466_v6 = vld [vmem:[%s6446_s2 + $0x98] sm:$0xff] }
 0x274   :  { %3973 = vmatprep.subr.bf16.mxu0 %v4627_v63  ;;  %v1486_v33 = vld [vmem:[%s6446_s2 + $0x138] sm:$0xff] }
 0x276   :  { %3946 = vmatpush1.bf16.msra.mxu1 %v5004_v13  ;;  %v1470_v13 = vld [vmem:[%s6446_s2 + $0xb8] sm:$0xff] }
 0x277   :  { %3948 = vmatprep.subr.bf16.mxu1 %v5023_v19  ;;  %3975 = vmatpush3.bf16.msra.mxu0 %v5258_v37  ;;  %v5499_v19 = vpack.c.bf16 %v1470_v13, %v1466_v6  ;;  %v5535_v37 = vpack.c.bf16 %v1486_v33, %v1482_v56 }
 0x278   :  { %3976 = vmatprep.subr.bf16.mxu0 %v4627_v63 }
 0x27a   :  { %3950 = vmatpush1.bf16.msra.mxu1 %v5045_v26  ;;  %v1465_v26 = vld [vmem:[%s6446_s2 + $0x90] sm:$0xff] }
 0x27b   :  { %3952 = vmatprep.subr.bf16.mxu1 %v5064_v32  ;;  %3978 = vmatpush3.bf16.msra.mxu0 %v5268_v43  ;;  %v1469_v32 = vld [vmem:[%s6446_s2 + $0xb0] sm:$0xff] }
 0x27c   :  { %3979 = vmatprep.subr.bf16.mxu0 %v4627_v63  ;;  %v1481_v43 = vld [vmem:[%s6446_s2 + $0x110] sm:$0xff] }
 0x27e   :  { %3954 = vmatpush1.bf16.msra.mxu1 %v5086_v40  ;;  %v5507_v40 = vpack.c.bf16 %v1469_v32, %v1465_v26 }
 0x27f   :  { %3956 = vmatprep.subr.bf16.mxu1 %v5105_v48  ;;  %3981 = vmatpush3.bf16.msra.mxu0 %v5278_v49  ;;  %v1474_v48 = vld [vmem:[%s6446_s2 + $0xd8] sm:$0xff]  ;;  %v1485_v49 = vld [vmem:[%s6446_s2 + $0x130] sm:$0xff] }
 0x280   :  { %3982 = vmatprep.subr.bf16.mxu0 %v4627_v63 }
 0x282   :  { %3958 = vmatpush1.bf16.msra.mxu1 %v5127_v58  ;;  %v1478_v58 = vld [vmem:[%s6446_s2 + $0xf8] sm:$0xff] }
 0x283   :  { %3960 = vmatprep.subr.bf16.mxu1 %v5146_v4  ;;  %3984 = vmatpush3.bf16.msra.mxu0 %v5288_v55  ;;  %v5517_v4 = vpack.c.bf16 %v1478_v58, %v1474_v48  ;;  %v5543_v55 = vpack.c.bf16 %v1485_v49, %v1481_v43 }
 0x284   :  { %3985 = vmatprep.subr.bf16.mxu0 %v4627_v63 }
 0x286   :  { %3962 = vmatpush1.bf16.msra.mxu1 %v5168_v14  ;;  %v1473_v14 = vld [vmem:[%s6446_s2 + $0xd0] sm:$0xff] }
 0x287   :  { %3964 = vmatprep.subr.bf16.mxu1 %v5187_v22  ;;  %3987 = vmatpush3.bf16.msra.mxu0 %v5299_v61  ;;  %v1477_v22 = vld [vmem:[%s6446_s2 + $0xf0] sm:$0xff]  ;;  %v1490_v61 = vld [vmem:[%s6446_s2 + $0x158] sm:$0xff] }
 0x288   :  { %3988 = vmatprep.subr.bf16.mxu0 %v4627_v63 }
 0x28a   :  { %3966 = vmatpush1.bf16.msra.mxu1 %v5197_v27  ;;  %v5525_v27 = vpack.c.bf16 %v1477_v22, %v1473_v14  ;;  %v994_v22 = vmul.f32 0.0, %v5419_v21  ;;  %v1447_v21 = vld [vmem:[%s6446_s2] sm:$0xff] }
 0x28b   :  { %4024 = vmatprep.subr.bf16.mxu1 %v5401_v53  ;;  %3990 = vmatpush3.bf16.msra.mxu0 %v5309_v5  ;;  %v1494_v5 = vld [vmem:[%s6446_s2 + $0x178] sm:$0xff] }
 0x28c   :  { %v5553_v44 = vpack.c.bf16 %v1494_v5, %v1490_v61  ;;  %3992 = vmatprep.subr.bf16.mxu0 %v5602_v24  ;;  %v5621_v43 = vadd.f32 %v994_v22, %v5422_v31  ;;  %v1451_v31 = vld [vmem:[%s6446_s2 + $0x20] sm:$0xff] }
 0x28d   :  { %1298 = vmatmul.mubr.f32.vlgmr.msra.gmra.mrb[4].mxu1 %v5440_v16  ;;  %v5640_v7 = vpack.c.bf16 %v1451_v31, %v1447_v21  ;;  %v1468_v16 = vld [vmem:[%s6446_s2 + $0xa8] sm:$0xff]  ;;  %v1483_v22 = vld [vmem:[%s6446_s2 + $0x120] sm:$0xff] }
 0x28e   :  { %4026 = vmatpush1.bf16.msra.mxu1 %v5438_v10  ;;  %1646 = vmatprep.mubr.f32.mxu1 %v4626_v3 }
 0x28f   :  { %4028 = vmatprep.subr.bf16.mxu1 %v5442_v23 }
 0x292   :  { %4030 = vmatpush1.bf16.msra.mxu1 %v5453_v45 }
 0x293   :  { %4032 = vmatprep.subr.bf16.mxu1 %v5499_v19 }
 0x296   :  { %4034 = vmatpush1.bf16.msra.mxu1 %v5507_v40 }
 0x297   :  { %4036 = vmatprep.subr.bf16.mxu1 %v5517_v4 }
 0x29a   :  { %4038 = vmatpush1.bf16.msra.mxu1 %v5525_v27 }
 0x29b   :  { %4040 = vmatprep.subr.bf16.mxu1 %v5535_v37 }
 0x29e   :  { %4042 = vmatpush1.bf16.msra.mxu1 %v5543_v55 }
 0x29f   :  { %4044 = vmatprep.subr.bf16.mxu1 %v5553_v44 }
 0x2a2   :  { %4046 = vmatpush1.bf16.msra.mxu1 %v5564_v18 }
 0x2a3   :  { %4048 = vmatprep.subr.bf16.mxu1 %v5576_v52 }
 0x2a6   :  { %4050 = vmatpush1.bf16.msra.mxu1 %v5585_v0 }
 0x2a7   :  { %4052 = vmatprep.subr.bf16.mxu1 %v5594_v11 }
 0x2aa   :  { %4054 = vmatpush1.bf16.msra.mxu1 %v5606_v41 }
 0x2ab   :  { %4055 = vmatprep.subr.bf16.mxu1 %v4627_v63 }
 0x340   :  { %v1085_v50 = vpop.f32.mrb[16].mxu1  ;;  %v1228_v34 = vpop.f32.mrb[4].mxu0 }
 0x341   :  { %v1086_v8 = vadd.f32 %v5407_v60, %v1085_v50  ;;  %v3452_v30 = vpop.f32.mrb[17].mxu1  ;;  %v1230_v35 = vpop.f32.mrb[5].mxu0  ;;  %v4435_v38 = vadd.f32 %v1228_v34, %v5317_v17  ;;  %v1455_v50 = vld [vmem:[%s6446_s2 + $0x40] sm:$0xff] }
 0x342   :  { %v4436_v42 = vadd.f32 %v1230_v35, %v5319_v20  ;;  %v1459_v34 = vld [vmem:[%s6446_s2 + $0x60] sm:$0xff] }
 0x343   :  { %3216 = vst [vmem:[%s6453_s8 + $0x8] sm:$0xff] %v1086_v8  ;;  %v3217_v2 = vmul.f32 -1.442695, %v4435_v38  ;;  %v1464_v8 = vld [vmem:[%s6446_s2 + $0x88] sm:$0xff]  ;;  %v5661_v30 = vpack.c.bf16 %v1459_v34, %v1455_v50  ;;  %v1467_v38 = vld [vmem:[%s6446_s2 + $0xa0] sm:$0xff] }
 0x344   :  { %v3218_v47 = vmul.f32 -1.442695, %v4436_v42  ;;  %v5665_v35 = vpack.c.bf16 %v1468_v16, %v1464_v8  ;;  %v1463_v42 = vld [vmem:[%s6446_s2 + $0x80] sm:$0xff] }
 0x345   :  { %v1503_v34 = vld [vmem:[%s6446_s2 + $0x1c0] sm:$0xff] }
 0x346   :  { %4530 = vpow2.f32 %v3218_v47  ;;  %v1472_v47 = vld [vmem:[%s6446_s2 + $0xc8] sm:$0xff]  ;;  %v1507_v8 = vld [vmem:[%s6446_s2 + $0x1e0] sm:$0xff] }
 0x347   :  { %4532 = vpow2.f32 %v3217_v2  ;;  %v1476_v2 = vld [vmem:[%s6446_s2 + $0xe8] sm:$0xff]  ;;  %v5766_v16 = vpack.c.bf16 %v1507_v8, %v1503_v34  ;;  %v1708_v8 = vld [vmem:[%s6449_s6 + $0x70] sm:$0xff] }
 0x350   :  { %v4531_v29 = vpop.eup %4530 }
 0x351   :  { %v4533_v36 = vpop.eup %4532  ;;  %v1318_v6 = vadd.f32 1.0, %v4531_v29  ;;  %v5682_v29 = vpack.c.bf16 %v1467_v38, %v1463_v42  ;;  %v1694_v42 = vld [vmem:[%s6449_s6] sm:$0xff]  ;;  %v1695_v38 = vld [vmem:[%s6449_s6 + $0x8] sm:$0xff] }
 0x352   :  { %v1317_v13 = vadd.f32 1.0, %v4533_v36  ;;  %v5685_v36 = vpack.c.bf16 %v1476_v2, %v1472_v47  ;;  %v5795_v47 = vpack.c.bf16 %v1695_v38, %v1694_v42  ;;  %v1696_v2 = vld [vmem:[%s6449_s6 + $0x10] sm:$0xff]  ;;  %v1709_v42 = vld [vmem:[%s6449_s6 + $0x78] sm:$0xff] }
 0x353   :  { %4534 = vrcp.f32 %v1318_v6  ;;  %v1471_v6 = vld [vmem:[%s6446_s2 + $0xc0] sm:$0xff]  ;;  %v5864_v38 = vpack.c.bf16 %v1709_v42, %v1708_v8 }
 0x354   :  { %4536 = vrcp.f32 %v1317_v13  ;;  %v1475_v13 = vld [vmem:[%s6446_s2 + $0xe0] sm:$0xff] }
 0x35d   :  { %v4535_v56 = vpop.eup %4534 }
 0x35e   :  { %v4537_v33 = vpop.eup %4536  ;;  %v1327_v5 = vmul.f32 %v4535_v56, %v5621_v43  ;;  %v1488_v56 = vld [vmem:[%s6446_s2 + $0x148] sm:$0xff] }
 0x360   :  { %v1299_v26 = vpop.f32.mrb[4].mxu1 }
 0x361   :  { %v4451_v32 = vadd.f32 %v1299_v26, %v5323_v39  ;;  %v1301_v48 = vpop.f32.mrb[5].mxu1  ;;  %v1480_v26 = vld [vmem:[%s6446_s2 + $0x108] sm:$0xff] }
 0x362   :  { %v4452_v58 = vadd.f32 %v1301_v48, %v5326_v51  ;;  %v5700_v48 = vpack.c.bf16 %v1475_v13, %v1471_v6  ;;  %v1697_v6 = vld [vmem:[%s6449_s6 + $0x18] sm:$0xff] }
 0x363   :  { %v3219_v14 = vmul.f32 -1.442695, %v4451_v32  ;;  %v1484_v32 = vld [vmem:[%s6446_s2 + $0x128] sm:$0xff]  ;;  %v5805_v13 = vpack.c.bf16 %v1697_v6, %v1696_v2 }
 0x364   :  { %4538 = vtanh.f32 %v4452_v58  ;;  %v5703_v58 = vpack.c.bf16 %v1484_v32, %v1480_v26  ;;  %v1698_v26 = vld [vmem:[%s6449_s6 + $0x20] sm:$0xff]  ;;  %v1699_v32 = vld [vmem:[%s6449_s6 + $0x28] sm:$0xff] }
 0x365   :  { %4540 = vpow2.f32 %v3219_v14  ;;  %v1479_v14 = vld [vmem:[%s6446_s2 + $0x100] sm:$0xff] }
 0x36e   :  { %v4539_v49 = vpop.eup %4538 }
 0x36f   :  { %v4541_v61 = vpop.eup %4540  ;;  %v1328_v54 = vmul.f32 %v4539_v49, %v4537_v33  ;;  %v1492_v33 = vld [vmem:[%s6446_s2 + $0x168] sm:$0xff]  ;;  %v5718_v49 = vpack.c.bf16 %v1483_v22, %v1479_v14  ;;  %v5815_v14 = vpack.c.bf16 %v1699_v32, %v1698_v26  ;;  %v1700_v22 = vld [vmem:[%s6449_s6 + $0x30] sm:$0xff] }
 0x370   :  { %v1319_v62 = vadd.f32 1.0, %v4541_v61  ;;  %v5721_v61 = vpack.c.bf16 %v1492_v33, %v1488_v56  ;;  %v1701_v56 = vld [vmem:[%s6449_s6 + $0x38] sm:$0xff] }
 0x371   :  { %v5624_v9 = vadd.f32 %v1328_v54, %v1327_v5  ;;  %v1487_v5 = vld [vmem:[%s6446_s2 + $0x140] sm:$0xff]  ;;  %v5825_v33 = vpack.c.bf16 %v1701_v56, %v1700_v22 }
 0x372   :  { %4542 = vrcp.f32 %v1319_v62  ;;  %v1491_v54 = vld [vmem:[%s6446_s2 + $0x160] sm:$0xff]  ;;  %v1496_v62 = vld [vmem:[%s6446_s2 + $0x188] sm:$0xff] }
 0x373   :  { %4544 = vtanh.f32 %v5624_v9  ;;  %v5736_v21 = vpack.c.bf16 %v1491_v54, %v1487_v5  ;;  %v1702_v5 = vld [vmem:[%s6449_s6 + $0x40] sm:$0xff]  ;;  %v1703_v54 = vld [vmem:[%s6449_s6 + $0x48] sm:$0xff] }
 0x37c   :  { %v4543_v25 = vpop.eup %4542 }
 0x37d   :  { %v4545_v28 = vpop.eup %4544 }
 0x37e   :  { %v1331_v59 = vmul.f32 %v4545_v28, %v4543_v25  ;;  %v1500_v25 = vld [vmem:[%s6446_s2 + $0x1a8] sm:$0xff]  ;;  %v1495_v28 = vld [vmem:[%s6446_s2 + $0x180] sm:$0xff] }
 0x37f   :  { %v5739_v31 = vpack.c.bf16 %v1500_v25, %v1496_v62  ;;  %v5835_v62 = vpack.c.bf16 %v1703_v54, %v1702_v5  ;;  %v1704_v25 = vld [vmem:[%s6449_s6 + $0x50] sm:$0xff] }
 0x380   :  { %v5642_v15 = vadd.f32 %v1340_v1, %v1331_v59  ;;  %v1508_v59 = vld [vmem:[%s6446_s2 + $0x1e8] sm:$0xff]  ;;  %v5754_v1 = vpack.c.bf16 %v1499_v46, %v1495_v28  ;;  %v1705_v28 = vld [vmem:[%s6449_s6 + $0x58] sm:$0xff]  ;;  %v1706_v46 = vld [vmem:[%s6449_s6 + $0x60] sm:$0xff] }
 0x381   :  { %v5757_v50 = vpack.c.bf16 %v1508_v59, %v1504_v57  ;;  %v5848_v57 = vpack.c.bf16 %v1705_v28, %v1704_v25  ;;  %v1707_v59 = vld [vmem:[%s6449_s6 + $0x68] sm:$0xff] }
 0x382   :  { %3486 = vmatmul.mubr.f32.vlgmr.msra.gmra.mrb[18].mxu0 %v5642_v15  ;;  %1647 = vmatmul.mubr.f32.vlgmr.msra.gmra.mrb[6].mxu1 %v5642_v15  ;;  %v5854_v34 = vpack.c.bf16 %v1707_v59, %v1706_v46 }
 0x383   :  { %3994 = vmatpush1.bf16.msra.mxu0 %v5640_v7  ;;  %1575 = vmatprep.mubr.f32.mxu0 %v4626_v3 }
 0x384   :  { %3996 = vmatprep.subr.bf16.mxu0 %v5644_v12  ;;  %3520 = vmatprep.mubr.msk.f32.mxu1 %vm4628_vm0, %v4626_v3 }
 0x385   :  { %4057 = vmatpush3.bf16.msra.mxu1 %v5795_v47 }
 0x386   :  { %4058 = vmatprep.subr.bf16.mxu1 %v4627_v63 }
 0x387   :  { %3998 = vmatpush1.bf16.msra.mxu0 %v5661_v30 }
 0x388   :  { %4000 = vmatprep.subr.bf16.mxu0 %v5665_v35 }
 0x389   :  { %4060 = vmatpush3.bf16.msra.mxu1 %v5805_v13 }
 0x38a   :  { %4061 = vmatprep.subr.bf16.mxu1 %v4627_v63 }
 0x38b   :  { %4002 = vmatpush1.bf16.msra.mxu0 %v5682_v29 }
 0x38c   :  { %4004 = vmatprep.subr.bf16.mxu0 %v5685_v36 }
 0x38d   :  { %4063 = vmatpush3.bf16.msra.mxu1 %v5815_v14 }
 0x38e   :  { %4064 = vmatprep.subr.bf16.mxu1 %v4627_v63 }
 0x38f   :  { %4006 = vmatpush1.bf16.msra.mxu0 %v5700_v48 }
 0x390   :  { %4008 = vmatprep.subr.bf16.mxu0 %v5703_v58 }
 0x391   :  { %4066 = vmatpush3.bf16.msra.mxu1 %v5825_v33 }
 0x392   :  { %4067 = vmatprep.subr.bf16.mxu1 %v4627_v63 }
 0x393   :  { %4010 = vmatpush1.bf16.msra.mxu0 %v5718_v49 }
 0x394   :  { %4012 = vmatprep.subr.bf16.mxu0 %v5721_v61 }
 0x395   :  { %4069 = vmatpush3.bf16.msra.mxu1 %v5835_v62 }
 0x396   :  { %4070 = vmatprep.subr.bf16.mxu1 %v4627_v63 }
 0x397   :  { %4014 = vmatpush1.bf16.msra.mxu0 %v5736_v21 }
 0x398   :  { %4016 = vmatprep.subr.bf16.mxu0 %v5739_v31 }
 0x399   :  { %4072 = vmatpush3.bf16.msra.mxu1 %v5848_v57 }
 0x39a   :  { %4073 = vmatprep.subr.bf16.mxu1 %v4627_v63 }
 0x39b   :  { %4018 = vmatpush1.bf16.msra.mxu0 %v5754_v1 }
 0x39c   :  { %4020 = vmatprep.subr.bf16.mxu0 %v5757_v50 }
 0x39d   :  { %4075 = vmatpush3.bf16.msra.mxu1 %v5854_v34 }
 0x39e   :  { %4076 = vmatprep.subr.bf16.mxu1 %v4627_v63 }
 0x39f   :  { %4022 = vmatpush1.bf16.msra.mxu0 %v5766_v16 }
 0x3a0   :  { %4080 = vmatprep.subr.bf16.mxu0 %v5602_v24 }
 0x3a1   :  { %4078 = vmatpush3.bf16.msra.mxu1 %v5864_v38 }
 0x3a2   :  { %1576 = vmatmul.mubr.f32.vlgmr.msra.gmra.mrb[6].mxu0 %v5642_v15  ;;  %4112 = vmatprep.subr.bf16.mxu1 %v5401_v53 }
 0x3a3   :  { %4082 = vmatpush1.bf16.msra.mxu0 %v5640_v7  ;;  %1924 = vmatprep.mubr.f32.mxu0 %v4626_v3 }
 0x3a4   :  { %4084 = vmatprep.subr.bf16.mxu0 %v5644_v12 }
 0x3a7   :  { %4086 = vmatpush1.bf16.msra.mxu0 %v5661_v30 }
 0x3a8   :  { %4088 = vmatprep.subr.bf16.mxu0 %v5665_v35 }
 0x3ab   :  { %4090 = vmatpush1.bf16.msra.mxu0 %v5682_v29 }
 0x3ac   :  { %4092 = vmatprep.subr.bf16.mxu0 %v5685_v36 }
 0x3af   :  { %4094 = vmatpush1.bf16.msra.mxu0 %v5700_v48 }
 0x3b0   :  { %4096 = vmatprep.subr.bf16.mxu0 %v5703_v58 }
 0x3b3   :  { %4098 = vmatpush1.bf16.msra.mxu0 %v5718_v49 }
 0x3b4   :  { %4100 = vmatprep.subr.bf16.mxu0 %v5721_v61 }
 0x3b7   :  { %4102 = vmatpush1.bf16.msra.mxu0 %v5736_v21 }
 0x3b8   :  { %4104 = vmatprep.subr.bf16.mxu0 %v5739_v31 }
 0x3bb   :  { %4106 = vmatpush1.bf16.msra.mxu0 %v5754_v1 }
 0x3bc   :  { %4108 = vmatprep.subr.bf16.mxu0 %v5757_v50 }
 0x3bf   :  { %4110 = vmatpush1.bf16.msra.mxu0 %v5766_v16 }
 0x3c0   :  { %4143 = vmatprep.subr.bf16.mxu0 %v4627_v63 }
 0x455   :  { %v1434_v2 = vpop.f32.mrb[18].mxu0  ;;  %v1648_v6 = vpop.f32.mrb[6].mxu1 }
 0x456   :  { %v1435_v26 = vadd.f32 %v5407_v60, %v1434_v2  ;;  %v3487_v32 = vpop.f32.mrb[19].mxu0  ;;  %v1650_v22 = vpop.f32.mrb[7].mxu1  ;;  %v4453_v53 = vadd.f32 %v1648_v6, %v5323_v39 }
 0x457   :  { %v4454_v60 = vadd.f32 %v1650_v22, %v5326_v51 }
 0x458   :  { %3221 = vst [vmem:[%s6453_s8 + $0x10] sm:$0xff] %v1435_v26  ;;  %v3224_v59 = vmul.f32 -1.442695, %v4453_v53 }
 0x475   :  { %v1577_v56 = vpop.f32.mrb[6].mxu0 }
 0x476   :  { %v4437_v5 = vadd.f32 %v1577_v56, %v5317_v17  ;;  %v1579_v54 = vpop.f32.mrb[7].mxu0  ;;  %v1343_v56 = vmul.f32 0.0, %v5621_v43  ;;  %v1689_v43 = vmul.f32 0.0, %v5642_v15 }
 0x477   :  { %v4438_v25 = vadd.f32 %v1579_v54, %v5319_v20 }
 0x478   :  { %v3222_v28 = vmul.f32 -1.442695, %v4437_v5 }
 0x479   :  { %v3223_v46 = vmul.f32 -1.442695, %v4438_v25  ;;  %v5879_v25 = vadd.f32 %v1343_v56, %v5624_v9  ;;  %v2147_v9 = vld [vmem:[%s6446_s2 + $0x10] sm:$0xff] }
 0x47a   :  { %4546 = vpow2.f32 %v3222_v28  ;;  %v2155_v56 = vld [vmem:[%s6446_s2 + $0x50] sm:$0xff] }
 0x47b   :  { %4548 = vpow2.f32 %v3223_v46 }
 0x47c   :  { %4550 = vpow2.f32 %v3224_v59 }
 0x47d   :  { %4552 = vtanh.f32 %v4454_v60 }
 0x484   :  { %v4547_v8 = vpop.eup %4546 }
 0x485   :  { %v4549_v42 = vpop.eup %4548  ;;  %v1666_v2 = vadd.f32 1.0, %v4547_v8 }
 0x486   :  { %v1667_v26 = vadd.f32 1.0, %v4549_v42  ;;  %v4551_v32 = vpop.eup %4550 }
 0x487   :  { %4554 = vrcp.f32 %v1666_v2  ;;  %v4553_v5 = vpop.eup %4552  ;;  %v1668_v28 = vadd.f32 1.0, %v4551_v32  ;;  %v2156_v2 = vld [vmem:[%s6446_s2 + $0x58] sm:$0xff] }
 0x488   :  { %4556 = vrcp.f32 %v1667_v26  ;;  %v2160_v26 = vld [vmem:[%s6446_s2 + $0x78] sm:$0xff] }
 0x489   :  { %4558 = vrcp.f32 %v1668_v28  ;;  %v5950_v32 = vpack.c.bf16 %v2160_v26, %v2156_v2 }
 0x491   :  { %v4555_v54 = vpop.eup %4554 }
 0x492   :  { %v4557_v6 = vpop.eup %4556  ;;  %v1677_v46 = vmul.f32 %v4555_v54, %v4553_v5  ;;  %v2159_v5 = vld [vmem:[%s6446_s2 + $0x70] sm:$0xff] }
 0x493   :  { %v1676_v22 = vmul.f32 %v4557_v6, %v5879_v25  ;;  %v4559_v59 = vpop.eup %4558  ;;  %v5958_v54 = vpack.c.bf16 %v2159_v5, %v2155_v56 }
 0x495   :  { %v5882_v53 = vadd.f32 %v1677_v46, %v1676_v22 }
 0x497   :  { %4560 = vtanh.f32 %v5882_v53 }
 0x4a1   :  { %v4561_v60 = vpop.eup %4560 }
 0x4a2   :  { %v1680_v8 = vmul.f32 %v4561_v60, %v4559_v59 }
 0x4a4   :  { %v5886_v42 = vadd.f32 %v1689_v43, %v1680_v8  ;;  %v1692_v43 = vmul.f32 0.0, %v5879_v25 }
 0x4a6   :  { %3521 = vmatmul.mubr.f32.vlgmr.msra.gmra.mrb[18].mxu1 %v5886_v42  ;;  %1925 = vmatmul.mubr.f32.vlgmr.msra.gmra.mrb[8].mxu0 %v5886_v42  ;;  %v2038_v25 = vmul.f32 0.0, %v5886_v42 }
 0x4a7   :  { %4114 = vmatpush1.bf16.msra.mxu1 %v5438_v10  ;;  %1995 = vmatprep.mubr.f32.mxu1 %v4626_v3  ;;  %v2148_v10 = vld [vmem:[%s6446_s2 + $0x18] sm:$0xff] }
 0x4a8   :  { %4116 = vmatprep.subr.bf16.mxu1 %v5442_v23  ;;  %4145 = vmatpush3.bf16.msra.mxu0 %v5795_v47  ;;  %v2152_v23 = vld [vmem:[%s6446_s2 + $0x38] sm:$0xff] }
 0x4a9   :  { %4146 = vmatprep.subr.bf16.mxu0 %v4627_v63  ;;  %3555 = vmatprep.mubr.msk.f32.mxu0 %vm4628_vm0, %v4626_v3 }
 0x4ab   :  { %4118 = vmatpush1.bf16.msra.mxu1 %v5453_v45  ;;  %v5932_v45 = vpack.c.bf16 %v2152_v23, %v2148_v10 }
 0x4ac   :  { %4120 = vmatprep.subr.bf16.mxu1 %v5499_v19  ;;  %4148 = vmatpush3.bf16.msra.mxu0 %v5805_v13 }
 0x4ad   :  { %4149 = vmatprep.subr.bf16.mxu0 %v4627_v63 }
 0x4af   :  { %4122 = vmatpush1.bf16.msra.mxu1 %v5507_v40 }
 0x4b0   :  { %4124 = vmatprep.subr.bf16.mxu1 %v5517_v4  ;;  %4151 = vmatpush3.bf16.msra.mxu0 %v5815_v14 }
 0x4b1   :  { %4152 = vmatprep.subr.bf16.mxu0 %v4627_v63 }
 0x4b3   :  { %4126 = vmatpush1.bf16.msra.mxu1 %v5525_v27 }
 0x4b4   :  { %4128 = vmatprep.subr.bf16.mxu1 %v5535_v37  ;;  %4154 = vmatpush3.bf16.msra.mxu0 %v5825_v33 }
 0x4b5   :  { %4155 = vmatprep.subr.bf16.mxu0 %v4627_v63 }
 0x4b7   :  { %4130 = vmatpush1.bf16.msra.mxu1 %v5543_v55 }
 0x4b8   :  { %4132 = vmatprep.subr.bf16.mxu1 %v5553_v44  ;;  %4157 = vmatpush3.bf16.msra.mxu0 %v5835_v62 }
 0x4b9   :  { %4158 = vmatprep.subr.bf16.mxu0 %v4627_v63 }
 0x4bb   :  { %4134 = vmatpush1.bf16.msra.mxu1 %v5564_v18 }
 0x4bc   :  { %4136 = vmatprep.subr.bf16.mxu1 %v5576_v52  ;;  %4160 = vmatpush3.bf16.msra.mxu0 %v5848_v57 }
 0x4bd   :  { %4161 = vmatprep.subr.bf16.mxu0 %v4627_v63 }
 0x4bf   :  { %4138 = vmatpush1.bf16.msra.mxu1 %v5585_v0 }
 0x4c0   :  { %4140 = vmatprep.subr.bf16.mxu1 %v5594_v11  ;;  %4163 = vmatpush3.bf16.msra.mxu0 %v5854_v34 }
 0x4c1   :  { %4164 = vmatprep.subr.bf16.mxu0 %v4627_v63 }
 0x4c3   :  { %4142 = vmatpush1.bf16.msra.mxu1 %v5606_v41 }
 0x4c4   :  { %4166 = vmatpush3.bf16.msra.mxu0 %v5864_v38  ;;  %4200 = vmatprep.subr.bf16.mxu1 %v5932_v45 }
 0x4c5   :  { %4168 = vmatprep.subr.bf16.mxu0 %v5602_v24  ;;  %v2151_v24 = vld [vmem:[%s6446_s2 + $0x30] sm:$0xff] }
 0x4c6   :  { %1996 = vmatmul.mubr.f32.vlgmr.msra.gmra.mrb[8].mxu1 %v5886_v42  ;;  %v5940_v15 = vpack.c.bf16 %v2151_v24, %v2147_v9  ;;  %v5990_v9 = vadd.f32 %v1692_v43, %v5882_v53  ;;  %v2527_v42 = vld [vmem:[%s6446_s2 + $0x108] sm:$0xff] }
 0x4c7   :  { %2344 = vmatprep.mubr.f32.mxu1 %v4626_v3 }
 0x4c8   :  { %4202 = vmatpush1.bf16.msra.mxu1 %v5940_v15 }
 0x4c9   :  { %4204 = vmatprep.subr.bf16.mxu1 %v5950_v32 }
 0x4cc   :  { %4206 = vmatpush1.bf16.msra.mxu1 %v5958_v54 }
 0x4cd   :  { %4208 = vmatprep.subr.bf16.mxu1 %v5499_v19  ;;  %v5978_v19 = vld [vmem:[%s6452_s7] ss:$0 sm:$0xff] }
 0x4d0   :  { %4210 = vmatpush1.bf16.msra.mxu1 %v5507_v40 }
 0x4d1   :  { %4212 = vmatprep.subr.bf16.mxu1 %v5517_v4 }
 0x4d4   :  { %4214 = vmatpush1.bf16.msra.mxu1 %v5525_v27 }
 0x4d5   :  { %4216 = vmatprep.subr.bf16.mxu1 %v5535_v37 }
 0x4d8   :  { %4218 = vmatpush1.bf16.msra.mxu1 %v5543_v55 }
 0x4d9   :  { %4220 = vmatprep.subr.bf16.mxu1 %v5553_v44 }
 0x4dc   :  { %4222 = vmatpush1.bf16.msra.mxu1 %v5564_v18 }
 0x4dd   :  { %4224 = vmatprep.subr.bf16.mxu1 %v5576_v52 }
 0x4e0   :  { %4226 = vmatpush1.bf16.msra.mxu1 %v5585_v0 }
 0x4e1   :  { %4228 = vmatprep.subr.bf16.mxu1 %v5594_v11 }
 0x4e4   :  { %4230 = vmatpush1.bf16.msra.mxu1 %v5606_v41 }
 0x4e5   :  { %4231 = vmatprep.subr.bf16.mxu1 %v4627_v63 }
 0x579   :  { %v1783_v40 = vpop.f32.mrb[18].mxu1  ;;  %v1926_v4 = vpop.f32.mrb[8].mxu0 }
 0x57a   :  { %v1784_v27 = vadd.f32 %v5978_v19, %v1783_v40  ;;  %v3522_v37 = vpop.f32.mrb[19].mxu1  ;;  %v1928_v55 = vpop.f32.mrb[9].mxu0  ;;  %v4439_v18 = vadd.f32 %v1926_v4, %v5317_v17 }
 0x57b   :  { %v4440_v44 = vadd.f32 %v1928_v55, %v5319_v20 }
 0x57c   :  { %3226 = vst [vmem:[%s6453_s8 + $0x18] sm:$0xff] %v1784_v27  ;;  %v3227_v0 = vmul.f32 -1.442695, %v4439_v18 }
 0x57d   :  { %v3228_v52 = vmul.f32 -1.442695, %v4440_v44  ;;  %v2531_v44 = vld [vmem:[%s6446_s2 + $0x128] sm:$0xff] }
 0x57e   :  { %v6115_v18 = vpack.c.bf16 %v2531_v44, %v2527_v42  ;;  %v2041_v44 = vmul.f32 0.0, %v5990_v9 }
 0x57f   :  { %4562 = vpow2.f32 %v3228_v52  ;;  %v2526_v52 = vld [vmem:[%s6446_s2 + $0x100] sm:$0xff] }
 0x580   :  { %4564 = vpow2.f32 %v3227_v0  ;;  %v2530_v0 = vld [vmem:[%s6446_s2 + $0x120] sm:$0xff] }
 0x589   :  { %v4563_v11 = vpop.eup %4562 }
 0x58a   :  { %v4565_v41 = vpop.eup %4564  ;;  %v2016_v6 = vadd.f32 1.0, %v4563_v11  ;;  %v6123_v11 = vpack.c.bf16 %v2530_v0, %v2526_v52 }
 0x58b   :  { %v2015_v28 = vadd.f32 1.0, %v4565_v41  ;;  %v2535_v41 = vld [vmem:[%s6446_s2 + $0x148] sm:$0xff] }
 0x58c   :  { %4566 = vrcp.f32 %v2016_v6  ;;  %v2539_v6 = vld [vmem:[%s6446_s2 + $0x168] sm:$0xff] }
 0x58d   :  { %4568 = vrcp.f32 %v2015_v28  ;;  %v2534_v28 = vld [vmem:[%s6446_s2 + $0x140] sm:$0xff] }
 0x596   :  { %v4567_v10 = vpop.eup %4566 }
 0x597   :  { %v4569_v23 = vpop.eup %4568  ;;  %v2025_v26 = vmul.f32 %v4567_v10, %v5990_v9  ;;  %v2542_v10 = vld [vmem:[%s6446_s2 + $0x180] sm:$0xff] }
 0x599   :  { %v1997_v46 = vpop.f32.mrb[8].mxu1 }
 0x59a   :  { %v4455_v22 = vadd.f32 %v1997_v46, %v5323_v39  ;;  %v1999_v59 = vpop.f32.mrb[9].mxu1  ;;  %v6136_v46 = vpack.c.bf16 %v2539_v6, %v2535_v41 }
 0x59b   :  { %v4456_v60 = vadd.f32 %v1999_v59, %v5326_v51  ;;  %v2543_v59 = vld [vmem:[%s6446_s2 + $0x188] sm:$0xff] }
 0x59c   :  { %v3229_v8 = vmul.f32 -1.442695, %v4455_v22  ;;  %v2538_v22 = vld [vmem:[%s6446_s2 + $0x160] sm:$0xff] }
 0x59d   :  { %4570 = vtanh.f32 %v4456_v60  ;;  %v2547_v60 = vld [vmem:[%s6446_s2 + $0x1a8] sm:$0xff] }
 0x59e   :  { %4572 = vpow2.f32 %v3229_v8  ;;  %v6147_v8 = vpack.c.bf16 %v2538_v22, %v2534_v28  ;;  %v6149_v43 = vpack.c.bf16 %v2547_v60, %v2543_v59 }
 0x5a7   :  { %v4571_v24 = vpop.eup %4570 }
 0x5a8   :  { %v4573_v2 = vpop.eup %4572  ;;  %v2026_v56 = vmul.f32 %v4571_v24, %v4569_v23  ;;  %v2546_v23 = vld [vmem:[%s6446_s2 + $0x1a0] sm:$0xff]  ;;  %v2551_v24 = vld [vmem:[%s6446_s2 + $0x1c8] sm:$0xff] }
 0x5a9   :  { %v2017_v5 = vadd.f32 1.0, %v4573_v2  ;;  %v2555_v2 = vld [vmem:[%s6446_s2 + $0x1e8] sm:$0xff] }
 0x5aa   :  { %v5993_v40 = vadd.f32 %v2026_v56, %v2025_v26  ;;  %v6165_v26 = vpack.c.bf16 %v2546_v23, %v2542_v10  ;;  %v6168_v56 = vpack.c.bf16 %v2555_v2, %v2551_v24 }
 0x5ab   :  { %4574 = vrcp.f32 %v2017_v5  ;;  %v2550_v5 = vld [vmem:[%s6446_s2 + $0x1c0] sm:$0xff] }
 0x5ac   :  { %4576 = vtanh.f32 %v5993_v40  ;;  %v6192_v41 = vadd.f32 %v2041_v44, %v5993_v40  ;;  %v2513_v40 = vld [vmem:[%s6446_s2 + $0x98] sm:$0xff] }
 0x5ad   :  { %v2545_v44 = vld [vmem:[%s6446_s2 + $0x198] sm:$0xff] }
 0x5b5   :  { %v4575_v4 = vpop.eup %4574 }
 0x5b6   :  { %v4577_v27 = vpop.eup %4576 }
 0x5b7   :  { %v2029_v37 = vmul.f32 %v4577_v27, %v4575_v4  ;;  %v2554_v4 = vld [vmem:[%s6446_s2 + $0x1e0] sm:$0xff] }
 0x5b8   :  { %v6177_v27 = vpack.c.bf16 %v2554_v4, %v2550_v5  ;;  %v2517_v5 = vld [vmem:[%s6446_s2 + $0xb8] sm:$0xff]  ;;  %v2512_v4 = vld [vmem:[%s6446_s2 + $0x90] sm:$0xff] }
 0x5b9   :  { %v5997_v55 = vadd.f32 %v2038_v25, %v2029_v37 }
 0x5bb   :  { %3556 = vmatmul.mubr.f32.vlgmr.msra.gmra.mrb[20].mxu0 %v5997_v55  ;;  %2345 = vmatmul.mubr.f32.vlgmr.msra.gmra.mrb[10].mxu1 %v5997_v55  ;;  %v2387_v9 = vmul.f32 0.0, %v5997_v55 }
 0x5bc   :  { %4170 = vmatpush1.bf16.msra.mxu0 %v5640_v7  ;;  %2273 = vmatprep.mubr.f32.mxu0 %v4626_v3  ;;  %v2495_v7 = vld [vmem:[%s6446_s2 + $0x8] sm:$0xff] }
 0x5bd   :  { %4172 = vmatprep.subr.bf16.mxu0 %v5644_v12  ;;  %4233 = vmatpush3.bf16.msra.mxu1 %v5795_v47  ;;  %v2499_v12 = vld [vmem:[%s6446_s2 + $0x28] sm:$0xff]  ;;  %v2510_v47 = vld [vmem:[%s6446_s2 + $0x80] sm:$0xff] }
 0x5be   :  { %4234 = vmatprep.subr.bf16.mxu1 %v4627_v63  ;;  %3590 = vmatprep.mubr.msk.f32.mxu1 %vm4628_vm0, %v4626_v3 }
 0x5c0   :  { %4174 = vmatpush1.bf16.msra.mxu0 %v5661_v30  ;;  %v6043_v30 = vpack.c.bf16 %v2499_v12, %v2495_v7 }
 0x5c1   :  { %4176 = vmatprep.subr.bf16.mxu0 %v5665_v35  ;;  %4236 = vmatpush3.bf16.msra.mxu1 %v5805_v13  ;;  %v2494_v35 = vld [vmem:[%s6446_s2] sm:$0xff] }
 0x5c2   :  { %4237 = vmatprep.subr.bf16.mxu1 %v4627_v63  ;;  %v2514_v13 = vld [vmem:[%s6446_s2 + $0xa0] sm:$0xff] }
 0x5c4   :  { %4178 = vmatpush1.bf16.msra.mxu0 %v5682_v29  ;;  %v2498_v29 = vld [vmem:[%s6446_s2 + $0x20] sm:$0xff] }
 0x5c5   :  { %4180 = vmatprep.subr.bf16.mxu0 %v5685_v36  ;;  %4239 = vmatpush3.bf16.msra.mxu1 %v5815_v14  ;;  %v6051_v36 = vpack.c.bf16 %v2498_v29, %v2494_v35  ;;  %v6087_v14 = vpack.c.bf16 %v2514_v13, %v2510_v47 }
 0x5c6   :  { %4240 = vmatprep.subr.bf16.mxu1 %v4627_v63 }
 0x5c8   :  { %4182 = vmatpush1.bf16.msra.mxu0 %v5700_v48  ;;  %v2503_v48 = vld [vmem:[%s6446_s2 + $0x48] sm:$0xff] }
 0x5c9   :  { %4184 = vmatprep.subr.bf16.mxu0 %v5703_v58  ;;  %4242 = vmatpush3.bf16.msra.mxu1 %v5825_v33  ;;  %v2507_v58 = vld [vmem:[%s6446_s2 + $0x68] sm:$0xff] }
 0x5ca   :  { %4243 = vmatprep.subr.bf16.mxu1 %v4627_v63  ;;  %v2519_v33 = vld [vmem:[%s6446_s2 + $0xc8] sm:$0xff] }
 0x5cc   :  { %4186 = vmatpush1.bf16.msra.mxu0 %v5718_v49  ;;  %v6061_v49 = vpack.c.bf16 %v2507_v58, %v2503_v48 }
 0x5cd   :  { %4188 = vmatprep.subr.bf16.mxu0 %v5721_v61  ;;  %4245 = vmatpush3.bf16.msra.mxu1 %v5835_v62  ;;  %v2502_v61 = vld [vmem:[%s6446_s2 + $0x40] sm:$0xff]  ;;  %v2523_v62 = vld [vmem:[%s6446_s2 + $0xe8] sm:$0xff] }
 0x5ce   :  { %4246 = vmatprep.subr.bf16.mxu1 %v4627_v63 }
 0x5d0   :  { %4190 = vmatpush1.bf16.msra.mxu0 %v5736_v21  ;;  %v2506_v21 = vld [vmem:[%s6446_s2 + $0x60] sm:$0xff] }
 0x5d1   :  { %4192 = vmatprep.subr.bf16.mxu0 %v5739_v31  ;;  %4248 = vmatpush3.bf16.msra.mxu1 %v5848_v57  ;;  %v6069_v31 = vpack.c.bf16 %v2506_v21, %v2502_v61  ;;  %v6097_v57 = vpack.c.bf16 %v2523_v62, %v2519_v33 }
 0x5d2   :  { %4249 = vmatprep.subr.bf16.mxu1 %v4627_v63 }
 0x5d4   :  { %4194 = vmatpush1.bf16.msra.mxu0 %v5754_v1  ;;  %v2511_v1 = vld [vmem:[%s6446_s2 + $0x88] sm:$0xff] }
 0x5d5   :  { %4196 = vmatprep.subr.bf16.mxu0 %v5757_v50  ;;  %4251 = vmatpush3.bf16.msra.mxu1 %v5854_v34  ;;  %v2515_v50 = vld [vmem:[%s6446_s2 + $0xa8] sm:$0xff]  ;;  %v2518_v34 = vld [vmem:[%s6446_s2 + $0xc0] sm:$0xff] }
 0x5d6   :  { %4252 = vmatprep.subr.bf16.mxu1 %v4627_v63 }
 0x5d8   :  { %4198 = vmatpush1.bf16.msra.mxu0 %v5766_v16  ;;  %v6079_v16 = vpack.c.bf16 %v2515_v50, %v2511_v1 }
 0x5d9   :  { %4254 = vmatpush3.bf16.msra.mxu1 %v5864_v38  ;;  %4256 = vmatprep.subr.bf16.mxu0 %v6043_v30  ;;  %v2522_v38 = vld [vmem:[%s6446_s2 + $0xe0] sm:$0xff] }
 0x5da   :  { %4288 = vmatprep.subr.bf16.mxu1 %v5932_v45  ;;  %v6105_v53 = vpack.c.bf16 %v2522_v38, %v2518_v34 }
 0x5db   :  { %2274 = vmatmul.mubr.f32.vlgmr.msra.gmra.mrb[10].mxu0 %v5997_v55  ;;  %v4295_v55 = vpack.c.bf16 %v2517_v5, %v2513_v40  ;;  %v2556_v40 = vld [vmem:[%s6446_s2 + $0x1f0] sm:$0xff] }
 0x5dc   :  { %2622 = vmatprep.mubr.f32.mxu0 %v4626_v3  ;;  %4258 = vmatpush1.bf16.msra.mxu0 %v6051_v36 }
 0x5dd   :  { %4260 = vmatprep.subr.bf16.mxu0 %v6061_v49 }
 0x5e0   :  { %4262 = vmatpush1.bf16.msra.mxu0 %v6069_v31 }
 0x5e1   :  { %4264 = vmatprep.subr.bf16.mxu0 %v6079_v16 }
 0x5e4   :  { %4266 = vmatpush1.bf16.msra.mxu0 %v6087_v14 }
 0x5e5   :  { %4268 = vmatprep.subr.bf16.mxu0 %v6097_v57 }
 0x5e8   :  { %4270 = vmatpush1.bf16.msra.mxu0 %v6105_v53 }
 0x5e9   :  { %4272 = vmatprep.subr.bf16.mxu0 %v6115_v18 }
 0x5ec   :  { %4274 = vmatpush1.bf16.msra.mxu0 %v6123_v11 }
 0x5ed   :  { %4276 = vmatprep.subr.bf16.mxu0 %v6136_v46 }
 0x5f0   :  { %4278 = vmatpush1.bf16.msra.mxu0 %v6147_v8 }
 0x5f1   :  { %4280 = vmatprep.subr.bf16.mxu0 %v6149_v43 }
 0x5f4   :  { %4282 = vmatpush1.bf16.msra.mxu0 %v6165_v26 }
 0x5f5   :  { %4284 = vmatprep.subr.bf16.mxu0 %v6168_v56 }
 0x5f8   :  { %4286 = vmatpush1.bf16.msra.mxu0 %v6177_v27 }
 0x5f9   :  { %4319 = vmatprep.subr.bf16.mxu0 %v4627_v63 }
 0x68e   :  { %v2132_v37 = vpop.f32.mrb[20].mxu0  ;;  %v2346_v25 = vpop.f32.mrb[10].mxu1 }
 0x68f   :  { %v2133_v7 = vadd.f32 %v5978_v19, %v2132_v37  ;;  %v3557_v12 = vpop.f32.mrb[21].mxu0  ;;  %v2348_v35 = vpop.f32.mrb[11].mxu1  ;;  %v4457_v50 = vadd.f32 %v2346_v25, %v5323_v39  ;;  %v2516_v37 = vld [vmem:[%s6446_s2 + $0xb0] sm:$0xff]  ;;  %v2521_v25 = vld [vmem:[%s6446_s2 + $0xd8] sm:$0xff] }
 0x690   :  { %v4458_v13 = vadd.f32 %v2348_v35, %v5326_v51  ;;  %v4297_v12 = vpack.c.bf16 %v2516_v37, %v2512_v4  ;;  %v2745_v37 = vld [vmem:[%s6449_s6 + $0x20] sm:$0xff] }
 0x691   :  { %3231 = vst [vmem:[%s6453_s8 + $0x20] sm:$0xff] %v2133_v7  ;;  %v3234_v47 = vmul.f32 -1.442695, %v4457_v50  ;;  %v2525_v7 = vld [vmem:[%s6446_s2 + $0xf8] sm:$0xff]  ;;  %v2528_v50 = vld [vmem:[%s6446_s2 + $0x110] sm:$0xff] }
 0x692   :  { %v4299_v35 = vpack.c.bf16 %v2525_v7, %v2521_v25  ;;  %v2746_v25 = vld [vmem:[%s6449_s6 + $0x28] sm:$0xff] }
 0x693   :  { %v6314_v7 = vpack.c.bf16 %v2746_v25, %v2745_v37 }
 0x6ae   :  { %v2275_v29 = vpop.f32.mrb[10].mxu0 }
 0x6af   :  { %v4441_v48 = vadd.f32 %v2275_v29, %v5317_v17  ;;  %v2277_v58 = vpop.f32.mrb[11].mxu0  ;;  %v2520_v29 = vld [vmem:[%s6446_s2 + $0xd0] sm:$0xff] }
 0x6b0   :  { %v4442_v61 = vadd.f32 %v2277_v58, %v5319_v20  ;;  %v2529_v58 = vld [vmem:[%s6446_s2 + $0x118] sm:$0xff] }
 0x6b1   :  { %v3232_v21 = vmul.f32 -1.442695, %v4441_v48  ;;  %v2524_v48 = vld [vmem:[%s6446_s2 + $0xf0] sm:$0xff] }
 0x6b2   :  { %v3233_v1 = vmul.f32 -1.442695, %v4442_v61  ;;  %v2533_v61 = vld [vmem:[%s6446_s2 + $0x138] sm:$0xff] }
 0x6b3   :  { %4578 = vpow2.f32 %v3232_v21  ;;  %v4301_v21 = vpack.c.bf16 %v2524_v48, %v2520_v29  ;;  %v2749_v48 = vld [vmem:[%s6449_s6 + $0x40] sm:$0xff] }
 0x6b4   :  { %4580 = vpow2.f32 %v3233_v1  ;;  %v4303_v1 = vpack.c.bf16 %v2533_v61, %v2529_v58  ;;  %v2750_v58 = vld [vmem:[%s6449_s6 + $0x48] sm:$0xff] }
 0x6b5   :  { %4582 = vpow2.f32 %v3234_v47  ;;  %v2532_v47 = vld [vmem:[%s6446_s2 + $0x130] sm:$0xff]  ;;  %v6334_v61 = vpack.c.bf16 %v2750_v58, %v2749_v48 }
 0x6b6   :  { %4584 = vtanh.f32 %v4458_v13  ;;  %v2537_v13 = vld [vmem:[%s6446_s2 + $0x158] sm:$0xff] }
 0x6bd   :  { %v4579_v33 = vpop.eup %4578 }
 0x6be   :  { %v4581_v62 = vpop.eup %4580  ;;  %v2364_v34 = vadd.f32 1.0, %v4579_v33  ;;  %v2541_v33 = vld [vmem:[%s6446_s2 + $0x178] sm:$0xff] }
 0x6bf   :  { %v2365_v38 = vadd.f32 1.0, %v4581_v62  ;;  %v4583_v42 = vpop.eup %4582  ;;  %v4305_v62 = vpack.c.bf16 %v2532_v47, %v2528_v50  ;;  %v2753_v47 = vld [vmem:[%s6449_s6 + $0x60] sm:$0xff] }
 0x6c0   :  { %4586 = vrcp.f32 %v2364_v34  ;;  %v4585_v52 = vpop.eup %4584  ;;  %v2366_v28 = vadd.f32 1.0, %v4583_v42  ;;  %v4307_v34 = vpack.c.bf16 %v2541_v33, %v2537_v13  ;;  %v2540_v42 = vld [vmem:[%s6446_s2 + $0x170] sm:$0xff]  ;;  %v2754_v13 = vld [vmem:[%s6449_s6 + $0x68] sm:$0xff] }
 0x6c1   :  { %4588 = vrcp.f32 %v2365_v38  ;;  %v2536_v38 = vld [vmem:[%s6446_s2 + $0x150] sm:$0xff]  ;;  %v6353_v33 = vpack.c.bf16 %v2754_v13, %v2753_v47 }
 0x6c2   :  { %4590 = vrcp.f32 %v2366_v28  ;;  %v2544_v28 = vld [vmem:[%s6446_s2 + $0x190] sm:$0xff] }
 0x6ca   :  { %v4587_v0 = vpop.eup %4586 }
 0x6cb   :  { %v4589_v6 = vpop.eup %4588  ;;  %v2375_v22 = vmul.f32 %v4587_v0, %v4585_v52  ;;  %v2549_v52 = vld [vmem:[%s6446_s2 + $0x1b8] sm:$0xff]  ;;  %v4309_v0 = vpack.c.bf16 %v2540_v42, %v2536_v38 }
 0x6cc   :  { %v2374_v59 = vmul.f32 %v4589_v6, %v6192_v41  ;;  %v4591_v10 = vpop.eup %4590  ;;  %v4311_v6 = vpack.c.bf16 %v2549_v52, %v2545_v44 }
 0x6ce   :  { %v6195_v60 = vadd.f32 %v2375_v22, %v2374_v59  ;;  %v2548_v22 = vld [vmem:[%s6446_s2 + $0x1b0] sm:$0xff]  ;;  %v2553_v59 = vld [vmem:[%s6446_s2 + $0x1d8] sm:$0xff] }
 0x6d0   :  { %4592 = vtanh.f32 %v6195_v60 }
 0x6da   :  { %v4593_v23 = vpop.eup %4592 }
 0x6db   :  { %v2378_v24 = vmul.f32 %v4593_v23, %v4591_v10  ;;  %v2557_v10 = vld [vmem:[%s6446_s2 + $0x1f8] sm:$0xff]  ;;  %v4313_v23 = vpack.c.bf16 %v2548_v22, %v2544_v28 }
 0x6dd   :  { %v6199_v2 = vadd.f32 %v2387_v9, %v2378_v24  ;;  %v4315_v24 = vpack.c.bf16 %v2557_v10, %v2553_v59  ;;  %v2552_v9 = vld [vmem:[%s6446_s2 + $0x1d0] sm:$0xff] }
 0x6de   :  { %v4317_v5 = vpack.c.bf16 %v2556_v40, %v2552_v9 }
 0x6df   :  { %3591 = vmatmul.mubr.f32.vlgmr.msra.gmra.mrb[20].mxu1 %v6199_v2  ;;  %2623 = vmatmul.mubr.f32.vlgmr.msra.gmra.mrb[12].mxu0 %v6199_v2 }
 0x6e0   :  { %4290 = vmatpush1.bf16.msra.mxu1 %v5940_v15  ;;  %2693 = vmatprep.mubr.f32.mxu1 %v4626_v3 }
 0x6e1   :  { %4292 = vmatprep.subr.bf16.mxu1 %v5950_v32  ;;  %3625 = vmatprep.mubr.msk.f32.mxu0 %vm4628_vm0, %v4626_v3 }
 0x6e4   :  { %4294 = vmatpush1.bf16.msra.mxu1 %v5958_v54 }
 0x6e5   :  { %4296 = vmatprep.subr.bf16.mxu1 %v4295_v55 }
 0x6e8   :  { %4298 = vmatpush1.bf16.msra.mxu1 %v4297_v12 }
 0x6e9   :  { %4300 = vmatprep.subr.bf16.mxu1 %v4299_v35 }
 0x6ec   :  { %4302 = vmatpush1.bf16.msra.mxu1 %v4301_v21 }
 0x6ed   :  { %4304 = vmatprep.subr.bf16.mxu1 %v4303_v1 }
 0x6f0   :  { %4306 = vmatpush1.bf16.msra.mxu1 %v4305_v62 }
 0x6f1   :  { %4308 = vmatprep.subr.bf16.mxu1 %v4307_v34 }
 0x6f4   :  { %4310 = vmatpush1.bf16.msra.mxu1 %v4309_v0 }
 0x6f5   :  { %4312 = vmatprep.subr.bf16.mxu1 %v4311_v6 }
 0x6f8   :  { %4314 = vmatpush1.bf16.msra.mxu1 %v4313_v23 }
 0x6f9   :  { %4316 = vmatprep.subr.bf16.mxu1 %v4315_v24 }
 0x6fc   :  { %4318 = vmatpush1.bf16.msra.mxu1 %v4317_v5 }
 0x6fd   :  { %4376 = vmatprep.subr.bf16.mxu1 %v5932_v45  ;;  %v2741_v45 = vld [vmem:[%s6449_s6] sm:$0xff] }
 0x6ff   :  { %2694 = vmatmul.mubr.f32.vlgmr.msra.gmra.mrb[12].mxu1 %v6199_v2 }
 0x700   :  { %4378 = vmatpush1.bf16.msra.mxu1 %v5940_v15  ;;  %3042 = vmatprep.mubr.f32.mxu1 %v4626_v3  ;;  %v2742_v15 = vld [vmem:[%s6449_s6 + $0x8] sm:$0xff] }
 0x701   :  { %4380 = vmatprep.subr.bf16.mxu1 %v5950_v32  ;;  %v6294_v32 = vpack.c.bf16 %v2742_v15, %v2741_v45 }
 0x703   :  { %4321 = vmatpush3.bf16.msra.mxu0 %v6294_v32 }
 0x704   :  { %4382 = vmatpush1.bf16.msra.mxu1 %v5958_v54  ;;  %4322 = vmatprep.subr.bf16.mxu0 %v4627_v63  ;;  %v2743_v54 = vld [vmem:[%s6449_s6 + $0x10] sm:$0xff] }
 0x705   :  { %4384 = vmatprep.subr.bf16.mxu1 %v4295_v55  ;;  %v2744_v55 = vld [vmem:[%s6449_s6 + $0x18] sm:$0xff] }
 0x706   :  { %v6304_v4 = vpack.c.bf16 %v2744_v55, %v2743_v54  ;;  %v2390_v54 = vmul.f32 0.0, %v6192_v41  ;;  %v2736_v41 = vmul.f32 0.0, %v6199_v2 }
 0x708   :  { %4386 = vmatpush1.bf16.msra.mxu1 %v4297_v12  ;;  %4324 = vmatpush3.bf16.msra.mxu0 %v6304_v4  ;;  %v2747_v12 = vld [vmem:[%s6449_s6 + $0x30] sm:$0xff]  ;;  %v6378_v25 = vadd.f32 %v2390_v54, %v6195_v60 }
 0x709   :  { %4388 = vmatprep.subr.bf16.mxu1 %v4299_v35  ;;  %4325 = vmatprep.subr.bf16.mxu0 %v4627_v63  ;;  %v2748_v35 = vld [vmem:[%s6449_s6 + $0x38] sm:$0xff] }
 0x70a   :  { %v6324_v29 = vpack.c.bf16 %v2748_v35, %v2747_v12 }
 0x70c   :  { %4390 = vmatpush1.bf16.msra.mxu1 %v4301_v21  ;;  %4327 = vmatpush3.bf16.msra.mxu0 %v6314_v7  ;;  %v2751_v21 = vld [vmem:[%s6449_s6 + $0x50] sm:$0xff] }
 0x70d   :  { %4392 = vmatprep.subr.bf16.mxu1 %v4303_v1  ;;  %4328 = vmatprep.subr.bf16.mxu0 %v4627_v63  ;;  %v2752_v1 = vld [vmem:[%s6449_s6 + $0x58] sm:$0xff] }
 0x70e   :  { %v6344_v50 = vpack.c.bf16 %v2752_v1, %v2751_v21 }
 0x710   :  { %4394 = vmatpush1.bf16.msra.mxu1 %v4305_v62  ;;  %4330 = vmatpush3.bf16.msra.mxu0 %v6324_v29  ;;  %v2755_v62 = vld [vmem:[%s6449_s6 + $0x70] sm:$0xff] }
 0x711   :  { %4396 = vmatprep.subr.bf16.mxu1 %v4307_v34  ;;  %4331 = vmatprep.subr.bf16.mxu0 %v4627_v63  ;;  %v2756_v34 = vld [vmem:[%s6449_s6 + $0x78] sm:$0xff] }
 0x712   :  { %v6363_v38 = vpack.c.bf16 %v2756_v34, %v2755_v62 }
 0x714   :  { %4398 = vmatpush1.bf16.msra.mxu1 %v4309_v0  ;;  %4333 = vmatpush3.bf16.msra.mxu0 %v6334_v61 }
 0x715   :  { %4400 = vmatprep.subr.bf16.mxu1 %v4311_v6  ;;  %4334 = vmatprep.subr.bf16.mxu0 %v4627_v63 }
 0x718   :  { %4402 = vmatpush1.bf16.msra.mxu1 %v4313_v23  ;;  %4336 = vmatpush3.bf16.msra.mxu0 %v6344_v50 }
 0x719   :  { %4404 = vmatprep.subr.bf16.mxu1 %v4315_v24  ;;  %4337 = vmatprep.subr.bf16.mxu0 %v4627_v63 }
 0x71c   :  { %4406 = vmatpush1.bf16.msra.mxu1 %v4317_v5  ;;  %4339 = vmatpush3.bf16.msra.mxu0 %v6353_v33 }
 0x71d   :  { %4407 = vmatprep.subr.bf16.mxu1 %v4627_v63  ;;  %4340 = vmatprep.subr.bf16.mxu0 %v4627_v63 }
 0x720   :  { %4342 = vmatpush3.bf16.msra.mxu0 %v6363_v38 }
 0x721   :  { %4344 = vmatprep.subr.bf16.mxu0 %v6043_v30 }
 0x7b2   :  { %v2481_v42 = vpop.f32.mrb[20].mxu1  ;;  %v2624_v44 = vpop.f32.mrb[12].mxu0 }
 0x7b3   :  { %v2482_v52 = vadd.f32 %v5978_v19, %v2481_v42  ;;  %v3592_v0 = vpop.f32.mrb[21].mxu1  ;;  %v2626_v6 = vpop.f32.mrb[13].mxu0  ;;  %v4443_v22 = vadd.f32 %v2624_v44, %v5317_v17 }
 0x7b4   :  { %v4444_v28 = vadd.f32 %v2626_v6, %v5319_v20 }
 0x7b5   :  { %3236 = vst [vmem:[%s6453_s8 + $0x28] sm:$0xff] %v2482_v52  ;;  %v3237_v10 = vmul.f32 -1.442695, %v4443_v22 }
 0x7b6   :  { %v3238_v59 = vmul.f32 -1.442695, %v4444_v28 }
 0x7b8   :  { %4594 = vpow2.f32 %v3238_v59 }
 0x7b9   :  { %4596 = vpow2.f32 %v3237_v10 }
 0x7c2   :  { %v4595_v23 = vpop.eup %4594 }
 0x7c3   :  { %v4597_v30 = vpop.eup %4596  ;;  %v2714_v24 = vadd.f32 1.0, %v4595_v23 }
 0x7c4   :  { %v2713_v9 = vadd.f32 1.0, %v4597_v30 }
 0x7c5   :  { %4598 = vrcp.f32 %v2714_v24 }
 0x7c6   :  { %4600 = vrcp.f32 %v2713_v9 }
 0x7cf   :  { %v4599_v55 = vpop.eup %4598 }
 0x7d0   :  { %v4601_v37 = vpop.eup %4600  ;;  %v2723_v48 = vmul.f32 %v4599_v55, %v6378_v25 }
 0x7d2   :  { %v2695_v40 = vpop.f32.mrb[12].mxu1 }
 0x7d3   :  { %v4459_v19 = vadd.f32 %v2695_v40, %v5323_v39  ;;  %v2697_v5 = vpop.f32.mrb[13].mxu1 }
 0x7d4   :  { %v4460_v45 = vadd.f32 %v2697_v5, %v5326_v51 }
 0x7d5   :  { %v3239_v15 = vmul.f32 -1.442695, %v4459_v19 }
 0x7d6   :  { %4602 = vtanh.f32 %v4460_v45 }
 0x7d7   :  { %4604 = vpow2.f32 %v3239_v15 }
 0x7e0   :  { %v4603_v12 = vpop.eup %4602 }
 0x7e1   :  { %v4605_v35 = vpop.eup %4604  ;;  %v2724_v58 = vmul.f32 %v4603_v12, %v4601_v37 }
 0x7e2   :  { %v2715_v21 = vadd.f32 1.0, %v4605_v35 }
 0x7e3   :  { %v6381_v1 = vadd.f32 %v2724_v58, %v2723_v48 }
 0x7e4   :  { %4606 = vrcp.f32 %v2715_v21 }
 0x7e5   :  { %4608 = vtanh.f32 %v6381_v1 }
 0x7ee   :  { %v4607_v47 = vpop.eup %4606 }
 0x7ef   :  { %v4609_v13 = vpop.eup %4608 }
 0x7f0   :  { %v2727_v62 = vmul.f32 %v4609_v13, %v4607_v47 }
 0x7f2   :  { %v6385_v34 = vadd.f32 %v2736_v41, %v2727_v62 }
 0x7f4   :  { %3626 = vmatmul.mubr.f32.vlgmr.msra.gmra.mrb[22].mxu0 %v6385_v34  ;;  %3043 = vmatmul.mubr.f32.vlgmr.msra.gmra.mrb[14].mxu1 %v6385_v34  ;;  %v3085_v0 = vmul.f32 0.0, %v6385_v34 }
 0x7f5   :  { %4346 = vmatpush1.bf16.msra.mxu0 %v6051_v36  ;;  %2971 = vmatprep.mubr.f32.mxu0 %v4626_v3 }
 0x7f6   :  { %4348 = vmatprep.subr.bf16.mxu0 %v6061_v49  ;;  %4409 = vmatpush3.bf16.msra.mxu1 %v6294_v32 }
 0x7f7   :  { %4410 = vmatprep.subr.bf16.mxu1 %v4627_v63  ;;  %3660 = vmatprep.mubr.msk.f32.mxu1 %vm4628_vm0, %v4626_v3  ;;  %v3240_v3 = vld [vmem:[%s6452_s7] ss:$0 sm:$0xff] }
 0x7f9   :  { %4350 = vmatpush1.bf16.msra.mxu0 %v6069_v31 }
 0x7fa   :  { %4352 = vmatprep.subr.bf16.mxu0 %v6079_v16  ;;  %4412 = vmatpush3.bf16.msra.mxu1 %v6304_v4 }
 0x7fb   :  { %4413 = vmatprep.subr.bf16.mxu1 %v4627_v63 }
 0x7fd   :  { %4354 = vmatpush1.bf16.msra.mxu0 %v6087_v14 }
 0x7fe   :  { %4356 = vmatprep.subr.bf16.mxu0 %v6097_v57  ;;  %4415 = vmatpush3.bf16.msra.mxu1 %v6314_v7 }
 0x7ff   :  { %4416 = vmatprep.subr.bf16.mxu1 %v4627_v63 }
 0x801   :  { %4358 = vmatpush1.bf16.msra.mxu0 %v6105_v53 }
 0x802   :  { %4360 = vmatprep.subr.bf16.mxu0 %v6115_v18  ;;  %4418 = vmatpush3.bf16.msra.mxu1 %v6324_v29 }
 0x803   :  { %4419 = vmatprep.subr.bf16.mxu1 %v4627_v63 }
 0x805   :  { %4362 = vmatpush1.bf16.msra.mxu0 %v6123_v11 }
 0x806   :  { %4364 = vmatprep.subr.bf16.mxu0 %v6136_v46  ;;  %4421 = vmatpush3.bf16.msra.mxu1 %v6334_v61 }
 0x807   :  { %4422 = vmatprep.subr.bf16.mxu1 %v4627_v63 }
 0x809   :  { %4366 = vmatpush1.bf16.msra.mxu0 %v6147_v8 }
 0x80a   :  { %4368 = vmatprep.subr.bf16.mxu0 %v6149_v43  ;;  %4424 = vmatpush3.bf16.msra.mxu1 %v6344_v50 }
 0x80b   :  { %4425 = vmatprep.subr.bf16.mxu1 %v4627_v63 }
 0x80d   :  { %4370 = vmatpush1.bf16.msra.mxu0 %v6165_v26 }
 0x80e   :  { %4372 = vmatprep.subr.bf16.mxu0 %v6168_v56  ;;  %4427 = vmatpush3.bf16.msra.mxu1 %v6353_v33 }
 0x80f   :  { %4428 = vmatprep.subr.bf16.mxu1 %v4627_v63 }
 0x811   :  { %4374 = vmatpush1.bf16.msra.mxu0 %v6177_v27 }
 0x812   :  { %4430 = vmatpush3.bf16.msra.mxu1 %v6363_v38 }
 0x814   :  { %2972 = vmatmul.mubr.f32.vlgmr.msra.gmra.mrb[14].mxu0 %v6385_v34 }
 0x8c7   :  { %v2830_v36 = vpop.f32.mrb[22].mxu0  ;;  %v3044_v49 = vpop.f32.mrb[14].mxu1 }
 0x8c8   :  { %v2831_v31 = vadd.f32 %v3240_v3, %v2830_v36  ;;  %v3627_v16 = vpop.f32.mrb[23].mxu0  ;;  %v3046_v14 = vpop.f32.mrb[15].mxu1  ;;  %v4461_v8 = vadd.f32 %v3044_v49, %v5323_v39 }
 0x8c9   :  { %v4462_v26 = vadd.f32 %v3046_v14, %v5326_v51 }
 0x8ca   :  { %3241 = vst [vmem:[%s6453_s8 + $0x30] sm:$0xff] %v2831_v31  ;;  %v3244_v43 = vmul.f32 -1.442695, %v4461_v8 }
 0x8e7   :  { %v2973_v63 = vpop.f32.mrb[14].mxu0 }
 0x8e8   :  { %v4445_v57 = vadd.f32 %v2973_v63, %v5317_v17  ;;  %v2975_v53 = vpop.f32.mrb[15].mxu0 }
 0x8e9   :  { %v4446_v18 = vadd.f32 %v2975_v53, %v5319_v20  ;;  %v2739_v20 = vmul.f32 0.0, %v6378_v25 }
 0x8ea   :  { %v3242_v11 = vmul.f32 -1.442695, %v4445_v57 }
 0x8eb   :  { %v3243_v46 = vmul.f32 -1.442695, %v4446_v18  ;;  %v2740_v7 = vadd.f32 %v2739_v20, %v6381_v1 }
 0x8ec   :  { %4610 = vpow2.f32 %v3242_v11 }
 0x8ed   :  { %4612 = vpow2.f32 %v3243_v46  ;;  %v3088_v51 = vmul.f32 0.0, %v2740_v7 }
 0x8ee   :  { %4614 = vpow2.f32 %v3244_v43 }
 0x8ef   :  { %4616 = vtanh.f32 %v4462_v26 }
 0x8f6   :  { %v4611_v56 = vpop.eup %4610 }
 0x8f7   :  { %v4613_v27 = vpop.eup %4612  ;;  %v3062_v60 = vadd.f32 1.0, %v4611_v56 }
 0x8f8   :  { %v3063_v2 = vadd.f32 1.0, %v4613_v27  ;;  %v4615_v17 = vpop.eup %4614 }
 0x8f9   :  { %4618 = vrcp.f32 %v3062_v60  ;;  %v4617_v32 = vpop.eup %4616  ;;  %v3064_v39 = vadd.f32 1.0, %v4615_v17 }
 0x8fa   :  { %4620 = vrcp.f32 %v3063_v2 }
 0x8fb   :  { %4622 = vrcp.f32 %v3064_v39 }
 0x903   :  { %v4619_v4 = vpop.eup %4618 }
 0x904   :  { %v4621_v29 = vpop.eup %4620  ;;  %v3073_v61 = vmul.f32 %v4619_v4, %v4617_v32 }
 0x905   :  { %v3072_v50 = vmul.f32 %v4621_v29, %v2740_v7  ;;  %v4623_v42 = vpop.eup %4622 }
 0x907   :  { %v3074_v33 = vadd.f32 %v3073_v61, %v3072_v50 }
 0x909   :  { %4624 = vtanh.f32 %v3074_v33  ;;  %v3089_v38 = vadd.f32 %v3088_v51, %v3074_v33 }
 0x90b   :  { %3188 = vst [vmem:[%s6454_s10] sm:$0xff] %v3089_v38 }
 0x913   :  { %v4625_v44 = vpop.eup %4624 }
 0x914   :  { %v3076_v52 = vmul.f32 %v4625_v44, %v4623_v42 }
 0x916   :  { %v3086_v6 = vadd.f32 %v3085_v0, %v3076_v52 }
 0x918   :  { %3661 = vmatmul.mubr.f32.vlgmr.msra.gmra.mrb[22].mxu1 %v3086_v6  ;;  %3187 = vst [vmem:[%s6455_s9] sm:$0xff] %v3086_v6 }
 0x9eb   :  { %v3179_v28 = vpop.f32.mrb[22].mxu1 }
 0x9ec   :  { %v3180_v22 = vadd.f32 %v3240_v3, %v3179_v28  ;;  %v3662_v59 = vpop.f32.mrb[23].mxu1 }
 0x9ee   :  { %3246 = vst [vmem:[%s6453_s8 + $0x38] sm:$0xff] %v3180_v22 }

</bundles_post_ra>
